<compile_context>
chip_gen: v7x
topology: tpu7x:2x2x1
jax: 0.10.0
libtpu: 0.0.40
codegen_flags: <defaults>
</compile_context>

<pallas_src>
import functools
import math

import jax
import jax.numpy as jnp
from jax import lax
from jax.experimental import pallas as pl
from jax.experimental.pallas import tpu as pltpu

_CONV1_OUT = 32                      # Conv1d(frames->32, k=5, s=2, p=1): 512 -> 255
_CONV2_OUT = 32                      # Conv1d(32->32,    k=3, s=2, p=1): 255 -> 128
_CONV2_LEN = 128
_FC1_IN = _CONV2_OUT * _CONV2_LEN    # 4096
_FC1_OUT = 256
_FC2_OUT = 128


# ------------------------------ fused Pallas kernel ---------------------------------

def _fused_kernel(xqt_ref, gs_ref, b0t_ref, b1t_ref, bz1_ref, c0t_ref, c1t_ref,
                  b2c_ref, fc1w_ref, fc1b_ref, fc2wa_ref, fc2wgs_ref, fc2b_ref,
                  hw_ref, hb_ref, logstd_ref, noise_ref,
                  act_ref, logp_ref, mean_ref, aflat_ref,
                  *, n_samples, action_space):
    """conv1 -> conv2 -> fc1 -> fc2 -> heads -> sample -> logprob, all in VMEM.

    Both stride-2 Conv1d layers are evaluated as two unit-stride "shifted" matmuls:
    the input is quad-packed host-side (4 consecutive positions per column group),
    conv1 emits paired even/odd output positions per column, and conv2 then only ever
    needs columns r and r+1.  All tap/parity bookkeeping lives in the repacked
    weights (b0t/b1t/c0t/c1t), built once at init.
    """
    b0t = b0t_ref[...]          # (64, 4F)   conv1 taps hitting quad r-1
    b1t = b1t_ref[...]          # (64, 4F)   conv1 taps hitting quad r
    bz1 = bz1_ref[...]          # (64, 1)    conv1 bias, duplicated for the pair
    c0t = c0t_ref[...]          # (32, 64)   conv2 tap hitting pair column r
    c1t = c1t_ref[...]          # (32, 64)   conv2 taps hitting pair column r+1
    b2c = b2c_ref[...]          # (32, 1)

    # relu(conv1)[255] does not exist (it is conv2's right padding) -> zero the odd
    # half of the last pair column.
    row = lax.broadcasted_iota(jnp.int32, (2 * _CONV1_OUT, _CONV2_LEN), 0)
    col = lax.broadcasted_iota(jnp.int32, (2 * _CONV1_OUT, _CONV2_LEN), 1)
    right_pad = jnp.logical_and(row >= _CONV1_OUT, col == _CONV2_LEN - 1)
    zero_col = jnp.zeros((2 * _CONV1_OUT, 1), jnp.float32)

    # Per-sample conv stack (unrolled; intended for the small actor batches this
    # module runs with -- larger batches only grow this loop, the tail is one dot).
    for n in range(n_samples):
        xq = xqt_ref[n]                               # (4F, 129), quads in lanes
        # conv1 + ReLU: pair columns r = 1..128 of Z1^T (64 "pair channels", 128 pos)
        z = (jnp.dot(b0t, xq[:, 0:128], preferred_element_type=jnp.float32)
             + jnp.dot(b1t, xq[:, 1:129], preferred_element_type=jnp.float32)
             + bz1)
        z = jnp.maximum(z, 0.0)
        z = jnp.where(right_pad, 0.0, z)
        # pair column r = 0 is conv2's left padding (all zeros)
        z_prev = jnp.concatenate([zero_col, z[:, 0:127]], axis=1)    # columns 0..127
        # conv2 + ReLU: (32 channels, 128 positions) -- lane-dense
        y2 = (jnp.dot(c0t, z_prev, preferred_element_type=jnp.float32)
              + jnp.dot(c1t, z, preferred_element_type=jnp.float32)
              + b2c)
        y2 = jnp.maximum(y2, 0.0)
        # channel-major flatten (== PyTorch .view(N, -1)) written lane-dense into the
        # (N, 4096) VMEM slab feeding fc1: each store is one aligned 128-lane row.
        for c in range(_CONV2_OUT):
            aflat_ref[n:n + 1, c * _CONV2_LEN:(c + 1) * _CONV2_LEN] = y2[c:c + 1, :]

    # fc1 (+ReLU): the single 2 MiB bf16 weight DMA is this kernel's cost floor.
    a_flat = aflat_ref[...].astype(jnp.bfloat16)                     # (N, 4096)
    h1 = jnp.dot(a_flat, fc1w_ref[...], preferred_element_type=jnp.float32)
    h1 = jnp.maximum(h1 + fc1b_ref[...], 0.0)

    # fc2 (+ReLU) on [h1, goal, speed]: fc2 weight split host-side -> no lane concat.
    h2 = (jnp.dot(h1, fc2wa_ref[...], preferred_element_type=jnp.float32)
          + jnp.dot(gs_ref[...], fc2wgs_ref[...], preferred_element_type=jnp.float32)
          + fc2b_ref[...])
    h2 = jnp.maximum(h2, 0.0)

    # actor1 / actor2 as one (128, 2A) matmul; sigmoid on first A cols, tanh on rest.
    m = jnp.dot(h2, hw_ref[...], preferred_element_type=jnp.float32) + hb_ref[...]
    hcol = lax.broadcasted_iota(jnp.int32, m.shape, 1)
    mean = jnp.where(hcol < action_space, jax.nn.sigmoid(m), jnp.tanh(m))

    # torch.normal(mean, std) with an externally drawn unit-normal; since
    # action = mean + std * noise, the normalized residual equals the noise exactly,
    # so the log-density needs no divide.
    logstd = logstd_ref[...]
    noise = noise_ref[...]
    action = mean + jnp.exp(logstd) * noise
    log_density = -0.5 * noise * noise - 0.5 * math.log(2.0 * math.pi) - logstd

    act_ref[...] = action
    logp_ref[...] = jnp.sum(log_density, axis=-1, keepdims=True)
    mean_ref[...] = mean


def _fused_forward_call(xqt, gs, noise, prep, *, n_samples, action_space):
    a2 = 2 * action_space
    f4 = xqt.shape[1]                                  # 4 * frames
    kernel = functools.partial(_fused_kernel, n_samples=n_samples,
                               action_space=action_space)
    operands = [xqt, gs, prep["b0t"], prep["b1t"], prep["bz1"], prep["c0t"],
                prep["c1t"], prep["b2c"], prep["fc1_w"], prep["fc1_b"],
                prep["fc2_w_a"], prep["fc2_w_gs"], prep["fc2_b"],
                prep["head_w"], prep["head_b"], prep["logstd"], noise]

    flops = int(n_samples * (2 * 2 * 64 * f4 * _CONV2_LEN            # conv1
                             + 2 * 2 * _CONV2_OUT * 64 * _CONV2_LEN  # conv2
                             + 2 * _FC1_IN * _FC1_OUT                # fc1
                             + 2 * (_FC1_OUT + 4) * _FC2_OUT         # fc2
                             + 2 * _FC2_OUT * a2))                   # heads
    bytes_accessed = int(sum(int(op.size) * op.dtype.itemsize for op in operands)
                         + n_samples * (2 * a2 + 1) * 4)
    transcendentals = int(3 * n_samples * a2)

    return pl.pallas_call(
        kernel,
        out_shape=(jax.ShapeDtypeStruct((n_samples, a2), jnp.float32),
                   jax.ShapeDtypeStruct((n_samples, 1), jnp.float32),
                   jax.ShapeDtypeStruct((n_samples, a2), jnp.float32)),
        scratch_shapes=[pltpu.VMEM((n_samples, _FC1_IN), jnp.float32)],
        cost_estimate=pl.CostEstimate(flops=flops,
                                      transcendentals=transcendentals,
                                      bytes_accessed=bytes_accessed),
    )(*operands)


# ------------------------------ parameter handling -----------------------------------

def init_params(key, frames, msg_action_space):
    """PyTorch-layout parameters (Conv1d: (Cout,Cin,K); Linear stored as (in,out))."""
    def uniform(k, shape, fan_in):
        bound = 1.0 / math.sqrt(fan_in)
        return jax.random.uniform(k, shape, jnp.float32, -bound, bound)

    ks = jax.random.split(key, 12)
    p = {}
    p["cv1_w"] = uniform(ks[0], (_CONV1_OUT, frames, 5), frames * 5)
    p["cv1_b"] = uniform(ks[1], (_CONV1_OUT,), frames * 5)
    p["cv2_w"] = uniform(ks[2], (_CONV2_OUT, _CONV1_OUT, 3), _CONV1_OUT * 3)
    p["cv2_b"] = uniform(ks[3], (_CONV2_OUT,), _CONV1_OUT * 3)
    p["fc1_w"] = uniform(ks[4], (_FC1_IN, _FC1_OUT), _FC1_IN)
    p["fc1_b"] = uniform(ks[5], (_FC1_OUT,), _FC1_IN)
    p["fc2_w"] = uniform(ks[6], (_FC1_OUT + 4, _FC2_OUT), _FC1_OUT + 4)
    p["fc2_b"] = uniform(ks[7], (_FC2_OUT,), _FC1_OUT + 4)
    p["a1_w"] = uniform(ks[8], (_FC2_OUT, msg_action_space), _FC2_OUT)
    p["a1_b"] = uniform(ks[9], (msg_action_space,), _FC2_OUT)
    p["a2_w"] = uniform(ks[10], (_FC2_OUT, msg_action_space), _FC2_OUT)
    p["a2_b"] = uniform(ks[11], (msg_action_space,), _FC2_OUT)
    p["logstd"] = jnp.zeros((2 * msg_action_space,), jnp.float32)
    return p


def prepare_params(p, *, frames):
    """One-time weight repacking so both stride-2 convs become shifted matmuls.

    Pair row r of conv1's repacked output holds [y1[2r-2] | y1[2r-1]]; b0t/b1t are the
    taps hitting input quad r-1 / r, c0t/c1t the conv2 taps hitting pair column r / r+1.
    """
    F = frames
    w1 = p["cv1_w"]                                        # (32, F, 5)
    b0t = jnp.zeros((2 * _CONV1_OUT, 4 * F), jnp.float32)
    b0t = b0t.at[0:32, 1 * F:2 * F].set(w1[:, :, 0])       # even out, tap0 @ slot1
    b0t = b0t.at[0:32, 2 * F:3 * F].set(w1[:, :, 1])       # even out, tap1 @ slot2
    b0t = b0t.at[0:32, 3 * F:4 * F].set(w1[:, :, 2])       # even out, tap2 @ slot3
    b0t = b0t.at[32:64, 3 * F:4 * F].set(w1[:, :, 0])      # odd  out, tap0 @ slot3
    b1t = jnp.zeros((2 * _CONV1_OUT, 4 * F), jnp.float32)
    b1t = b1t.at[0:32, 0 * F:1 * F].set(w1[:, :, 3])       # even out, tap3 @ slot0
    b1t = b1t.at[0:32, 1 * F:2 * F].set(w1[:, :, 4])       # even out, tap4 @ slot1
    b1t = b1t.at[32:64, 0 * F:1 * F].set(w1[:, :, 1])      # odd  out, tap1 @ slot0
    b1t = b1t.at[32:64, 1 * F:2 * F].set(w1[:, :, 2])      # odd  out, tap2 @ slot1
    b1t = b1t.at[32:64, 2 * F:3 * F].set(w1[:, :, 3])      # odd  out, tap3 @ slot2
    b1t = b1t.at[32:64, 3 * F:4 * F].set(w1[:, :, 4])      # odd  out, tap4 @ slot3
    bz1 = jnp.concatenate([p["cv1_b"], p["cv1_b"]]).reshape(2 * _CONV1_OUT, 1)

    w2 = p["cv2_w"]                                        # (32, 32, 3)
    c0t = jnp.concatenate([jnp.zeros((_CONV2_OUT, _CONV1_OUT), jnp.float32),
                           w2[:, :, 0]], axis=1)           # tap0 hits the odd half
    c1t = jnp.concatenate([w2[:, :, 1], w2[:, :, 2]], axis=1)
    b2c = p["cv2_b"].reshape(_CONV2_OUT, 1)

    return dict(
        b0t=b0t, b1t=b1t, bz1=bz1, c0t=c0t, c1t=c1t, b2c=b2c,
        fc1_w=p["fc1_w"].astype(jnp.bfloat16),             # halve the dominant HBM DMA
        fc1_b=p["fc1_b"].reshape(1, _FC1_OUT),
        fc2_w_a=p["fc2_w"][:_FC1_OUT],                     # rows for the 256-d features
        fc2_w_gs=p["fc2_w"][_FC1_OUT:],                    # rows for [goal(2), speed(2)]
        fc2_b=p["fc2_b"].reshape(1, _FC2_OUT),
        head_w=jnp.concatenate([p["a1_w"], p["a2_w"]], axis=1),
        head_b=jnp.concatenate([p["a1_b"], p["a2_b"]]).reshape(1, -1),
        logstd=p["logstd"].reshape(1, -1),
    )


# ---------------------------------- forward -----------------------------------------

def message_actor_forward(prep, x, goal, speed, noise_key, *,
                          frames, n_agent, msg_action_space):
    x = x.reshape(-1, frames, 512)
    N = x.shape[0]
    B = N // n_agent
    A2 = 2 * msg_action_space

    # Quad-pack the observation (positions -2..513, zeros outside [0, 512)) so the
    # stride-2 conv taps become unit-stride column shifts inside the kernel.  This is
    # the only host-side layout op (one pad + one transpose on a 24 KiB tensor).
    xp = jnp.pad(x, ((0, 0), (0, 0), (2, 2)))                       # (N, F, 516)
    xq = xp.reshape(N, frames, 129, 4)
    xqt = jnp.transpose(xq, (0, 3, 1, 2)).reshape(N, 4 * frames, 129)

    if goal.ndim < 3:
        goal = goal[None]
    if speed.ndim < 3:
        speed = speed[None]
    assert goal.shape == (B, n_agent, 2) and speed.shape == (B, n_agent, 2), \
        "goal/speed must be (batch, n_agent, 2) after the unsqueeze"
    gs = jnp.concatenate([goal, speed], axis=-1).reshape(N, 4)

    # torch.normal(mean, std): deterministic unit-Gaussian noise drawn here, combined
    # with mean/std and the log-density inside the fused kernel.
    # TODO(synk): could use in-kernel pltpu.prng_* instead; kept external so the
    # random stream stays a plain jax.random stream.
    noise = jax.random.normal(noise_key, (N, A2), jnp.float32)

    action2d, logp2d, mean2d = _fused_forward_call(
        xqt, gs, noise, prep, n_samples=N, action_space=msg_action_space)
    return (action2d.reshape(B, n_agent, A2),
            logp2d.reshape(B, n_agent, 1),
            mean2d.reshape(B, n_agent, A2))


# ----------------------------- pure-JAX reference ------------------------------------

def _reference_forward(p, x, goal, speed, noise, *, frames, n_agent):
    hp = lax.Precision.HIGHEST
    x = x.reshape(-1, frames, 512)
    a = lax.conv_general_dilated(x, p["cv1_w"], window_strides=(2,), padding=[(1, 1)],
                                 dimension_numbers=("NCH", "OIH", "NCH"), precision=hp)
    a = jnp.maximum(a + p["cv1_b"][None, :, None], 0.0)
    a = lax.conv_general_dilated(a, p["cv2_w"], window_strides=(2,), padding=[(1, 1)],
                                 dimension_numbers=("NCH", "OIH", "NCH"), precision=hp)
    a = jnp.maximum(a + p["cv2_b"][None, :, None], 0.0)
    a = a.reshape(a.shape[0], -1)
    a = jnp.maximum(jnp.dot(a, p["fc1_w"], precision=hp) + p["fc1_b"], 0.0)
    B = a.shape[0] // n_agent
    a = a.reshape(B, n_agent, _FC1_OUT)
    if goal.ndim < 3:
        goal = goal[None]
    if speed.ndim < 3:
        speed = speed[None]
    a = jnp.concatenate([a, goal, speed], axis=-1)
    a = jnp.maximum(jnp.dot(a, p["fc2_w"], precision=hp) + p["fc2_b"], 0.0)
    m1 = jax.nn.sigmoid(jnp.dot(a, p["a1_w"], precision=hp) + p["a1_b"])
    m2 = jnp.tanh(jnp.dot(a, p["a2_w"], precision=hp) + p["a2_b"])
    mean = jnp.concatenate([m1, m2], axis=-1)
    z = noise.reshape(mean.shape)
    logstd = p["logstd"]
    action = mean + jnp.exp(logstd) * z
    logp = jnp.sum(-0.5 * z * z - 0.5 * math.log(2.0 * math.pi) - logstd,
                   axis=-1, keepdims=True)
    return action, logp, mean


if __name__ == "__main__":
    frames, msg_action_space, n_agent = 3, 2, 2
    B = 2  # batch of agent-groups

    key = jax.random.PRNGKey(0)
    kx, kg, ksp, kn, kp = jax.random.split(key, 5)

    # length 512 is fixed by the module (act_fc1 expects 128*32 features)
    x = jax.random.normal(kx, (B * n_agent, frames, 512), jnp.float32)
    goal = jax.random.normal(kg, (B, n_agent, 2), jnp.float32)
    speed = jax.random.normal(ksp, (B, n_agent, 2), jnp.float32)

    torch_layout_params = init_params(kp, frames, msg_action_space)
    prep = prepare_params(torch_layout_params, frames=frames)

    fwd = jax.jit(functools.partial(message_actor_forward, frames=frames,
                                    n_agent=n_agent,
                                    msg_action_space=msg_action_space))
    action, logprob, mean = fwd(prep, x, goal, speed, kn)
    jax.block_until_ready((action, logprob, mean))

    assert action.shape == (B, n_agent, 2 * msg_action_space)
    assert logprob.shape == (B, n_agent, 1)
    assert mean.shape == (B, n_agent, 2 * msg_action_space)

    # Parity against a pure-JAX f32 reference (fc1 runs in bf16 inside the kernel,
    # hence the loose tolerance on mean/action; the log-prob math is exact).
    noise = jax.random.normal(kn, (B * n_agent, 2 * msg_action_space), jnp.float32)
    ref_action, ref_logp, ref_mean = _reference_forward(
        torch_layout_params, x, goal, speed, noise, frames=frames, n_agent=n_agent)
    assert float(jnp.max(jnp.abs(mean - ref_mean))) < 3e-2
    assert float(jnp.max(jnp.abs(action - ref_action))) < 3e-2
    assert float(jnp.max(jnp.abs(logprob - ref_logp))) < 1e-3
    assert bool(jnp.all(jnp.isfinite(action))) and bool(jnp.all(jnp.isfinite(logprob)))
    print("KERNEL_OK")
</pallas_src>

<mosaic_0001>
module attributes {stable_mosaic.version = 11 : i64} {
  func.func @_fused_kernel(%arg0: memref<4x12x129xf32, #tpu.memory_space<vmem>>, %arg1: memref<4x4xf32, #tpu.memory_space<vmem>>, %arg2: memref<64x12xf32, #tpu.memory_space<vmem>>, %arg3: memref<64x12xf32, #tpu.memory_space<vmem>>, %arg4: memref<64x1xf32, #tpu.memory_space<vmem>>, %arg5: memref<32x64xf32, #tpu.memory_space<vmem>>, %arg6: memref<32x64xf32, #tpu.memory_space<vmem>>, %arg7: memref<32x1xf32, #tpu.memory_space<vmem>>, %arg8: memref<4096x256xbf16, #tpu.memory_space<vmem>>, %arg9: memref<1x256xf32, #tpu.memory_space<vmem>>, %arg10: memref<256x128xf32, #tpu.memory_space<vmem>>, %arg11: memref<4x128xf32, #tpu.memory_space<vmem>>, %arg12: memref<1x128xf32, #tpu.memory_space<vmem>>, %arg13: memref<128x4xf32, #tpu.memory_space<vmem>>, %arg14: memref<1x4xf32, #tpu.memory_space<vmem>>, %arg15: memref<1x4xf32, #tpu.memory_space<vmem>>, %arg16: memref<4x4xf32, #tpu.memory_space<vmem>>, %arg17: memref<4x4xf32, #tpu.memory_space<vmem>>, %arg18: memref<4x1xf32, #tpu.memory_space<vmem>>, %arg19: memref<4x4xf32, #tpu.memory_space<vmem>>, %arg20: memref<4x4096xf32, #tpu.memory_space<vmem>>) attributes {dimension_semantics = [], scalar_prefetch = 0 : i64, scratch_operands = 1 : i64, tpu.core_type = #tpu.core_type<tc>} {
    %c0 = arith.constant 0 : index
    %c0_0 = arith.constant 0 : index
    %0 = vector.load %arg2[%c0, %c0_0] : memref<64x12xf32, #tpu.memory_space<vmem>>, vector<64x12xf32>
    %c0_1 = arith.constant 0 : index
    %c0_2 = arith.constant 0 : index
    %1 = vector.load %arg3[%c0_1, %c0_2] : memref<64x12xf32, #tpu.memory_space<vmem>>, vector<64x12xf32>
    %c0_3 = arith.constant 0 : index
    %c0_4 = arith.constant 0 : index
    %2 = vector.load %arg4[%c0_3, %c0_4] : memref<64x1xf32, #tpu.memory_space<vmem>>, vector<64x1xf32>
    %c0_5 = arith.constant 0 : index
    %c0_6 = arith.constant 0 : index
    %3 = vector.load %arg5[%c0_5, %c0_6] : memref<32x64xf32, #tpu.memory_space<vmem>>, vector<32x64xf32>
    %c0_7 = arith.constant 0 : index
    %c0_8 = arith.constant 0 : index
    %4 = vector.load %arg6[%c0_7, %c0_8] : memref<32x64xf32, #tpu.memory_space<vmem>>, vector<32x64xf32>
    %c0_9 = arith.constant 0 : index
    %c0_10 = arith.constant 0 : index
    %5 = vector.load %arg7[%c0_9, %c0_10] : memref<32x1xf32, #tpu.memory_space<vmem>>, vector<32x1xf32>
    %6 = tpu.iota {dimensions = array<i32: 0>} : vector<64x128xi32>
    %7 = tpu.iota {dimensions = array<i32: 1>} : vector<64x128xi32>
    %c32_i32 = arith.constant 32 : i32
    %8 = vector.broadcast %c32_i32 : i32 to vector<64x128xi32>
    %9 = arith.cmpi sge, %6, %8 : vector<64x128xi32>
    %c127_i32 = arith.constant 127 : i32
    %10 = vector.broadcast %c127_i32 : i32 to vector<64x128xi32>
    %11 = arith.cmpi eq, %7, %10 : vector<64x128xi32>
    %12 = arith.andi %9, %11 : vector<64x128xi1>
    %cst = arith.constant 0.000000e+00 : f32
    %13 = vector.broadcast %cst : f32 to vector<64x1xf32>
    %c0_11 = arith.constant 0 : index
    %c0_12 = arith.constant 0 : index
    %c0_13 = arith.constant 0 : index
    %14 = vector.load %arg0[%c0_11, %c0_12, %c0_13] : memref<4x12x129xf32, #tpu.memory_space<vmem>>, vector<1x12x129xf32>
    %15 = vector.shape_cast %14 : vector<1x12x129xf32> to vector<12x129xf32>
    %16 = vector.extract_strided_slice %15 {offsets = [0, 0], sizes = [12, 128], strides = [1, 1]} : vector<12x129xf32> to vector<12x128xf32>
    %cst_14 = arith.constant dense<0.000000e+00> : vector<64x128xf32>
    %17 = tpu.matmul %0, %16, %cst_14 {dimension_numbers = #tpu.dot_dimension_numbers<[1], [0], [0], [1], [0, 0, 1, 1], [], []>} : vector<64x12xf32>, vector<12x128xf32>, vector<64x128xf32> -> vector<64x128xf32>
    %18 = vector.extract_strided_slice %15 {offsets = [0, 1], sizes = [12, 128], strides = [1, 1]} : vector<12x129xf32> to vector<12x128xf32>
    %cst_15 = arith.constant dense<0.000000e+00> : vector<64x128xf32>
    %19 = tpu.matmul %1, %18, %cst_15 {dimension_numbers = #tpu.dot_dimension_numbers<[1], [0], [0], [1], [0, 0, 1, 1], [], []>} : vector<64x12xf32>, vector<12x128xf32>, vector<64x128xf32> -> vector<64x128xf32>
    %20 = arith.addf %17, %19 : vector<64x128xf32>
    %21 = vector.broadcast %2 : vector<64x1xf32> to vector<64x128xf32>
    %22 = arith.addf %20, %21 : vector<64x128xf32>
    %cst_16 = arith.constant 0.000000e+00 : f32
    %23 = vector.broadcast %cst_16 : f32 to vector<64x128xf32>
    %24 = arith.maximumf %22, %23 : vector<64x128xf32>
    %cst_17 = arith.constant 0.000000e+00 : f32
    %25 = vector.broadcast %cst_17 : f32 to vector<64x128xf32>
    %26 = arith.select %12, %25, %24 : vector<64x128xi1>, vector<64x128xf32>
    %27 = vector.extract_strided_slice %26 {offsets = [0, 0], sizes = [64, 127], strides = [1, 1]} : vector<64x128xf32> to vector<64x127xf32>
    %28 = tpu.concatenate %13, %27 in 1 : vector<64x1xf32>, vector<64x127xf32> -> vector<64x128xf32>
    %cst_18 = arith.constant dense<0.000000e+00> : vector<32x128xf32>
    %29 = tpu.matmul %3, %28, %cst_18 {dimension_numbers = #tpu.dot_dimension_numbers<[1], [0], [0], [1], [0, 0, 1, 1], [], []>} : vector<32x64xf32>, vector<64x128xf32>, vector<32x128xf32> -> vector<32x128xf32>
    %cst_19 = arith.constant dense<0.000000e+00> : vector<32x128xf32>
    %30 = tpu.matmul %4, %26, %cst_19 {dimension_numbers = #tpu.dot_dimension_numbers<[1], [0], [0], [1], [0, 0, 1, 1], [], []>} : vector<32x64xf32>, vector<64x128xf32>, vector<32x128xf32> -> vector<32x128xf32>
    %31 = arith.addf %29, %30 : vector<32x128xf32>
    %32 = vector.broadcast %5 : vector<32x1xf32> to vector<32x128xf32>
    %33 = arith.addf %31, %32 : vector<32x128xf32>
    %cst_20 = arith.constant 0.000000e+00 : f32
    %34 = vector.broadcast %cst_20 : f32 to vector<32x128xf32>
    %35 = arith.maximumf %33, %34 : vector<32x128xf32>
    %36 = vector.extract_strided_slice %35 {offsets = [0, 0], sizes = [1, 128], strides = [1, 1]} : vector<32x128xf32> to vector<1x128xf32>
    %c0_21 = arith.constant 0 : index
    %c0_22 = arith.constant 0 : index
    %37 = vector.load %arg20[%c0_21, %c0_22] : memref<4x4096xf32, #tpu.memory_space<vmem>>, vector<1x128xf32>
    tpu.vector_store %arg20[%c0_21, %c0_22], %36 {strides = array<i32>} : memref<4x4096xf32, #tpu.memory_space<vmem>>, vector<1x128xf32>,
    %38 = vector.extract_strided_slice %35 {offsets = [1, 0], sizes = [1, 128], strides = [1, 1]} : vector<32x128xf32> to vector<1x128xf32>
    %c0_23 = arith.constant 0 : index
    %c128 = arith.constant 128 : index
    %39 = vector.load %arg20[%c0_23, %c128] : memref<4x4096xf32, #tpu.memory_space<vmem>>, vector<1x128xf32>
    tpu.vector_store %arg20[%c0_23, %c128], %38 {strides = array<i32>} : memref<4x4096xf32, #tpu.memory_space<vmem>>, vector<1x128xf32>,
    %40 = vector.extract_strided_slice %35 {offsets = [2, 0], sizes = [1, 128], strides = [1, 1]} : vector<32x128xf32> to vector<1x128xf32>
    %c0_24 = arith.constant 0 : index
    %c256 = arith.constant 256 : index
    %41 = vector.load %arg20[%c0_24, %c256] : memref<4x4096xf32, #tpu.memory_space<vmem>>, vector<1x128xf32>
    tpu.vector_store %arg20[%c0_24, %c256], %40 {strides = array<i32>} : memref<4x4096xf32, #tpu.memory_space<vmem>>, vector<1x128xf32>,
    %42 = vector.extract_strided_slice %35 {offsets = [3, 0], sizes = [1, 128], strides = [1, 1]} : vector<32x128xf32> to vector<1x128xf32>
    %c0_25 = arith.constant 0 : index
    %c384 = arith.constant 384 : index
    %43 = vector.load %arg20[%c0_25, %c384] : memref<4x4096xf32, #tpu.memory_space<vmem>>, vector<1x128xf32>
    tpu.vector_store %arg20[%c0_25, %c384], %42 {strides = array<i32>} : memref<4x4096xf32, #tpu.memory_space<vmem>>, vector<1x128xf32>,
    %44 = vector.extract_strided_slice %35 {offsets = [4, 0], sizes = [1, 128], strides = [1, 1]} : vector<32x128xf32> to vector<1x128xf32>
    %c0_26 = arith.constant 0 : index
    %c512 = arith.constant 512 : index
    %45 = vector.load %arg20[%c0_26, %c512] : memref<4x4096xf32, #tpu.memory_space<vmem>>, vector<1x128xf32>
    tpu.vector_store %arg20[%c0_26, %c512], %44 {strides = array<i32>} : memref<4x4096xf32, #tpu.memory_space<vmem>>, vector<1x128xf32>,
    %46 = vector.extract_strided_slice %35 {offsets = [5, 0], sizes = [1, 128], strides = [1, 1]} : vector<32x128xf32> to vector<1x128xf32>
    %c0_27 = arith.constant 0 : index
    %c640 = arith.constant 640 : index
    %47 = vector.load %arg20[%c0_27, %c640] : memref<4x4096xf32, #tpu.memory_space<vmem>>, vector<1x128xf32>
    tpu.vector_store %arg20[%c0_27, %c640], %46 {strides = array<i32>} : memref<4x4096xf32, #tpu.memory_space<vmem>>, vector<1x128xf32>,
    %48 = vector.extract_strided_slice %35 {offsets = [6, 0], sizes = [1, 128], strides = [1, 1]} : vector<32x128xf32> to vector<1x128xf32>
    %c0_28 = arith.constant 0 : index
    %c768 = arith.constant 768 : index
    %49 = vector.load %arg20[%c0_28, %c768] : memref<4x4096xf32, #tpu.memory_space<vmem>>, vector<1x128xf32>
    tpu.vector_store %arg20[%c0_28, %c768], %48 {strides = array<i32>} : memref<4x4096xf32, #tpu.memory_space<vmem>>, vector<1x128xf32>,
    %50 = vector.extract_strided_slice %35 {offsets = [7, 0], sizes = [1, 128], strides = [1, 1]} : vector<32x128xf32> to vector<1x128xf32>
    %c0_29 = arith.constant 0 : index
    %c896 = arith.constant 896 : index
    %51 = vector.load %arg20[%c0_29, %c896] : memref<4x4096xf32, #tpu.memory_space<vmem>>, vector<1x128xf32>
    tpu.vector_store %arg20[%c0_29, %c896], %50 {strides = array<i32>} : memref<4x4096xf32, #tpu.memory_space<vmem>>, vector<1x128xf32>,
    %52 = vector.extract_strided_slice %35 {offsets = [8, 0], sizes = [1, 128], strides = [1, 1]} : vector<32x128xf32> to vector<1x128xf32>
    %c0_30 = arith.constant 0 : index
    %c1024 = arith.constant 1024 : index
    %53 = vector.load %arg20[%c0_30, %c1024] : memref<4x4096xf32, #tpu.memory_space<vmem>>, vector<1x128xf32>
    tpu.vector_store %arg20[%c0_30, %c1024], %52 {strides = array<i32>} : memref<4x4096xf32, #tpu.memory_space<vmem>>, vector<1x128xf32>,
    %54 = vector.extract_strided_slice %35 {offsets = [9, 0], sizes = [1, 128], strides = [1, 1]} : vector<32x128xf32> to vector<1x128xf32>
    %c0_31 = arith.constant 0 : index
    %c1152 = arith.constant 1152 : index
    %55 = vector.load %arg20[%c0_31, %c1152] : memref<4x4096xf32, #tpu.memory_space<vmem>>, vector<1x128xf32>
    tpu.vector_store %arg20[%c0_31, %c1152], %54 {strides = array<i32>} : memref<4x4096xf32, #tpu.memory_space<vmem>>, vector<1x128xf32>,
    %56 = vector.extract_strided_slice %35 {offsets = [10, 0], sizes = [1, 128], strides = [1, 1]} : vector<32x128xf32> to vector<1x128xf32>
    %c0_32 = arith.constant 0 : index
    %c1280 = arith.constant 1280 : index
    %57 = vector.load %arg20[%c0_32, %c1280] : memref<4x4096xf32, #tpu.memory_space<vmem>>, vector<1x128xf32>
    tpu.vector_store %arg20[%c0_32, %c1280], %56 {strides = array<i32>} : memref<4x4096xf32, #tpu.memory_space<vmem>>, vector<1x128xf32>,
    %58 = vector.extract_strided_slice %35 {offsets = [11, 0], sizes = [1, 128], strides = [1, 1]} : vector<32x128xf32> to vector<1x128xf32>
    %c0_33 = arith.constant 0 : index
    %c1408 = arith.constant 1408 : index
    %59 = vector.load %arg20[%c0_33, %c1408] : memref<4x4096xf32, #tpu.memory_space<vmem>>, vector<1x128xf32>
    tpu.vector_store %arg20[%c0_33, %c1408], %58 {strides = array<i32>} : memref<4x4096xf32, #tpu.memory_space<vmem>>, vector<1x128xf32>,
    %60 = vector.extract_strided_slice %35 {offsets = [12, 0], sizes = [1, 128], strides = [1, 1]} : vector<32x128xf32> to vector<1x128xf32>
    %c0_34 = arith.constant 0 : index
    %c1536 = arith.constant 1536 : index
    %61 = vector.load %arg20[%c0_34, %c1536] : memref<4x4096xf32, #tpu.memory_space<vmem>>, vector<1x128xf32>
    tpu.vector_store %arg20[%c0_34, %c1536], %60 {strides = array<i32>} : memref<4x4096xf32, #tpu.memory_space<vmem>>, vector<1x128xf32>,
    %62 = vector.extract_strided_slice %35 {offsets = [13, 0], sizes = [1, 128], strides = [1, 1]} : vector<32x128xf32> to vector<1x128xf32>
    %c0_35 = arith.constant 0 : index
    %c1664 = arith.constant 1664 : index
    %63 = vector.load %arg20[%c0_35, %c1664] : memref<4x4096xf32, #tpu.memory_space<vmem>>, vector<1x128xf32>
    tpu.vector_store %arg20[%c0_35, %c1664], %62 {strides = array<i32>} : memref<4x4096xf32, #tpu.memory_space<vmem>>, vector<1x128xf32>,
    %64 = vector.extract_strided_slice %35 {offsets = [14, 0], sizes = [1, 128], strides = [1, 1]} : vector<32x128xf32> to vector<1x128xf32>
    %c0_36 = arith.constant 0 : index
    %c1792 = arith.constant 1792 : index
    %65 = vector.load %arg20[%c0_36, %c1792] : memref<4x4096xf32, #tpu.memory_space<vmem>>, vector<1x128xf32>
    tpu.vector_store %arg20[%c0_36, %c1792], %64 {strides = array<i32>} : memref<4x4096xf32, #tpu.memory_space<vmem>>, vector<1x128xf32>,
    %66 = vector.extract_strided_slice %35 {offsets = [15, 0], sizes = [1, 128], strides = [1, 1]} : vector<32x128xf32> to vector<1x128xf32>
    %c0_37 = arith.constant 0 : index
    %c1920 = arith.constant 1920 : index
    %67 = vector.load %arg20[%c0_37, %c1920] : memref<4x4096xf32, #tpu.memory_space<vmem>>, vector<1x128xf32>
    tpu.vector_store %arg20[%c0_37, %c1920], %66 {strides = array<i32>} : memref<4x4096xf32, #tpu.memory_space<vmem>>, vector<1x128xf32>,
    %68 = vector.extract_strided_slice %35 {offsets = [16, 0], sizes = [1, 128], strides = [1, 1]} : vector<32x128xf32> to vector<1x128xf32>
    %c0_38 = arith.constant 0 : index
    %c2048 = arith.constant 2048 : index
    %69 = vector.load %arg20[%c0_38, %c2048] : memref<4x4096xf32, #tpu.memory_space<vmem>>, vector<1x128xf32>
    tpu.vector_store %arg20[%c0_38, %c2048], %68 {strides = array<i32>} : memref<4x4096xf32, #tpu.memory_space<vmem>>, vector<1x128xf32>,
    %70 = vector.extract_strided_slice %35 {offsets = [17, 0], sizes = [1, 128], strides = [1, 1]} : vector<32x128xf32> to vector<1x128xf32>
    %c0_39 = arith.constant 0 : index
    %c2176 = arith.constant 2176 : index
    %71 = vector.load %arg20[%c0_39, %c2176] : memref<4x4096xf32, #tpu.memory_space<vmem>>, vector<1x128xf32>
    tpu.vector_store %arg20[%c0_39, %c2176], %70 {strides = array<i32>} : memref<4x4096xf32, #tpu.memory_space<vmem>>, vector<1x128xf32>,
    %72 = vector.extract_strided_slice %35 {offsets = [18, 0], sizes = [1, 128], strides = [1, 1]} : vector<32x128xf32> to vector<1x128xf32>
    %c0_40 = arith.constant 0 : index
    %c2304 = arith.constant 2304 : index
    %73 = vector.load %arg20[%c0_40, %c2304] : memref<4x4096xf32, #tpu.memory_space<vmem>>, vector<1x128xf32>
    tpu.vector_store %arg20[%c0_40, %c2304], %72 {strides = array<i32>} : memref<4x4096xf32, #tpu.memory_space<vmem>>, vector<1x128xf32>,
    %74 = vector.extract_strided_slice %35 {offsets = [19, 0], sizes = [1, 128], strides = [1, 1]} : vector<32x128xf32> to vector<1x128xf32>
    %c0_41 = arith.constant 0 : index
    %c2432 = arith.constant 2432 : index
    %75 = vector.load %arg20[%c0_41, %c2432] : memref<4x4096xf32, #tpu.memory_space<vmem>>, vector<1x128xf32>
    tpu.vector_store %arg20[%c0_41, %c2432], %74 {strides = array<i32>} : memref<4x4096xf32, #tpu.memory_space<vmem>>, vector<1x128xf32>,
    %76 = vector.extract_strided_slice %35 {offsets = [20, 0], sizes = [1, 128], strides = [1, 1]} : vector<32x128xf32> to vector<1x128xf32>
    %c0_42 = arith.constant 0 : index
    %c2560 = arith.constant 2560 : index
    %77 = vector.load %arg20[%c0_42, %c2560] : memref<4x4096xf32, #tpu.memory_space<vmem>>, vector<1x128xf32>
    tpu.vector_store %arg20[%c0_42, %c2560], %76 {strides = array<i32>} : memref<4x4096xf32, #tpu.memory_space<vmem>>, vector<1x128xf32>,
    %78 = vector.extract_strided_slice %35 {offsets = [21, 0], sizes = [1, 128], strides = [1, 1]} : vector<32x128xf32> to vector<1x128xf32>
    %c0_43 = arith.constant 0 : index
    %c2688 = arith.constant 2688 : index
    %79 = vector.load %arg20[%c0_43, %c2688] : memref<4x4096xf32, #tpu.memory_space<vmem>>, vector<1x128xf32>
    tpu.vector_store %arg20[%c0_43, %c2688], %78 {strides = array<i32>} : memref<4x4096xf32, #tpu.memory_space<vmem>>, vector<1x128xf32>,
    %80 = vector.extract_strided_slice %35 {offsets = [22, 0], sizes = [1, 128], strides = [1, 1]} : vector<32x128xf32> to vector<1x128xf32>
    %c0_44 = arith.constant 0 : index
    %c2816 = arith.constant 2816 : index
    %81 = vector.load %arg20[%c0_44, %c2816] : memref<4x4096xf32, #tpu.memory_space<vmem>>, vector<1x128xf32>
    tpu.vector_store %arg20[%c0_44, %c2816], %80 {strides = array<i32>} : memref<4x4096xf32, #tpu.memory_space<vmem>>, vector<1x128xf32>,
    %82 = vector.extract_strided_slice %35 {offsets = [23, 0], sizes = [1, 128], strides = [1, 1]} : vector<32x128xf32> to vector<1x128xf32>
    %c0_45 = arith.constant 0 : index
    %c2944 = arith.constant 2944 : index
    %83 = vector.load %arg20[%c0_45, %c2944] : memref<4x4096xf32, #tpu.memory_space<vmem>>, vector<1x128xf32>
    tpu.vector_store %arg20[%c0_45, %c2944], %82 {strides = array<i32>} : memref<4x4096xf32, #tpu.memory_space<vmem>>, vector<1x128xf32>,
    %84 = vector.extract_strided_slice %35 {offsets = [24, 0], sizes = [1, 128], strides = [1, 1]} : vector<32x128xf32> to vector<1x128xf32>
    %c0_46 = arith.constant 0 : index
    %c3072 = arith.constant 3072 : index
    %85 = vector.load %arg20[%c0_46, %c3072] : memref<4x4096xf32, #tpu.memory_space<vmem>>, vector<1x128xf32>
    tpu.vector_store %arg20[%c0_46, %c3072], %84 {strides = array<i32>} : memref<4x4096xf32, #tpu.memory_space<vmem>>, vector<1x128xf32>,
    %86 = vector.extract_strided_slice %35 {offsets = [25, 0], sizes = [1, 128], strides = [1, 1]} : vector<32x128xf32> to vector<1x128xf32>
    %c0_47 = arith.constant 0 : index
    %c3200 = arith.constant 3200 : index
    %87 = vector.load %arg20[%c0_47, %c3200] : memref<4x4096xf32, #tpu.memory_space<vmem>>, vector<1x128xf32>
    tpu.vector_store %arg20[%c0_47, %c3200], %86 {strides = array<i32>} : memref<4x4096xf32, #tpu.memory_space<vmem>>, vector<1x128xf32>,
    %88 = vector.extract_strided_slice %35 {offsets = [26, 0], sizes = [1, 128], strides = [1, 1]} : vector<32x128xf32> to vector<1x128xf32>
    %c0_48 = arith.constant 0 : index
    %c3328 = arith.constant 3328 : index
    %89 = vector.load %arg20[%c0_48, %c3328] : memref<4x4096xf32, #tpu.memory_space<vmem>>, vector<1x128xf32>
    tpu.vector_store %arg20[%c0_48, %c3328], %88 {strides = array<i32>} : memref<4x4096xf32, #tpu.memory_space<vmem>>, vector<1x128xf32>,
    %90 = vector.extract_strided_slice %35 {offsets = [27, 0], sizes = [1, 128], strides = [1, 1]} : vector<32x128xf32> to vector<1x128xf32>
    %c0_49 = arith.constant 0 : index
    %c3456 = arith.constant 3456 : index
    %91 = vector.load %arg20[%c0_49, %c3456] : memref<4x4096xf32, #tpu.memory_space<vmem>>, vector<1x128xf32>
    tpu.vector_store %arg20[%c0_49, %c3456], %90 {strides = array<i32>} : memref<4x4096xf32, #tpu.memory_space<vmem>>, vector<1x128xf32>,
    %92 = vector.extract_strided_slice %35 {offsets = [28, 0], sizes = [1, 128], strides = [1, 1]} : vector<32x128xf32> to vector<1x128xf32>
    %c0_50 = arith.constant 0 : index
    %c3584 = arith.constant 3584 : index
    %93 = vector.load %arg20[%c0_50, %c3584] : memref<4x4096xf32, #tpu.memory_space<vmem>>, vector<1x128xf32>
    tpu.vector_store %arg20[%c0_50, %c3584], %92 {strides = array<i32>} : memref<4x4096xf32, #tpu.memory_space<vmem>>, vector<1x128xf32>,
    %94 = vector.extract_strided_slice %35 {offsets = [29, 0], sizes = [1, 128], strides = [1, 1]} : vector<32x128xf32> to vector<1x128xf32>
    %c0_51 = arith.constant 0 : index
    %c3712 = arith.constant 3712 : index
    %95 = vector.load %arg20[%c0_51, %c3712] : memref<4x4096xf32, #tpu.memory_space<vmem>>, vector<1x128xf32>
    tpu.vector_store %arg20[%c0_51, %c3712], %94 {strides = array<i32>} : memref<4x4096xf32, #tpu.memory_space<vmem>>, vector<1x128xf32>,
    %96 = vector.extract_strided_slice %35 {offsets = [30, 0], sizes = [1, 128], strides = [1, 1]} : vector<32x128xf32> to vector<1x128xf32>
    %c0_52 = arith.constant 0 : index
    %c3840 = arith.constant 3840 : index
    %97 = vector.load %arg20[%c0_52, %c3840] : memref<4x4096xf32, #tpu.memory_space<vmem>>, vector<1x128xf32>
    tpu.vector_store %arg20[%c0_52, %c3840], %96 {strides = array<i32>} : memref<4x4096xf32, #tpu.memory_space<vmem>>, vector<1x128xf32>,
    %98 = vector.extract_strided_slice %35 {offsets = [31, 0], sizes = [1, 128], strides = [1, 1]} : vector<32x128xf32> to vector<1x128xf32>
    %c0_53 = arith.constant 0 : index
    %c3968 = arith.constant 3968 : index
    %99 = vector.load %arg20[%c0_53, %c3968] : memref<4x4096xf32, #tpu.memory_space<vmem>>, vector<1x128xf32>
    tpu.vector_store %arg20[%c0_53, %c3968], %98 {strides = array<i32>} : memref<4x4096xf32, #tpu.memory_space<vmem>>, vector<1x128xf32>,
    %c1 = arith.constant 1 : index
    %c0_54 = arith.constant 0 : index
    %c0_55 = arith.constant 0 : index
    %100 = vector.load %arg0[%c1, %c0_54, %c0_55] : memref<4x12x129xf32, #tpu.memory_space<vmem>>, vector<1x12x129xf32>
    %101 = vector.shape_cast %100 : vector<1x12x129xf32> to vector<12x129xf32>
    %102 = vector.extract_strided_slice %101 {offsets = [0, 0], sizes = [12, 128], strides = [1, 1]} : vector<12x129xf32> to vector<12x128xf32>
    %cst_56 = arith.constant dense<0.000000e+00> : vector<64x128xf32>
    %103 = tpu.matmul %0, %102, %cst_56 {dimension_numbers = #tpu.dot_dimension_numbers<[1], [0], [0], [1], [0, 0, 1, 1], [], []>} : vector<64x12xf32>, vector<12x128xf32>, vector<64x128xf32> -> vector<64x128xf32>
    %104 = vector.extract_strided_slice %101 {offsets = [0, 1], sizes = [12, 128], strides = [1, 1]} : vector<12x129xf32> to vector<12x128xf32>
    %cst_57 = arith.constant dense<0.000000e+00> : vector<64x128xf32>
    %105 = tpu.matmul %1, %104, %cst_57 {dimension_numbers = #tpu.dot_dimension_numbers<[1], [0], [0], [1], [0, 0, 1, 1], [], []>} : vector<64x12xf32>, vector<12x128xf32>, vector<64x128xf32> -> vector<64x128xf32>
    %106 = arith.addf %103, %105 : vector<64x128xf32>
    %107 = vector.broadcast %2 : vector<64x1xf32> to vector<64x128xf32>
    %108 = arith.addf %106, %107 : vector<64x128xf32>
    %cst_58 = arith.constant 0.000000e+00 : f32
    %109 = vector.broadcast %cst_58 : f32 to vector<64x128xf32>
    %110 = arith.maximumf %108, %109 : vector<64x128xf32>
    %cst_59 = arith.constant 0.000000e+00 : f32
    %111 = vector.broadcast %cst_59 : f32 to vector<64x128xf32>
    %112 = arith.select %12, %111, %110 : vector<64x128xi1>, vector<64x128xf32>
    %113 = vector.extract_strided_slice %112 {offsets = [0, 0], sizes = [64, 127], strides = [1, 1]} : vector<64x128xf32> to vector<64x127xf32>
    %114 = tpu.concatenate %13, %113 in 1 : vector<64x1xf32>, vector<64x127xf32> -> vector<64x128xf32>
    %cst_60 = arith.constant dense<0.000000e+00> : vector<32x128xf32>
    %115 = tpu.matmul %3, %114, %cst_60 {dimension_numbers = #tpu.dot_dimension_numbers<[1], [0], [0], [1], [0, 0, 1, 1], [], []>} : vector<32x64xf32>, vector<64x128xf32>, vector<32x128xf32> -> vector<32x128xf32>
    %cst_61 = arith.constant dense<0.000000e+00> : vector<32x128xf32>
    %116 = tpu.matmul %4, %112, %cst_61 {dimension_numbers = #tpu.dot_dimension_numbers<[1], [0], [0], [1], [0, 0, 1, 1], [], []>} : vector<32x64xf32>, vector<64x128xf32>, vector<32x128xf32> -> vector<32x128xf32>
    %117 = arith.addf %115, %116 : vector<32x128xf32>
    %118 = vector.broadcast %5 : vector<32x1xf32> to vector<32x128xf32>
    %119 = arith.addf %117, %118 : vector<32x128xf32>
    %cst_62 = arith.constant 0.000000e+00 : f32
    %120 = vector.broadcast %cst_62 : f32 to vector<32x128xf32>
    %121 = arith.maximumf %119, %120 : vector<32x128xf32>
    %122 = vector.extract_strided_slice %121 {offsets = [0, 0], sizes = [1, 128], strides = [1, 1]} : vector<32x128xf32> to vector<1x128xf32>
    %c1_63 = arith.constant 1 : index
    %c0_64 = arith.constant 0 : index
    %123 = vector.load %arg20[%c1_63, %c0_64] : memref<4x4096xf32, #tpu.memory_space<vmem>>, vector<1x128xf32>
    tpu.vector_store %arg20[%c1_63, %c0_64], %122 {strides = array<i32>} : memref<4x4096xf32, #tpu.memory_space<vmem>>, vector<1x128xf32>,
    %124 = vector.extract_strided_slice %121 {offsets = [1, 0], sizes = [1, 128], strides = [1, 1]} : vector<32x128xf32> to vector<1x128xf32>
    %c1_65 = arith.constant 1 : index
    %c128_66 = arith.constant 128 : index
    %125 = vector.load %arg20[%c1_65, %c128_66] : memref<4x4096xf32, #tpu.memory_space<vmem>>, vector<1x128xf32>
    tpu.vector_store %arg20[%c1_65, %c128_66], %124 {strides = array<i32>} : memref<4x4096xf32, #tpu.memory_space<vmem>>, vector<1x128xf32>,
    %126 = vector.extract_strided_slice %121 {offsets = [2, 0], sizes = [1, 128], strides = [1, 1]} : vector<32x128xf32> to vector<1x128xf32>
    %c1_67 = arith.constant 1 : index
    %c256_68 = arith.constant 256 : index
    %127 = vector.load %arg20[%c1_67, %c256_68] : memref<4x4096xf32, #tpu.memory_space<vmem>>, vector<1x128xf32>
    tpu.vector_store %arg20[%c1_67, %c256_68], %126 {strides = array<i32>} : memref<4x4096xf32, #tpu.memory_space<vmem>>, vector<1x128xf32>,
    %128 = vector.extract_strided_slice %121 {offsets = [3, 0], sizes = [1, 128], strides = [1, 1]} : vector<32x128xf32> to vector<1x128xf32>
    %c1_69 = arith.constant 1 : index
    %c384_70 = arith.constant 384 : index
    %129 = vector.load %arg20[%c1_69, %c384_70] : memref<4x4096xf32, #tpu.memory_space<vmem>>, vector<1x128xf32>
    tpu.vector_store %arg20[%c1_69, %c384_70], %128 {strides = array<i32>} : memref<4x4096xf32, #tpu.memory_space<vmem>>, vector<1x128xf32>,
    %130 = vector.extract_strided_slice %121 {offsets = [4, 0], sizes = [1, 128], strides = [1, 1]} : vector<32x128xf32> to vector<1x128xf32>
    %c1_71 = arith.constant 1 : index
    %c512_72 = arith.constant 512 : index
    %131 = vector.load %arg20[%c1_71, %c512_72] : memref<4x4096xf32, #tpu.memory_space<vmem>>, vector<1x128xf32>
    tpu.vector_store %arg20[%c1_71, %c512_72], %130 {strides = array<i32>} : memref<4x4096xf32, #tpu.memory_space<vmem>>, vector<1x128xf32>,
    %132 = vector.extract_strided_slice %121 {offsets = [5, 0], sizes = [1, 128], strides = [1, 1]} : vector<32x128xf32> to vector<1x128xf32>
    %c1_73 = arith.constant 1 : index
    %c640_74 = arith.constant 640 : index
    %133 = vector.load %arg20[%c1_73, %c640_74] : memref<4x4096xf32, #tpu.memory_space<vmem>>, vector<1x128xf32>
    tpu.vector_store %arg20[%c1_73, %c640_74], %132 {strides = array<i32>} : memref<4x4096xf32, #tpu.memory_space<vmem>>, vector<1x128xf32>,
    %134 = vector.extract_strided_slice %121 {offsets = [6, 0], sizes = [1, 128], strides = [1, 1]} : vector<32x128xf32> to vector<1x128xf32>
    %c1_75 = arith.constant 1 : index
    %c768_76 = arith.constant 768 : index
    %135 = vector.load %arg20[%c1_75, %c768_76] : memref<4x4096xf32, #tpu.memory_space<vmem>>, vector<1x128xf32>
    tpu.vector_store %arg20[%c1_75, %c768_76], %134 {strides = array<i32>} : memref<4x4096xf32, #tpu.memory_space<vmem>>, vector<1x128xf32>,
    %136 = vector.extract_strided_slice %121 {offsets = [7, 0], sizes = [1, 128], strides = [1, 1]} : vector<32x128xf32> to vector<1x128xf32>
    %c1_77 = arith.constant 1 : index
    %c896_78 = arith.constant 896 : index
    %137 = vector.load %arg20[%c1_77, %c896_78] : memref<4x4096xf32, #tpu.memory_space<vmem>>, vector<1x128xf32>
    tpu.vector_store %arg20[%c1_77, %c896_78], %136 {strides = array<i32>} : memref<4x4096xf32, #tpu.memory_space<vmem>>, vector<1x128xf32>,
    %138 = vector.extract_strided_slice %121 {offsets = [8, 0], sizes = [1, 128], strides = [1, 1]} : vector<32x128xf32> to vector<1x128xf32>
    %c1_79 = arith.constant 1 : index
    %c1024_80 = arith.constant 1024 : index
    %139 = vector.load %arg20[%c1_79, %c1024_80] : memref<4x4096xf32, #tpu.memory_space<vmem>>, vector<1x128xf32>
    tpu.vector_store %arg20[%c1_79, %c1024_80], %138 {strides = array<i32>} : memref<4x4096xf32, #tpu.memory_space<vmem>>, vector<1x128xf32>,
    %140 = vector.extract_strided_slice %121 {offsets = [9, 0], sizes = [1, 128], strides = [1, 1]} : vector<32x128xf32> to vector<1x128xf32>
    %c1_81 = arith.constant 1 : index
    %c1152_82 = arith.constant 1152 : index
    %141 = vector.load %arg20[%c1_81, %c1152_82] : memref<4x4096xf32, #tpu.memory_space<vmem>>, vector<1x128xf32>
    tpu.vector_store %arg20[%c1_81, %c1152_82], %140 {strides = array<i32>} : memref<4x4096xf32, #tpu.memory_space<vmem>>, vector<1x128xf32>,
    %142 = vector.extract_strided_slice %121 {offsets = [10, 0], sizes = [1, 128], strides = [1, 1]} : vector<32x128xf32> to vector<1x128xf32>
    %c1_83 = arith.constant 1 : index
    %c1280_84 = arith.constant 1280 : index
    %143 = vector.load %arg20[%c1_83, %c1280_84] : memref<4x4096xf32, #tpu.memory_space<vmem>>, vector<1x128xf32>
    tpu.vector_store %arg20[%c1_83, %c1280_84], %142 {strides = array<i32>} : memref<4x4096xf32, #tpu.memory_space<vmem>>, vector<1x128xf32>,
    %144 = vector.extract_strided_slice %121 {offsets = [11, 0], sizes = [1, 128], strides = [1, 1]} : vector<32x128xf32> to vector<1x128xf32>
    %c1_85 = arith.constant 1 : index
    %c1408_86 = arith.constant 1408 : index
    %145 = vector.load %arg20[%c1_85, %c1408_86] : memref<4x4096xf32, #tpu.memory_space<vmem>>, vector<1x128xf32>
    tpu.vector_store %arg20[%c1_85, %c1408_86], %144 {strides = array<i32>} : memref<4x4096xf32, #tpu.memory_space<vmem>>, vector<1x128xf32>,
    %146 = vector.extract_strided_slice %121 {offsets = [12, 0], sizes = [1, 128], strides = [1, 1]} : vector<32x128xf32> to vector<1x128xf32>
    %c1_87 = arith.constant 1 : index
    %c1536_88 = arith.constant 1536 : index
    %147 = vector.load %arg20[%c1_87, %c1536_88] : memref<4x4096xf32, #tpu.memory_space<vmem>>, vector<1x128xf32>
    tpu.vector_store %arg20[%c1_87, %c1536_88], %146 {strides = array<i32>} : memref<4x4096xf32, #tpu.memory_space<vmem>>, vector<1x128xf32>,
    %148 = vector.extract_strided_slice %121 {offsets = [13, 0], sizes = [1, 128], strides = [1, 1]} : vector<32x128xf32> to vector<1x128xf32>
    %c1_89 = arith.constant 1 : index
    %c1664_90 = arith.constant 1664 : index
    %149 = vector.load %arg20[%c1_89, %c1664_90] : memref<4x4096xf32, #tpu.memory_space<vmem>>, vector<1x128xf32>
    tpu.vector_store %arg20[%c1_89, %c1664_90], %148 {strides = array<i32>} : memref<4x4096xf32, #tpu.memory_space<vmem>>, vector<1x128xf32>,
    %150 = vector.extract_strided_slice %121 {offsets = [14, 0], sizes = [1, 128], strides = [1, 1]} : vector<32x128xf32> to vector<1x128xf32>
    %c1_91 = arith.constant 1 : index
    %c1792_92 = arith.constant 1792 : index
    %151 = vector.load %arg20[%c1_91, %c1792_92] : memref<4x4096xf32, #tpu.memory_space<vmem>>, vector<1x128xf32>
    tpu.vector_store %arg20[%c1_91, %c1792_92], %150 {strides = array<i32>} : memref<4x4096xf32, #tpu.memory_space<vmem>>, vector<1x128xf32>,
    %152 = vector.extract_strided_slice %121 {offsets = [15, 0], sizes = [1, 128], strides = [1, 1]} : vector<32x128xf32> to vector<1x128xf32>
    %c1_93 = arith.constant 1 : index
    %c1920_94 = arith.constant 1920 : index
    %153 = vector.load %arg20[%c1_93, %c1920_94] : memref<4x4096xf32, #tpu.memory_space<vmem>>, vector<1x128xf32>
    tpu.vector_store %arg20[%c1_93, %c1920_94], %152 {strides = array<i32>} : memref<4x4096xf32, #tpu.memory_space<vmem>>, vector<1x128xf32>,
    %154 = vector.extract_strided_slice %121 {offsets = [16, 0], sizes = [1, 128], strides = [1, 1]} : vector<32x128xf32> to vector<1x128xf32>
    %c1_95 = arith.constant 1 : index
    %c2048_96 = arith.constant 2048 : index
    %155 = vector.load %arg20[%c1_95, %c2048_96] : memref<4x4096xf32, #tpu.memory_space<vmem>>, vector<1x128xf32>
    tpu.vector_store %arg20[%c1_95, %c2048_96], %154 {strides = array<i32>} : memref<4x4096xf32, #tpu.memory_space<vmem>>, vector<1x128xf32>,
    %156 = vector.extract_strided_slice %121 {offsets = [17, 0], sizes = [1, 128], strides = [1, 1]} : vector<32x128xf32> to vector<1x128xf32>
    %c1_97 = arith.constant 1 : index
    %c2176_98 = arith.constant 2176 : index
    %157 = vector.load %arg20[%c1_97, %c2176_98] : memref<4x4096xf32, #tpu.memory_space<vmem>>, vector<1x128xf32>
    tpu.vector_store %arg20[%c1_97, %c2176_98], %156 {strides = array<i32>} : memref<4x4096xf32, #tpu.memory_space<vmem>>, vector<1x128xf32>,
    %158 = vector.extract_strided_slice %121 {offsets = [18, 0], sizes = [1, 128], strides = [1, 1]} : vector<32x128xf32> to vector<1x128xf32>
    %c1_99 = arith.constant 1 : index
    %c2304_100 = arith.constant 2304 : index
    %159 = vector.load %arg20[%c1_99, %c2304_100] : memref<4x4096xf32, #tpu.memory_space<vmem>>, vector<1x128xf32>
    tpu.vector_store %arg20[%c1_99, %c2304_100], %158 {strides = array<i32>} : memref<4x4096xf32, #tpu.memory_space<vmem>>, vector<1x128xf32>,
    %160 = vector.extract_strided_slice %121 {offsets = [19, 0], sizes = [1, 128], strides = [1, 1]} : vector<32x128xf32> to vector<1x128xf32>
    %c1_101 = arith.constant 1 : index
    %c2432_102 = arith.constant 2432 : index
    %161 = vector.load %arg20[%c1_101, %c2432_102] : memref<4x4096xf32, #tpu.memory_space<vmem>>, vector<1x128xf32>
    tpu.vector_store %arg20[%c1_101, %c2432_102], %160 {strides = array<i32>} : memref<4x4096xf32, #tpu.memory_space<vmem>>, vector<1x128xf32>,
    %162 = vector.extract_strided_slice %121 {offsets = [20, 0], sizes = [1, 128], strides = [1, 1]} : vector<32x128xf32> to vector<1x128xf32>
    %c1_103 = arith.constant 1 : index
    %c2560_104 = arith.constant 2560 : index
    %163 = vector.load %arg20[%c1_103, %c2560_104] : memref<4x4096xf32, #tpu.memory_space<vmem>>, vector<1x128xf32>
    tpu.vector_store %arg20[%c1_103, %c2560_104], %162 {strides = array<i32>} : memref<4x4096xf32, #tpu.memory_space<vmem>>, vector<1x128xf32>,
    %164 = vector.extract_strided_slice %121 {offsets = [21, 0], sizes = [1, 128], strides = [1, 1]} : vector<32x128xf32> to vector<1x128xf32>
    %c1_105 = arith.constant 1 : index
    %c2688_106 = arith.constant 2688 : index
    %165 = vector.load %arg20[%c1_105, %c2688_106] : memref<4x4096xf32, #tpu.memory_space<vmem>>, vector<1x128xf32>
    tpu.vector_store %arg20[%c1_105, %c2688_106], %164 {strides = array<i32>} : memref<4x4096xf32, #tpu.memory_space<vmem>>, vector<1x128xf32>,
    %166 = vector.extract_strided_slice %121 {offsets = [22, 0], sizes = [1, 128], strides = [1, 1]} : vector<32x128xf32> to vector<1x128xf32>
    %c1_107 = arith.constant 1 : index
    %c2816_108 = arith.constant 2816 : index
    %167 = vector.load %arg20[%c1_107, %c2816_108] : memref<4x4096xf32, #tpu.memory_space<vmem>>, vector<1x128xf32>
    tpu.vector_store %arg20[%c1_107, %c2816_108], %166 {strides = array<i32>} : memref<4x4096xf32, #tpu.memory_space<vmem>>, vector<1x128xf32>,
    %168 = vector.extract_strided_slice %121 {offsets = [23, 0], sizes = [1, 128], strides = [1, 1]} : vector<32x128xf32> to vector<1x128xf32>
    %c1_109 = arith.constant 1 : index
    %c2944_110 = arith.constant 2944 : index
    %169 = vector.load %arg20[%c1_109, %c2944_110] : memref<4x4096xf32, #tpu.memory_space<vmem>>, vector<1x128xf32>
    tpu.vector_store %arg20[%c1_109, %c2944_110], %168 {strides = array<i32>} : memref<4x4096xf32, #tpu.memory_space<vmem>>, vector<1x128xf32>,
    %170 = vector.extract_strided_slice %121 {offsets = [24, 0], sizes = [1, 128], strides = [1, 1]} : vector<32x128xf32> to vector<1x128xf32>
    %c1_111 = arith.constant 1 : index
    %c3072_112 = arith.constant 3072 : index
    %171 = vector.load %arg20[%c1_111, %c3072_112] : memref<4x4096xf32, #tpu.memory_space<vmem>>, vector<1x128xf32>
    tpu.vector_store %arg20[%c1_111, %c3072_112], %170 {strides = array<i32>} : memref<4x4096xf32, #tpu.memory_space<vmem>>, vector<1x128xf32>,
    %172 = vector.extract_strided_slice %121 {offsets = [25, 0], sizes = [1, 128], strides = [1, 1]} : vector<32x128xf32> to vector<1x128xf32>
    %c1_113 = arith.constant 1 : index
    %c3200_114 = arith.constant 3200 : index
    %173 = vector.load %arg20[%c1_113, %c3200_114] : memref<4x4096xf32, #tpu.memory_space<vmem>>, vector<1x128xf32>
    tpu.vector_store %arg20[%c1_113, %c3200_114], %172 {strides = array<i32>} : memref<4x4096xf32, #tpu.memory_space<vmem>>, vector<1x128xf32>,
    %174 = vector.extract_strided_slice %121 {offsets = [26, 0], sizes = [1, 128], strides = [1, 1]} : vector<32x128xf32> to vector<1x128xf32>
    %c1_115 = arith.constant 1 : index
    %c3328_116 = arith.constant 3328 : index
    %175 = vector.load %arg20[%c1_115, %c3328_116] : memref<4x4096xf32, #tpu.memory_space<vmem>>, vector<1x128xf32>
    tpu.vector_store %arg20[%c1_115, %c3328_116], %174 {strides = array<i32>} : memref<4x4096xf32, #tpu.memory_space<vmem>>, vector<1x128xf32>,
    %176 = vector.extract_strided_slice %121 {offsets = [27, 0], sizes = [1, 128], strides = [1, 1]} : vector<32x128xf32> to vector<1x128xf32>
    %c1_117 = arith.constant 1 : index
    %c3456_118 = arith.constant 3456 : index
    %177 = vector.load %arg20[%c1_117, %c3456_118] : memref<4x4096xf32, #tpu.memory_space<vmem>>, vector<1x128xf32>
    tpu.vector_store %arg20[%c1_117, %c3456_118], %176 {strides = array<i32>} : memref<4x4096xf32, #tpu.memory_space<vmem>>, vector<1x128xf32>,
    %178 = vector.extract_strided_slice %121 {offsets = [28, 0], sizes = [1, 128], strides = [1, 1]} : vector<32x128xf32> to vector<1x128xf32>
    %c1_119 = arith.constant 1 : index
    %c3584_120 = arith.constant 3584 : index
    %179 = vector.load %arg20[%c1_119, %c3584_120] : memref<4x4096xf32, #tpu.memory_space<vmem>>, vector<1x128xf32>
    tpu.vector_store %arg20[%c1_119, %c3584_120], %178 {strides = array<i32>} : memref<4x4096xf32, #tpu.memory_space<vmem>>, vector<1x128xf32>,
    %180 = vector.extract_strided_slice %121 {offsets = [29, 0], sizes = [1, 128], strides = [1, 1]} : vector<32x128xf32> to vector<1x128xf32>
    %c1_121 = arith.constant 1 : index
    %c3712_122 = arith.constant 3712 : index
    %181 = vector.load %arg20[%c1_121, %c3712_122] : memref<4x4096xf32, #tpu.memory_space<vmem>>, vector<1x128xf32>
    tpu.vector_store %arg20[%c1_121, %c3712_122], %180 {strides = array<i32>} : memref<4x4096xf32, #tpu.memory_space<vmem>>, vector<1x128xf32>,
    %182 = vector.extract_strided_slice %121 {offsets = [30, 0], sizes = [1, 128], strides = [1, 1]} : vector<32x128xf32> to vector<1x128xf32>
    %c1_123 = arith.constant 1 : index
    %c3840_124 = arith.constant 3840 : index
    %183 = vector.load %arg20[%c1_123, %c3840_124] : memref<4x4096xf32, #tpu.memory_space<vmem>>, vector<1x128xf32>
    tpu.vector_store %arg20[%c1_123, %c3840_124], %182 {strides = array<i32>} : memref<4x4096xf32, #tpu.memory_space<vmem>>, vector<1x128xf32>,
    %184 = vector.extract_strided_slice %121 {offsets = [31, 0], sizes = [1, 128], strides = [1, 1]} : vector<32x128xf32> to vector<1x128xf32>
    %c1_125 = arith.constant 1 : index
    %c3968_126 = arith.constant 3968 : index
    %185 = vector.load %arg20[%c1_125, %c3968_126] : memref<4x4096xf32, #tpu.memory_space<vmem>>, vector<1x128xf32>
    tpu.vector_store %arg20[%c1_125, %c3968_126], %184 {strides = array<i32>} : memref<4x4096xf32, #tpu.memory_space<vmem>>, vector<1x128xf32>,
    %c2 = arith.constant 2 : index
    %c0_127 = arith.constant 0 : index
    %c0_128 = arith.constant 0 : index
    %186 = vector.load %arg0[%c2, %c0_127, %c0_128] : memref<4x12x129xf32, #tpu.memory_space<vmem>>, vector<1x12x129xf32>
    %187 = vector.shape_cast %186 : vector<1x12x129xf32> to vector<12x129xf32>
    %188 = vector.extract_strided_slice %187 {offsets = [0, 0], sizes = [12, 128], strides = [1, 1]} : vector<12x129xf32> to vector<12x128xf32>
    %cst_129 = arith.constant dense<0.000000e+00> : vector<64x128xf32>
    %189 = tpu.matmul %0, %188, %cst_129 {dimension_numbers = #tpu.dot_dimension_numbers<[1], [0], [0], [1], [0, 0, 1, 1], [], []>} : vector<64x12xf32>, vector<12x128xf32>, vector<64x128xf32> -> vector<64x128xf32>
    %190 = vector.extract_strided_slice %187 {offsets = [0, 1], sizes = [12, 128], strides = [1, 1]} : vector<12x129xf32> to vector<12x128xf32>
    %cst_130 = arith.constant dense<0.000000e+00> : vector<64x128xf32>
    %191 = tpu.matmul %1, %190, %cst_130 {dimension_numbers = #tpu.dot_dimension_numbers<[1], [0], [0], [1], [0, 0, 1, 1], [], []>} : vector<64x12xf32>, vector<12x128xf32>, vector<64x128xf32> -> vector<64x128xf32>
    %192 = arith.addf %189, %191 : vector<64x128xf32>
    %193 = vector.broadcast %2 : vector<64x1xf32> to vector<64x128xf32>
    %194 = arith.addf %192, %193 : vector<64x128xf32>
    %cst_131 = arith.constant 0.000000e+00 : f32
    %195 = vector.broadcast %cst_131 : f32 to vector<64x128xf32>
    %196 = arith.maximumf %194, %195 : vector<64x128xf32>
    %cst_132 = arith.constant 0.000000e+00 : f32
    %197 = vector.broadcast %cst_132 : f32 to vector<64x128xf32>
    %198 = arith.select %12, %197, %196 : vector<64x128xi1>, vector<64x128xf32>
    %199 = vector.extract_strided_slice %198 {offsets = [0, 0], sizes = [64, 127], strides = [1, 1]} : vector<64x128xf32> to vector<64x127xf32>
    %200 = tpu.concatenate %13, %199 in 1 : vector<64x1xf32>, vector<64x127xf32> -> vector<64x128xf32>
    %cst_133 = arith.constant dense<0.000000e+00> : vector<32x128xf32>
    %201 = tpu.matmul %3, %200, %cst_133 {dimension_numbers = #tpu.dot_dimension_numbers<[1], [0], [0], [1], [0, 0, 1, 1], [], []>} : vector<32x64xf32>, vector<64x128xf32>, vector<32x128xf32> -> vector<32x128xf32>
    %cst_134 = arith.constant dense<0.000000e+00> : vector<32x128xf32>
    %202 = tpu.matmul %4, %198, %cst_134 {dimension_numbers = #tpu.dot_dimension_numbers<[1], [0], [0], [1], [0, 0, 1, 1], [], []>} : vector<32x64xf32>, vector<64x128xf32>, vector<32x128xf32> -> vector<32x128xf32>
    %203 = arith.addf %201, %202 : vector<32x128xf32>
    %204 = vector.broadcast %5 : vector<32x1xf32> to vector<32x128xf32>
    %205 = arith.addf %203, %204 : vector<32x128xf32>
    %cst_135 = arith.constant 0.000000e+00 : f32
    %206 = vector.broadcast %cst_135 : f32 to vector<32x128xf32>
    %207 = arith.maximumf %205, %206 : vector<32x128xf32>
    %208 = vector.extract_strided_slice %207 {offsets = [0, 0], sizes = [1, 128], strides = [1, 1]} : vector<32x128xf32> to vector<1x128xf32>
    %c2_136 = arith.constant 2 : index
    %c0_137 = arith.constant 0 : index
    %209 = vector.load %arg20[%c2_136, %c0_137] : memref<4x4096xf32, #tpu.memory_space<vmem>>, vector<1x128xf32>
    tpu.vector_store %arg20[%c2_136, %c0_137], %208 {strides = array<i32>} : memref<4x4096xf32, #tpu.memory_space<vmem>>, vector<1x128xf32>,
    %210 = vector.extract_strided_slice %207 {offsets = [1, 0], sizes = [1, 128], strides = [1, 1]} : vector<32x128xf32> to vector<1x128xf32>
    %c2_138 = arith.constant 2 : index
    %c128_139 = arith.constant 128 : index
    %211 = vector.load %arg20[%c2_138, %c128_139] : memref<4x4096xf32, #tpu.memory_space<vmem>>, vector<1x128xf32>
    tpu.vector_store %arg20[%c2_138, %c128_139], %210 {strides = array<i32>} : memref<4x4096xf32, #tpu.memory_space<vmem>>, vector<1x128xf32>,
    %212 = vector.extract_strided_slice %207 {offsets = [2, 0], sizes = [1, 128], strides = [1, 1]} : vector<32x128xf32> to vector<1x128xf32>
    %c2_140 = arith.constant 2 : index
    %c256_141 = arith.constant 256 : index
    %213 = vector.load %arg20[%c2_140, %c256_141] : memref<4x4096xf32, #tpu.memory_space<vmem>>, vector<1x128xf32>
    tpu.vector_store %arg20[%c2_140, %c256_141], %212 {strides = array<i32>} : memref<4x4096xf32, #tpu.memory_space<vmem>>, vector<1x128xf32>,
    %214 = vector.extract_strided_slice %207 {offsets = [3, 0], sizes = [1, 128], strides = [1, 1]} : vector<32x128xf32> to vector<1x128xf32>
    %c2_142 = arith.constant 2 : index
    %c384_143 = arith.constant 384 : index
    %215 = vector.load %arg20[%c2_142, %c384_143] : memref<4x4096xf32, #tpu.memory_space<vmem>>, vector<1x128xf32>
    tpu.vector_store %arg20[%c2_142, %c384_143], %214 {strides = array<i32>} : memref<4x4096xf32, #tpu.memory_space<vmem>>, vector<1x128xf32>,
    %216 = vector.extract_strided_slice %207 {offsets = [4, 0], sizes = [1, 128], strides = [1, 1]} : vector<32x128xf32> to vector<1x128xf32>
    %c2_144 = arith.constant 2 : index
    %c512_145 = arith.constant 512 : index
    %217 = vector.load %arg20[%c2_144, %c512_145] : memref<4x4096xf32, #tpu.memory_space<vmem>>, vector<1x128xf32>
    tpu.vector_store %arg20[%c2_144, %c512_145], %216 {strides = array<i32>} : memref<4x4096xf32, #tpu.memory_space<vmem>>, vector<1x128xf32>,
    %218 = vector.extract_strided_slice %207 {offsets = [5, 0], sizes = [1, 128], strides = [1, 1]} : vector<32x128xf32> to vector<1x128xf32>
    %c2_146 = arith.constant 2 : index
    %c640_147 = arith.constant 640 : index
    %219 = vector.load %arg20[%c2_146, %c640_147] : memref<4x4096xf32, #tpu.memory_space<vmem>>, vector<1x128xf32>
    tpu.vector_store %arg20[%c2_146, %c640_147], %218 {strides = array<i32>} : memref<4x4096xf32, #tpu.memory_space<vmem>>, vector<1x128xf32>,
    %220 = vector.extract_strided_slice %207 {offsets = [6, 0], sizes = [1, 128], strides = [1, 1]} : vector<32x128xf32> to vector<1x128xf32>
    %c2_148 = arith.constant 2 : index
    %c768_149 = arith.constant 768 : index
    %221 = vector.load %arg20[%c2_148, %c768_149] : memref<4x4096xf32, #tpu.memory_space<vmem>>, vector<1x128xf32>
    tpu.vector_store %arg20[%c2_148, %c768_149], %220 {strides = array<i32>} : memref<4x4096xf32, #tpu.memory_space<vmem>>, vector<1x128xf32>,
    %222 = vector.extract_strided_slice %207 {offsets = [7, 0], sizes = [1, 128], strides = [1, 1]} : vector<32x128xf32> to vector<1x128xf32>
    %c2_150 = arith.constant 2 : index
    %c896_151 = arith.constant 896 : index
    %223 = vector.load %arg20[%c2_150, %c896_151] : memref<4x4096xf32, #tpu.memory_space<vmem>>, vector<1x128xf32>
    tpu.vector_store %arg20[%c2_150, %c896_151], %222 {strides = array<i32>} : memref<4x4096xf32, #tpu.memory_space<vmem>>, vector<1x128xf32>,
    %224 = vector.extract_strided_slice %207 {offsets = [8, 0], sizes = [1, 128], strides = [1, 1]} : vector<32x128xf32> to vector<1x128xf32>
    %c2_152 = arith.constant 2 : index
    %c1024_153 = arith.constant 1024 : index
    %225 = vector.load %arg20[%c2_152, %c1024_153] : memref<4x4096xf32, #tpu.memory_space<vmem>>, vector<1x128xf32>
    tpu.vector_store %arg20[%c2_152, %c1024_153], %224 {strides = array<i32>} : memref<4x4096xf32, #tpu.memory_space<vmem>>, vector<1x128xf32>,
    %226 = vector.extract_strided_slice %207 {offsets = [9, 0], sizes = [1, 128], strides = [1, 1]} : vector<32x128xf32> to vector<1x128xf32>
    %c2_154 = arith.constant 2 : index
    %c1152_155 = arith.constant 1152 : index
    %227 = vector.load %arg20[%c2_154, %c1152_155] : memref<4x4096xf32, #tpu.memory_space<vmem>>, vector<1x128xf32>
    tpu.vector_store %arg20[%c2_154, %c1152_155], %226 {strides = array<i32>} : memref<4x4096xf32, #tpu.memory_space<vmem>>, vector<1x128xf32>,
    %228 = vector.extract_strided_slice %207 {offsets = [10, 0], sizes = [1, 128], strides = [1, 1]} : vector<32x128xf32> to vector<1x128xf32>
    %c2_156 = arith.constant 2 : index
    %c1280_157 = arith.constant 1280 : index
    %229 = vector.load %arg20[%c2_156, %c1280_157] : memref<4x4096xf32, #tpu.memory_space<vmem>>, vector<1x128xf32>
    tpu.vector_store %arg20[%c2_156, %c1280_157], %228 {strides = array<i32>} : memref<4x4096xf32, #tpu.memory_space<vmem>>, vector<1x128xf32>,
    %230 = vector.extract_strided_slice %207 {offsets = [11, 0], sizes = [1, 128], strides = [1, 1]} : vector<32x128xf32> to vector<1x128xf32>
    %c2_158 = arith.constant 2 : index
    %c1408_159 = arith.constant 1408 : index
    %231 = vector.load %arg20[%c2_158, %c1408_159] : memref<4x4096xf32, #tpu.memory_space<vmem>>, vector<1x128xf32>
    tpu.vector_store %arg20[%c2_158, %c1408_159], %230 {strides = array<i32>} : memref<4x4096xf32, #tpu.memory_space<vmem>>, vector<1x128xf32>,
    %232 = vector.extract_strided_slice %207 {offsets = [12, 0], sizes = [1, 128], strides = [1, 1]} : vector<32x128xf32> to vector<1x128xf32>
    %c2_160 = arith.constant 2 : index
    %c1536_161 = arith.constant 1536 : index
    %233 = vector.load %arg20[%c2_160, %c1536_161] : memref<4x4096xf32, #tpu.memory_space<vmem>>, vector<1x128xf32>
    tpu.vector_store %arg20[%c2_160, %c1536_161], %232 {strides = array<i32>} : memref<4x4096xf32, #tpu.memory_space<vmem>>, vector<1x128xf32>,
    %234 = vector.extract_strided_slice %207 {offsets = [13, 0], sizes = [1, 128], strides = [1, 1]} : vector<32x128xf32> to vector<1x128xf32>
    %c2_162 = arith.constant 2 : index
    %c1664_163 = arith.constant 1664 : index
    %235 = vector.load %arg20[%c2_162, %c1664_163] : memref<4x4096xf32, #tpu.memory_space<vmem>>, vector<1x128xf32>
    tpu.vector_store %arg20[%c2_162, %c1664_163], %234 {strides = array<i32>} : memref<4x4096xf32, #tpu.memory_space<vmem>>, vector<1x128xf32>,
    %236 = vector.extract_strided_slice %207 {offsets = [14, 0], sizes = [1, 128], strides = [1, 1]} : vector<32x128xf32> to vector<1x128xf32>
    %c2_164 = arith.constant 2 : index
    %c1792_165 = arith.constant 1792 : index
    %237 = vector.load %arg20[%c2_164, %c1792_165] : memref<4x4096xf32, #tpu.memory_space<vmem>>, vector<1x128xf32>
    tpu.vector_store %arg20[%c2_164, %c1792_165], %236 {strides = array<i32>} : memref<4x4096xf32, #tpu.memory_space<vmem>>, vector<1x128xf32>,
    %238 = vector.extract_strided_slice %207 {offsets = [15, 0], sizes = [1, 128], strides = [1, 1]} : vector<32x128xf32> to vector<1x128xf32>
    %c2_166 = arith.constant 2 : index
    %c1920_167 = arith.constant 1920 : index
    %239 = vector.load %arg20[%c2_166, %c1920_167] : memref<4x4096xf32, #tpu.memory_space<vmem>>, vector<1x128xf32>
    tpu.vector_store %arg20[%c2_166, %c1920_167], %238 {strides = array<i32>} : memref<4x4096xf32, #tpu.memory_space<vmem>>, vector<1x128xf32>,
    %240 = vector.extract_strided_slice %207 {offsets = [16, 0], sizes = [1, 128], strides = [1, 1]} : vector<32x128xf32> to vector<1x128xf32>
    %c2_168 = arith.constant 2 : index
    %c2048_169 = arith.constant 2048 : index
    %241 = vector.load %arg20[%c2_168, %c2048_169] : memref<4x4096xf32, #tpu.memory_space<vmem>>, vector<1x128xf32>
    tpu.vector_store %arg20[%c2_168, %c2048_169], %240 {strides = array<i32>} : memref<4x4096xf32, #tpu.memory_space<vmem>>, vector<1x128xf32>,
    %242 = vector.extract_strided_slice %207 {offsets = [17, 0], sizes = [1, 128], strides = [1, 1]} : vector<32x128xf32> to vector<1x128xf32>
    %c2_170 = arith.constant 2 : index
    %c2176_171 = arith.constant 2176 : index
    %243 = vector.load %arg20[%c2_170, %c2176_171] : memref<4x4096xf32, #tpu.memory_space<vmem>>, vector<1x128xf32>
    tpu.vector_store %arg20[%c2_170, %c2176_171], %242 {strides = array<i32>} : memref<4x4096xf32, #tpu.memory_space<vmem>>, vector<1x128xf32>,
    %244 = vector.extract_strided_slice %207 {offsets = [18, 0], sizes = [1, 128], strides = [1, 1]} : vector<32x128xf32> to vector<1x128xf32>
    %c2_172 = arith.constant 2 : index
    %c2304_173 = arith.constant 2304 : index
    %245 = vector.load %arg20[%c2_172, %c2304_173] : memref<4x4096xf32, #tpu.memory_space<vmem>>, vector<1x128xf32>
    tpu.vector_store %arg20[%c2_172, %c2304_173], %244 {strides = array<i32>} : memref<4x4096xf32, #tpu.memory_space<vmem>>, vector<1x128xf32>,
    %246 = vector.extract_strided_slice %207 {offsets = [19, 0], sizes = [1, 128], strides = [1, 1]} : vector<32x128xf32> to vector<1x128xf32>
    %c2_174 = arith.constant 2 : index
    %c2432_175 = arith.constant 2432 : index
    %247 = vector.load %arg20[%c2_174, %c2432_175] : memref<4x4096xf32, #tpu.memory_space<vmem>>, vector<1x128xf32>
    tpu.vector_store %arg20[%c2_174, %c2432_175], %246 {strides = array<i32>} : memref<4x4096xf32, #tpu.memory_space<vmem>>, vector<1x128xf32>,
    %248 = vector.extract_strided_slice %207 {offsets = [20, 0], sizes = [1, 128], strides = [1, 1]} : vector<32x128xf32> to vector<1x128xf32>
    %c2_176 = arith.constant 2 : index
    %c2560_177 = arith.constant 2560 : index
    %249 = vector.load %arg20[%c2_176, %c2560_177] : memref<4x4096xf32, #tpu.memory_space<vmem>>, vector<1x128xf32>
    tpu.vector_store %arg20[%c2_176, %c2560_177], %248 {strides = array<i32>} : memref<4x4096xf32, #tpu.memory_space<vmem>>, vector<1x128xf32>,
    %250 = vector.extract_strided_slice %207 {offsets = [21, 0], sizes = [1, 128], strides = [1, 1]} : vector<32x128xf32> to vector<1x128xf32>
    %c2_178 = arith.constant 2 : index
    %c2688_179 = arith.constant 2688 : index
    %251 = vector.load %arg20[%c2_178, %c2688_179] : memref<4x4096xf32, #tpu.memory_space<vmem>>, vector<1x128xf32>
    tpu.vector_store %arg20[%c2_178, %c2688_179], %250 {strides = array<i32>} : memref<4x4096xf32, #tpu.memory_space<vmem>>, vector<1x128xf32>,
    %252 = vector.extract_strided_slice %207 {offsets = [22, 0], sizes = [1, 128], strides = [1, 1]} : vector<32x128xf32> to vector<1x128xf32>
    %c2_180 = arith.constant 2 : index
    %c2816_181 = arith.constant 2816 : index
    %253 = vector.load %arg20[%c2_180, %c2816_181] : memref<4x4096xf32, #tpu.memory_space<vmem>>, vector<1x128xf32>
    tpu.vector_store %arg20[%c2_180, %c2816_181], %252 {strides = array<i32>} : memref<4x4096xf32, #tpu.memory_space<vmem>>, vector<1x128xf32>,
    %254 = vector.extract_strided_slice %207 {offsets = [23, 0], sizes = [1, 128], strides = [1, 1]} : vector<32x128xf32> to vector<1x128xf32>
    %c2_182 = arith.constant 2 : index
    %c2944_183 = arith.constant 2944 : index
    %255 = vector.load %arg20[%c2_182, %c2944_183] : memref<4x4096xf32, #tpu.memory_space<vmem>>, vector<1x128xf32>
    tpu.vector_store %arg20[%c2_182, %c2944_183], %254 {strides = array<i32>} : memref<4x4096xf32, #tpu.memory_space<vmem>>, vector<1x128xf32>,
    %256 = vector.extract_strided_slice %207 {offsets = [24, 0], sizes = [1, 128], strides = [1, 1]} : vector<32x128xf32> to vector<1x128xf32>
    %c2_184 = arith.constant 2 : index
    %c3072_185 = arith.constant 3072 : index
    %257 = vector.load %arg20[%c2_184, %c3072_185] : memref<4x4096xf32, #tpu.memory_space<vmem>>, vector<1x128xf32>
    tpu.vector_store %arg20[%c2_184, %c3072_185], %256 {strides = array<i32>} : memref<4x4096xf32, #tpu.memory_space<vmem>>, vector<1x128xf32>,
    %258 = vector.extract_strided_slice %207 {offsets = [25, 0], sizes = [1, 128], strides = [1, 1]} : vector<32x128xf32> to vector<1x128xf32>
    %c2_186 = arith.constant 2 : index
    %c3200_187 = arith.constant 3200 : index
    %259 = vector.load %arg20[%c2_186, %c3200_187] : memref<4x4096xf32, #tpu.memory_space<vmem>>, vector<1x128xf32>
    tpu.vector_store %arg20[%c2_186, %c3200_187], %258 {strides = array<i32>} : memref<4x4096xf32, #tpu.memory_space<vmem>>, vector<1x128xf32>,
    %260 = vector.extract_strided_slice %207 {offsets = [26, 0], sizes = [1, 128], strides = [1, 1]} : vector<32x128xf32> to vector<1x128xf32>
    %c2_188 = arith.constant 2 : index
    %c3328_189 = arith.constant 3328 : index
    %261 = vector.load %arg20[%c2_188, %c3328_189] : memref<4x4096xf32, #tpu.memory_space<vmem>>, vector<1x128xf32>
    tpu.vector_store %arg20[%c2_188, %c3328_189], %260 {strides = array<i32>} : memref<4x4096xf32, #tpu.memory_space<vmem>>, vector<1x128xf32>,
    %262 = vector.extract_strided_slice %207 {offsets = [27, 0], sizes = [1, 128], strides = [1, 1]} : vector<32x128xf32> to vector<1x128xf32>
    %c2_190 = arith.constant 2 : index
    %c3456_191 = arith.constant 3456 : index
    %263 = vector.load %arg20[%c2_190, %c3456_191] : memref<4x4096xf32, #tpu.memory_space<vmem>>, vector<1x128xf32>
    tpu.vector_store %arg20[%c2_190, %c3456_191], %262 {strides = array<i32>} : memref<4x4096xf32, #tpu.memory_space<vmem>>, vector<1x128xf32>,
    %264 = vector.extract_strided_slice %207 {offsets = [28, 0], sizes = [1, 128], strides = [1, 1]} : vector<32x128xf32> to vector<1x128xf32>
    %c2_192 = arith.constant 2 : index
    %c3584_193 = arith.constant 3584 : index
    %265 = vector.load %arg20[%c2_192, %c3584_193] : memref<4x4096xf32, #tpu.memory_space<vmem>>, vector<1x128xf32>
    tpu.vector_store %arg20[%c2_192, %c3584_193], %264 {strides = array<i32>} : memref<4x4096xf32, #tpu.memory_space<vmem>>, vector<1x128xf32>,
    %266 = vector.extract_strided_slice %207 {offsets = [29, 0], sizes = [1, 128], strides = [1, 1]} : vector<32x128xf32> to vector<1x128xf32>
    %c2_194 = arith.constant 2 : index
    %c3712_195 = arith.constant 3712 : index
    %267 = vector.load %arg20[%c2_194, %c3712_195] : memref<4x4096xf32, #tpu.memory_space<vmem>>, vector<1x128xf32>
    tpu.vector_store %arg20[%c2_194, %c3712_195], %266 {strides = array<i32>} : memref<4x4096xf32, #tpu.memory_space<vmem>>, vector<1x128xf32>,
    %268 = vector.extract_strided_slice %207 {offsets = [30, 0], sizes = [1, 128], strides = [1, 1]} : vector<32x128xf32> to vector<1x128xf32>
    %c2_196 = arith.constant 2 : index
    %c3840_197 = arith.constant 3840 : index
    %269 = vector.load %arg20[%c2_196, %c3840_197] : memref<4x4096xf32, #tpu.memory_space<vmem>>, vector<1x128xf32>
    tpu.vector_store %arg20[%c2_196, %c3840_197], %268 {strides = array<i32>} : memref<4x4096xf32, #tpu.memory_space<vmem>>, vector<1x128xf32>,
    %270 = vector.extract_strided_slice %207 {offsets = [31, 0], sizes = [1, 128], strides = [1, 1]} : vector<32x128xf32> to vector<1x128xf32>
    %c2_198 = arith.constant 2 : index
    %c3968_199 = arith.constant 3968 : index
    %271 = vector.load %arg20[%c2_198, %c3968_199] : memref<4x4096xf32, #tpu.memory_space<vmem>>, vector<1x128xf32>
    tpu.vector_store %arg20[%c2_198, %c3968_199], %270 {strides = array<i32>} : memref<4x4096xf32, #tpu.memory_space<vmem>>, vector<1x128xf32>,
    %c3 = arith.constant 3 : index
    %c0_200 = arith.constant 0 : index
    %c0_201 = arith.constant 0 : index
    %272 = vector.load %arg0[%c3, %c0_200, %c0_201] : memref<4x12x129xf32, #tpu.memory_space<vmem>>, vector<1x12x129xf32>
    %273 = vector.shape_cast %272 : vector<1x12x129xf32> to vector<12x129xf32>
    %274 = vector.extract_strided_slice %273 {offsets = [0, 0], sizes = [12, 128], strides = [1, 1]} : vector<12x129xf32> to vector<12x128xf32>
    %cst_202 = arith.constant dense<0.000000e+00> : vector<64x128xf32>
    %275 = tpu.matmul %0, %274, %cst_202 {dimension_numbers = #tpu.dot_dimension_numbers<[1], [0], [0], [1], [0, 0, 1, 1], [], []>} : vector<64x12xf32>, vector<12x128xf32>, vector<64x128xf32> -> vector<64x128xf32>
    %276 = vector.extract_strided_slice %273 {offsets = [0, 1], sizes = [12, 128], strides = [1, 1]} : vector<12x129xf32> to vector<12x128xf32>
    %cst_203 = arith.constant dense<0.000000e+00> : vector<64x128xf32>
    %277 = tpu.matmul %1, %276, %cst_203 {dimension_numbers = #tpu.dot_dimension_numbers<[1], [0], [0], [1], [0, 0, 1, 1], [], []>} : vector<64x12xf32>, vector<12x128xf32>, vector<64x128xf32> -> vector<64x128xf32>
    %278 = arith.addf %275, %277 : vector<64x128xf32>
    %279 = vector.broadcast %2 : vector<64x1xf32> to vector<64x128xf32>
    %280 = arith.addf %278, %279 : vector<64x128xf32>
    %cst_204 = arith.constant 0.000000e+00 : f32
    %281 = vector.broadcast %cst_204 : f32 to vector<64x128xf32>
    %282 = arith.maximumf %280, %281 : vector<64x128xf32>
    %cst_205 = arith.constant 0.000000e+00 : f32
    %283 = vector.broadcast %cst_205 : f32 to vector<64x128xf32>
    %284 = arith.select %12, %283, %282 : vector<64x128xi1>, vector<64x128xf32>
    %285 = vector.extract_strided_slice %284 {offsets = [0, 0], sizes = [64, 127], strides = [1, 1]} : vector<64x128xf32> to vector<64x127xf32>
    %286 = tpu.concatenate %13, %285 in 1 : vector<64x1xf32>, vector<64x127xf32> -> vector<64x128xf32>
    %cst_206 = arith.constant dense<0.000000e+00> : vector<32x128xf32>
    %287 = tpu.matmul %3, %286, %cst_206 {dimension_numbers = #tpu.dot_dimension_numbers<[1], [0], [0], [1], [0, 0, 1, 1], [], []>} : vector<32x64xf32>, vector<64x128xf32>, vector<32x128xf32> -> vector<32x128xf32>
    %cst_207 = arith.constant dense<0.000000e+00> : vector<32x128xf32>
    %288 = tpu.matmul %4, %284, %cst_207 {dimension_numbers = #tpu.dot_dimension_numbers<[1], [0], [0], [1], [0, 0, 1, 1], [], []>} : vector<32x64xf32>, vector<64x128xf32>, vector<32x128xf32> -> vector<32x128xf32>
    %289 = arith.addf %287, %288 : vector<32x128xf32>
    %290 = vector.broadcast %5 : vector<32x1xf32> to vector<32x128xf32>
    %291 = arith.addf %289, %290 : vector<32x128xf32>
    %cst_208 = arith.constant 0.000000e+00 : f32
    %292 = vector.broadcast %cst_208 : f32 to vector<32x128xf32>
    %293 = arith.maximumf %291, %292 : vector<32x128xf32>
    %294 = vector.extract_strided_slice %293 {offsets = [0, 0], sizes = [1, 128], strides = [1, 1]} : vector<32x128xf32> to vector<1x128xf32>
    %c3_209 = arith.constant 3 : index
    %c0_210 = arith.constant 0 : index
    %295 = vector.load %arg20[%c3_209, %c0_210] : memref<4x4096xf32, #tpu.memory_space<vmem>>, vector<1x128xf32>
    tpu.vector_store %arg20[%c3_209, %c0_210], %294 {strides = array<i32>} : memref<4x4096xf32, #tpu.memory_space<vmem>>, vector<1x128xf32>,
    %296 = vector.extract_strided_slice %293 {offsets = [1, 0], sizes = [1, 128], strides = [1, 1]} : vector<32x128xf32> to vector<1x128xf32>
    %c3_211 = arith.constant 3 : index
    %c128_212 = arith.constant 128 : index
    %297 = vector.load %arg20[%c3_211, %c128_212] : memref<4x4096xf32, #tpu.memory_space<vmem>>, vector<1x128xf32>
    tpu.vector_store %arg20[%c3_211, %c128_212], %296 {strides = array<i32>} : memref<4x4096xf32, #tpu.memory_space<vmem>>, vector<1x128xf32>,
    %298 = vector.extract_strided_slice %293 {offsets = [2, 0], sizes = [1, 128], strides = [1, 1]} : vector<32x128xf32> to vector<1x128xf32>
    %c3_213 = arith.constant 3 : index
    %c256_214 = arith.constant 256 : index
    %299 = vector.load %arg20[%c3_213, %c256_214] : memref<4x4096xf32, #tpu.memory_space<vmem>>, vector<1x128xf32>
    tpu.vector_store %arg20[%c3_213, %c256_214], %298 {strides = array<i32>} : memref<4x4096xf32, #tpu.memory_space<vmem>>, vector<1x128xf32>,
    %300 = vector.extract_strided_slice %293 {offsets = [3, 0], sizes = [1, 128], strides = [1, 1]} : vector<32x128xf32> to vector<1x128xf32>
    %c3_215 = arith.constant 3 : index
    %c384_216 = arith.constant 384 : index
    %301 = vector.load %arg20[%c3_215, %c384_216] : memref<4x4096xf32, #tpu.memory_space<vmem>>, vector<1x128xf32>
    tpu.vector_store %arg20[%c3_215, %c384_216], %300 {strides = array<i32>} : memref<4x4096xf32, #tpu.memory_space<vmem>>, vector<1x128xf32>,
    %302 = vector.extract_strided_slice %293 {offsets = [4, 0], sizes = [1, 128], strides = [1, 1]} : vector<32x128xf32> to vector<1x128xf32>
    %c3_217 = arith.constant 3 : index
    %c512_218 = arith.constant 512 : index
    %303 = vector.load %arg20[%c3_217, %c512_218] : memref<4x4096xf32, #tpu.memory_space<vmem>>, vector<1x128xf32>
    tpu.vector_store %arg20[%c3_217, %c512_218], %302 {strides = array<i32>} : memref<4x4096xf32, #tpu.memory_space<vmem>>, vector<1x128xf32>,
    %304 = vector.extract_strided_slice %293 {offsets = [5, 0], sizes = [1, 128], strides = [1, 1]} : vector<32x128xf32> to vector<1x128xf32>
    %c3_219 = arith.constant 3 : index
    %c640_220 = arith.constant 640 : index
    %305 = vector.load %arg20[%c3_219, %c640_220] : memref<4x4096xf32, #tpu.memory_space<vmem>>, vector<1x128xf32>
    tpu.vector_store %arg20[%c3_219, %c640_220], %304 {strides = array<i32>} : memref<4x4096xf32, #tpu.memory_space<vmem>>, vector<1x128xf32>,
    %306 = vector.extract_strided_slice %293 {offsets = [6, 0], sizes = [1, 128], strides = [1, 1]} : vector<32x128xf32> to vector<1x128xf32>
    %c3_221 = arith.constant 3 : index
    %c768_222 = arith.constant 768 : index
    %307 = vector.load %arg20[%c3_221, %c768_222] : memref<4x4096xf32, #tpu.memory_space<vmem>>, vector<1x128xf32>
    tpu.vector_store %arg20[%c3_221, %c768_222], %306 {strides = array<i32>} : memref<4x4096xf32, #tpu.memory_space<vmem>>, vector<1x128xf32>,
    %308 = vector.extract_strided_slice %293 {offsets = [7, 0], sizes = [1, 128], strides = [1, 1]} : vector<32x128xf32> to vector<1x128xf32>
    %c3_223 = arith.constant 3 : index
    %c896_224 = arith.constant 896 : index
    %309 = vector.load %arg20[%c3_223, %c896_224] : memref<4x4096xf32, #tpu.memory_space<vmem>>, vector<1x128xf32>
    tpu.vector_store %arg20[%c3_223, %c896_224], %308 {strides = array<i32>} : memref<4x4096xf32, #tpu.memory_space<vmem>>, vector<1x128xf32>,
    %310 = vector.extract_strided_slice %293 {offsets = [8, 0], sizes = [1, 128], strides = [1, 1]} : vector<32x128xf32> to vector<1x128xf32>
    %c3_225 = arith.constant 3 : index
    %c1024_226 = arith.constant 1024 : index
    %311 = vector.load %arg20[%c3_225, %c1024_226] : memref<4x4096xf32, #tpu.memory_space<vmem>>, vector<1x128xf32>
    tpu.vector_store %arg20[%c3_225, %c1024_226], %310 {strides = array<i32>} : memref<4x4096xf32, #tpu.memory_space<vmem>>, vector<1x128xf32>,
    %312 = vector.extract_strided_slice %293 {offsets = [9, 0], sizes = [1, 128], strides = [1, 1]} : vector<32x128xf32> to vector<1x128xf32>
    %c3_227 = arith.constant 3 : index
    %c1152_228 = arith.constant 1152 : index
    %313 = vector.load %arg20[%c3_227, %c1152_228] : memref<4x4096xf32, #tpu.memory_space<vmem>>, vector<1x128xf32>
    tpu.vector_store %arg20[%c3_227, %c1152_228], %312 {strides = array<i32>} : memref<4x4096xf32, #tpu.memory_space<vmem>>, vector<1x128xf32>,
    %314 = vector.extract_strided_slice %293 {offsets = [10, 0], sizes = [1, 128], strides = [1, 1]} : vector<32x128xf32> to vector<1x128xf32>
    %c3_229 = arith.constant 3 : index
    %c1280_230 = arith.constant 1280 : index
    %315 = vector.load %arg20[%c3_229, %c1280_230] : memref<4x4096xf32, #tpu.memory_space<vmem>>, vector<1x128xf32>
    tpu.vector_store %arg20[%c3_229, %c1280_230], %314 {strides = array<i32>} : memref<4x4096xf32, #tpu.memory_space<vmem>>, vector<1x128xf32>,
    %316 = vector.extract_strided_slice %293 {offsets = [11, 0], sizes = [1, 128], strides = [1, 1]} : vector<32x128xf32> to vector<1x128xf32>
    %c3_231 = arith.constant 3 : index
    %c1408_232 = arith.constant 1408 : index
    %317 = vector.load %arg20[%c3_231, %c1408_232] : memref<4x4096xf32, #tpu.memory_space<vmem>>, vector<1x128xf32>
    tpu.vector_store %arg20[%c3_231, %c1408_232], %316 {strides = array<i32>} : memref<4x4096xf32, #tpu.memory_space<vmem>>, vector<1x128xf32>,
    %318 = vector.extract_strided_slice %293 {offsets = [12, 0], sizes = [1, 128], strides = [1, 1]} : vector<32x128xf32> to vector<1x128xf32>
    %c3_233 = arith.constant 3 : index
    %c1536_234 = arith.constant 1536 : index
    %319 = vector.load %arg20[%c3_233, %c1536_234] : memref<4x4096xf32, #tpu.memory_space<vmem>>, vector<1x128xf32>
    tpu.vector_store %arg20[%c3_233, %c1536_234], %318 {strides = array<i32>} : memref<4x4096xf32, #tpu.memory_space<vmem>>, vector<1x128xf32>,
    %320 = vector.extract_strided_slice %293 {offsets = [13, 0], sizes = [1, 128], strides = [1, 1]} : vector<32x128xf32> to vector<1x128xf32>
    %c3_235 = arith.constant 3 : index
    %c1664_236 = arith.constant 1664 : index
    %321 = vector.load %arg20[%c3_235, %c1664_236] : memref<4x4096xf32, #tpu.memory_space<vmem>>, vector<1x128xf32>
    tpu.vector_store %arg20[%c3_235, %c1664_236], %320 {strides = array<i32>} : memref<4x4096xf32, #tpu.memory_space<vmem>>, vector<1x128xf32>,
    %322 = vector.extract_strided_slice %293 {offsets = [14, 0], sizes = [1, 128], strides = [1, 1]} : vector<32x128xf32> to vector<1x128xf32>
    %c3_237 = arith.constant 3 : index
    %c1792_238 = arith.constant 1792 : index
    %323 = vector.load %arg20[%c3_237, %c1792_238] : memref<4x4096xf32, #tpu.memory_space<vmem>>, vector<1x128xf32>
    tpu.vector_store %arg20[%c3_237, %c1792_238], %322 {strides = array<i32>} : memref<4x4096xf32, #tpu.memory_space<vmem>>, vector<1x128xf32>,
    %324 = vector.extract_strided_slice %293 {offsets = [15, 0], sizes = [1, 128], strides = [1, 1]} : vector<32x128xf32> to vector<1x128xf32>
    %c3_239 = arith.constant 3 : index
    %c1920_240 = arith.constant 1920 : index
    %325 = vector.load %arg20[%c3_239, %c1920_240] : memref<4x4096xf32, #tpu.memory_space<vmem>>, vector<1x128xf32>
    tpu.vector_store %arg20[%c3_239, %c1920_240], %324 {strides = array<i32>} : memref<4x4096xf32, #tpu.memory_space<vmem>>, vector<1x128xf32>,
    %326 = vector.extract_strided_slice %293 {offsets = [16, 0], sizes = [1, 128], strides = [1, 1]} : vector<32x128xf32> to vector<1x128xf32>
    %c3_241 = arith.constant 3 : index
    %c2048_242 = arith.constant 2048 : index
    %327 = vector.load %arg20[%c3_241, %c2048_242] : memref<4x4096xf32, #tpu.memory_space<vmem>>, vector<1x128xf32>
    tpu.vector_store %arg20[%c3_241, %c2048_242], %326 {strides = array<i32>} : memref<4x4096xf32, #tpu.memory_space<vmem>>, vector<1x128xf32>,
    %328 = vector.extract_strided_slice %293 {offsets = [17, 0], sizes = [1, 128], strides = [1, 1]} : vector<32x128xf32> to vector<1x128xf32>
    %c3_243 = arith.constant 3 : index
    %c2176_244 = arith.constant 2176 : index
    %329 = vector.load %arg20[%c3_243, %c2176_244] : memref<4x4096xf32, #tpu.memory_space<vmem>>, vector<1x128xf32>
    tpu.vector_store %arg20[%c3_243, %c2176_244], %328 {strides = array<i32>} : memref<4x4096xf32, #tpu.memory_space<vmem>>, vector<1x128xf32>,
    %330 = vector.extract_strided_slice %293 {offsets = [18, 0], sizes = [1, 128], strides = [1, 1]} : vector<32x128xf32> to vector<1x128xf32>
    %c3_245 = arith.constant 3 : index
    %c2304_246 = arith.constant 2304 : index
    %331 = vector.load %arg20[%c3_245, %c2304_246] : memref<4x4096xf32, #tpu.memory_space<vmem>>, vector<1x128xf32>
    tpu.vector_store %arg20[%c3_245, %c2304_246], %330 {strides = array<i32>} : memref<4x4096xf32, #tpu.memory_space<vmem>>, vector<1x128xf32>,
    %332 = vector.extract_strided_slice %293 {offsets = [19, 0], sizes = [1, 128], strides = [1, 1]} : vector<32x128xf32> to vector<1x128xf32>
    %c3_247 = arith.constant 3 : index
    %c2432_248 = arith.constant 2432 : index
    %333 = vector.load %arg20[%c3_247, %c2432_248] : memref<4x4096xf32, #tpu.memory_space<vmem>>, vector<1x128xf32>
    tpu.vector_store %arg20[%c3_247, %c2432_248], %332 {strides = array<i32>} : memref<4x4096xf32, #tpu.memory_space<vmem>>, vector<1x128xf32>,
    %334 = vector.extract_strided_slice %293 {offsets = [20, 0], sizes = [1, 128], strides = [1, 1]} : vector<32x128xf32> to vector<1x128xf32>
    %c3_249 = arith.constant 3 : index
    %c2560_250 = arith.constant 2560 : index
    %335 = vector.load %arg20[%c3_249, %c2560_250] : memref<4x4096xf32, #tpu.memory_space<vmem>>, vector<1x128xf32>
    tpu.vector_store %arg20[%c3_249, %c2560_250], %334 {strides = array<i32>} : memref<4x4096xf32, #tpu.memory_space<vmem>>, vector<1x128xf32>,
    %336 = vector.extract_strided_slice %293 {offsets = [21, 0], sizes = [1, 128], strides = [1, 1]} : vector<32x128xf32> to vector<1x128xf32>
    %c3_251 = arith.constant 3 : index
    %c2688_252 = arith.constant 2688 : index
    %337 = vector.load %arg20[%c3_251, %c2688_252] : memref<4x4096xf32, #tpu.memory_space<vmem>>, vector<1x128xf32>
    tpu.vector_store %arg20[%c3_251, %c2688_252], %336 {strides = array<i32>} : memref<4x4096xf32, #tpu.memory_space<vmem>>, vector<1x128xf32>,
    %338 = vector.extract_strided_slice %293 {offsets = [22, 0], sizes = [1, 128], strides = [1, 1]} : vector<32x128xf32> to vector<1x128xf32>
    %c3_253 = arith.constant 3 : index
    %c2816_254 = arith.constant 2816 : index
    %339 = vector.load %arg20[%c3_253, %c2816_254] : memref<4x4096xf32, #tpu.memory_space<vmem>>, vector<1x128xf32>
    tpu.vector_store %arg20[%c3_253, %c2816_254], %338 {strides = array<i32>} : memref<4x4096xf32, #tpu.memory_space<vmem>>, vector<1x128xf32>,
    %340 = vector.extract_strided_slice %293 {offsets = [23, 0], sizes = [1, 128], strides = [1, 1]} : vector<32x128xf32> to vector<1x128xf32>
    %c3_255 = arith.constant 3 : index
    %c2944_256 = arith.constant 2944 : index
    %341 = vector.load %arg20[%c3_255, %c2944_256] : memref<4x4096xf32, #tpu.memory_space<vmem>>, vector<1x128xf32>
    tpu.vector_store %arg20[%c3_255, %c2944_256], %340 {strides = array<i32>} : memref<4x4096xf32, #tpu.memory_space<vmem>>, vector<1x128xf32>,
    %342 = vector.extract_strided_slice %293 {offsets = [24, 0], sizes = [1, 128], strides = [1, 1]} : vector<32x128xf32> to vector<1x128xf32>
    %c3_257 = arith.constant 3 : index
    %c3072_258 = arith.constant 3072 : index
    %343 = vector.load %arg20[%c3_257, %c3072_258] : memref<4x4096xf32, #tpu.memory_space<vmem>>, vector<1x128xf32>
    tpu.vector_store %arg20[%c3_257, %c3072_258], %342 {strides = array<i32>} : memref<4x4096xf32, #tpu.memory_space<vmem>>, vector<1x128xf32>,
    %344 = vector.extract_strided_slice %293 {offsets = [25, 0], sizes = [1, 128], strides = [1, 1]} : vector<32x128xf32> to vector<1x128xf32>
    %c3_259 = arith.constant 3 : index
    %c3200_260 = arith.constant 3200 : index
    %345 = vector.load %arg20[%c3_259, %c3200_260] : memref<4x4096xf32, #tpu.memory_space<vmem>>, vector<1x128xf32>
    tpu.vector_store %arg20[%c3_259, %c3200_260], %344 {strides = array<i32>} : memref<4x4096xf32, #tpu.memory_space<vmem>>, vector<1x128xf32>,
    %346 = vector.extract_strided_slice %293 {offsets = [26, 0], sizes = [1, 128], strides = [1, 1]} : vector<32x128xf32> to vector<1x128xf32>
    %c3_261 = arith.constant 3 : index
    %c3328_262 = arith.constant 3328 : index
    %347 = vector.load %arg20[%c3_261, %c3328_262] : memref<4x4096xf32, #tpu.memory_space<vmem>>, vector<1x128xf32>
    tpu.vector_store %arg20[%c3_261, %c3328_262], %346 {strides = array<i32>} : memref<4x4096xf32, #tpu.memory_space<vmem>>, vector<1x128xf32>,
    %348 = vector.extract_strided_slice %293 {offsets = [27, 0], sizes = [1, 128], strides = [1, 1]} : vector<32x128xf32> to vector<1x128xf32>
    %c3_263 = arith.constant 3 : index
    %c3456_264 = arith.constant 3456 : index
    %349 = vector.load %arg20[%c3_263, %c3456_264] : memref<4x4096xf32, #tpu.memory_space<vmem>>, vector<1x128xf32>
    tpu.vector_store %arg20[%c3_263, %c3456_264], %348 {strides = array<i32>} : memref<4x4096xf32, #tpu.memory_space<vmem>>, vector<1x128xf32>,
    %350 = vector.extract_strided_slice %293 {offsets = [28, 0], sizes = [1, 128], strides = [1, 1]} : vector<32x128xf32> to vector<1x128xf32>
    %c3_265 = arith.constant 3 : index
    %c3584_266 = arith.constant 3584 : index
    %351 = vector.load %arg20[%c3_265, %c3584_266] : memref<4x4096xf32, #tpu.memory_space<vmem>>, vector<1x128xf32>
    tpu.vector_store %arg20[%c3_265, %c3584_266], %350 {strides = array<i32>} : memref<4x4096xf32, #tpu.memory_space<vmem>>, vector<1x128xf32>,
    %352 = vector.extract_strided_slice %293 {offsets = [29, 0], sizes = [1, 128], strides = [1, 1]} : vector<32x128xf32> to vector<1x128xf32>
    %c3_267 = arith.constant 3 : index
    %c3712_268 = arith.constant 3712 : index
    %353 = vector.load %arg20[%c3_267, %c3712_268] : memref<4x4096xf32, #tpu.memory_space<vmem>>, vector<1x128xf32>
    tpu.vector_store %arg20[%c3_267, %c3712_268], %352 {strides = array<i32>} : memref<4x4096xf32, #tpu.memory_space<vmem>>, vector<1x128xf32>,
    %354 = vector.extract_strided_slice %293 {offsets = [30, 0], sizes = [1, 128], strides = [1, 1]} : vector<32x128xf32> to vector<1x128xf32>
    %c3_269 = arith.constant 3 : index
    %c3840_270 = arith.constant 3840 : index
    %355 = vector.load %arg20[%c3_269, %c3840_270] : memref<4x4096xf32, #tpu.memory_space<vmem>>, vector<1x128xf32>
    tpu.vector_store %arg20[%c3_269, %c3840_270], %354 {strides = array<i32>} : memref<4x4096xf32, #tpu.memory_space<vmem>>, vector<1x128xf32>,
    %356 = vector.extract_strided_slice %293 {offsets = [31, 0], sizes = [1, 128], strides = [1, 1]} : vector<32x128xf32> to vector<1x128xf32>
    %c3_271 = arith.constant 3 : index
    %c3968_272 = arith.constant 3968 : index
    %357 = vector.load %arg20[%c3_271, %c3968_272] : memref<4x4096xf32, #tpu.memory_space<vmem>>, vector<1x128xf32>
    tpu.vector_store %arg20[%c3_271, %c3968_272], %356 {strides = array<i32>} : memref<4x4096xf32, #tpu.memory_space<vmem>>, vector<1x128xf32>,
    %c0_273 = arith.constant 0 : index
    %c0_274 = arith.constant 0 : index
    %358 = vector.load %arg20[%c0_273, %c0_274] : memref<4x4096xf32, #tpu.memory_space<vmem>>, vector<4x4096xf32>
    %359 = arith.truncf %358 : vector<4x4096xf32> to vector<4x4096xbf16>
    %c0_275 = arith.constant 0 : index
    %c0_276 = arith.constant 0 : index
    %360 = vector.load %arg8[%c0_275, %c0_276] : memref<4096x256xbf16, #tpu.memory_space<vmem>>, vector<4096x256xbf16>
    %cst_277 = arith.constant dense<0.000000e+00> : vector<4x256xf32>
    %361 = tpu.matmul %359, %360, %cst_277 {dimension_numbers = #tpu.dot_dimension_numbers<[1], [0], [0], [1], [0, 0, 1, 1], [], []>} : vector<4x4096xbf16>, vector<4096x256xbf16>, vector<4x256xf32> -> vector<4x256xf32>
    %c0_278 = arith.constant 0 : index
    %c0_279 = arith.constant 0 : index
    %362 = vector.load %arg9[%c0_278, %c0_279] : memref<1x256xf32, #tpu.memory_space<vmem>>, vector<1x256xf32>
    %363 = vector.broadcast %362 : vector<1x256xf32> to vector<4x256xf32>
    %364 = arith.addf %361, %363 : vector<4x256xf32>
    %cst_280 = arith.constant 0.000000e+00 : f32
    %365 = vector.broadcast %cst_280 : f32 to vector<4x256xf32>
    %366 = arith.maximumf %364, %365 : vector<4x256xf32>
    %c0_281 = arith.constant 0 : index
    %c0_282 = arith.constant 0 : index
    %367 = vector.load %arg10[%c0_281, %c0_282] : memref<256x128xf32, #tpu.memory_space<vmem>>, vector<256x128xf32>
    %cst_283 = arith.constant dense<0.000000e+00> : vector<4x128xf32>
    %368 = tpu.matmul %366, %367, %cst_283 {dimension_numbers = #tpu.dot_dimension_numbers<[1], [0], [0], [1], [0, 0, 1, 1], [], []>} : vector<4x256xf32>, vector<256x128xf32>, vector<4x128xf32> -> vector<4x128xf32>
    %c0_284 = arith.constant 0 : index
    %c0_285 = arith.constant 0 : index
    %369 = vector.load %arg1[%c0_284, %c0_285] : memref<4x4xf32, #tpu.memory_space<vmem>>, vector<4x4xf32>
    %c0_286 = arith.constant 0 : index
    %c0_287 = arith.constant 0 : index
    %370 = vector.load %arg11[%c0_286, %c0_287] : memref<4x128xf32, #tpu.memory_space<vmem>>, vector<4x128xf32>
    %cst_288 = arith.constant dense<0.000000e+00> : vector<4x128xf32>
    %371 = tpu.matmul %369, %370, %cst_288 {dimension_numbers = #tpu.dot_dimension_numbers<[1], [0], [0], [1], [0, 0, 1, 1], [], []>} : vector<4x4xf32>, vector<4x128xf32>, vector<4x128xf32> -> vector<4x128xf32>
    %372 = arith.addf %368, %371 : vector<4x128xf32>
    %c0_289 = arith.constant 0 : index
    %c0_290 = arith.constant 0 : index
    %373 = vector.load %arg12[%c0_289, %c0_290] : memref<1x128xf32, #tpu.memory_space<vmem>>, vector<1x128xf32>
    %374 = vector.broadcast %373 : vector<1x128xf32> to vector<4x128xf32>
    %375 = arith.addf %372, %374 : vector<4x128xf32>
    %cst_291 = arith.constant 0.000000e+00 : f32
    %376 = vector.broadcast %cst_291 : f32 to vector<4x128xf32>
    %377 = arith.maximumf %375, %376 : vector<4x128xf32>
    %c0_292 = arith.constant 0 : index
    %c0_293 = arith.constant 0 : index
    %378 = vector.load %arg13[%c0_292, %c0_293] : memref<128x4xf32, #tpu.memory_space<vmem>>, vector<128x4xf32>
    %cst_294 = arith.constant dense<0.000000e+00> : vector<4x4xf32>
    %379 = tpu.matmul %377, %378, %cst_294 {dimension_numbers = #tpu.dot_dimension_numbers<[1], [0], [0], [1], [0, 0, 1, 1], [], []>} : vector<4x128xf32>, vector<128x4xf32>, vector<4x4xf32> -> vector<4x4xf32>
    %c0_295 = arith.constant 0 : index
    %c0_296 = arith.constant 0 : index
    %380 = vector.load %arg14[%c0_295, %c0_296] : memref<1x4xf32, #tpu.memory_space<vmem>>, vector<1x4xf32>
    %381 = vector.broadcast %380 : vector<1x4xf32> to vector<4x4xf32>
    %382 = arith.addf %379, %381 : vector<4x4xf32>
    %383 = tpu.iota {dimensions = array<i32: 1>} : vector<4x4xi32>
    %c2_i32 = arith.constant 2 : i32
    %384 = vector.broadcast %c2_i32 : i32 to vector<4x4xi32>
    %385 = arith.cmpi slt, %383, %384 : vector<4x4xi32>
    %386 = arith.negf %382 : vector<4x4xf32>
    %387 = math.exp %386 : vector<4x4xf32>
    %cst_297 = arith.constant 1.000000e+00 : f32
    %388 = vector.broadcast %cst_297 : f32 to vector<4x4xf32>
    %389 = arith.addf %388, %387 : vector<4x4xf32>
    %390 = arith.divf %388, %389 : vector<4x4xf32>
    %391 = math.tanh %382 : vector<4x4xf32>
    %392 = arith.select %385, %390, %391 : vector<4x4xi1>, vector<4x4xf32>
    %c0_298 = arith.constant 0 : index
    %c0_299 = arith.constant 0 : index
    %393 = vector.load %arg15[%c0_298, %c0_299] : memref<1x4xf32, #tpu.memory_space<vmem>>, vector<1x4xf32>
    %c0_300 = arith.constant 0 : index
    %c0_301 = arith.constant 0 : index
    %394 = vector.load %arg16[%c0_300, %c0_301] : memref<4x4xf32, #tpu.memory_space<vmem>>, vector<4x4xf32>
    %395 = math.exp %393 : vector<1x4xf32>
    %396 = vector.broadcast %395 : vector<1x4xf32> to vector<4x4xf32>
    %397 = arith.mulf %396, %394 : vector<4x4xf32>
    %398 = arith.addf %392, %397 : vector<4x4xf32>
    %cst_302 = arith.constant -5.000000e-01 : f32
    %399 = vector.broadcast %cst_302 : f32 to vector<4x4xf32>
    %400 = arith.mulf %399, %394 : vector<4x4xf32>
    %401 = arith.mulf %400, %394 : vector<4x4xf32>
    %cst_303 = arith.constant 0.918938517 : f32
    %402 = vector.broadcast %cst_303 : f32 to vector<4x4xf32>
    %403 = arith.subf %401, %402 : vector<4x4xf32>
    %404 = vector.broadcast %393 : vector<1x4xf32> to vector<4x4xf32>
    %405 = arith.subf %403, %404 : vector<4x4xf32>
    %c0_304 = arith.constant 0 : index
    %c0_305 = arith.constant 0 : index
    %406 = vector.load %arg17[%c0_304, %c0_305] : memref<4x4xf32, #tpu.memory_space<vmem>>, vector<4x4xf32>
    tpu.vector_store %arg17[%c0_304, %c0_305], %398 {strides = array<i32>} : memref<4x4xf32, #tpu.memory_space<vmem>>, vector<4x4xf32>,
    %cst_306 = arith.constant dense<0.000000e+00> : vector<4xf32>
    %407 = vector.multi_reduction <add>, %405, %cst_306 [1] : vector<4x4xf32> to vector<4xf32>
    %408 = vector.shape_cast %407 : vector<4xf32> to vector<4x1xf32>
    %c0_307 = arith.constant 0 : index
    %c0_308 = arith.constant 0 : index
    %409 = vector.load %arg18[%c0_307, %c0_308] : memref<4x1xf32, #tpu.memory_space<vmem>>, vector<4x1xf32>
    tpu.vector_store %arg18[%c0_307, %c0_308], %408 {strides = array<i32>} : memref<4x1xf32, #tpu.memory_space<vmem>>, vector<4x1xf32>,
    %c0_309 = arith.constant 0 : index
    %c0_310 = arith.constant 0 : index
    %410 = vector.load %arg19[%c0_309, %c0_310] : memref<4x4xf32, #tpu.memory_space<vmem>>, vector<4x4xf32>
    tpu.vector_store %arg19[%c0_309, %c0_310], %392 {strides = array<i32>} : memref<4x4xf32, #tpu.memory_space<vmem>>, vector<4x4xf32>,
    return
  }
}

</mosaic_0001>

<bundles_post_ra>
// kernel: message_actor_forward.1
= control target key start
LH: loop header
LB: loop body
LE: loop exit
PB: predicated region body
PF: predicated region fallthrough
CT: control target
= control target key end

     0   :  { %s12268_s0 = inlined_call_operand.vmem [shape: f32[4,12,129], index: 0, kind: input, shape index: {}]   ;;  %s12269_s1 = inlined_call_operand.vmem [shape: f32[4,4], index: 1, kind: input, shape index: {}]   ;;  %s12270_s2 = inlined_call_operand.vmem [shape: f32[64,12], index: 2, kind: input, shape index: {}]   ;;  %s12271_s3 = inlined_call_operand.vmem [shape: f32[64,12], index: 3, kind: input, shape index: {}]   ;;  %s12272_s4 = inlined_call_operand.vmem [shape: f32[64,1], index: 4, kind: input, shape index: {}]   ;;  %s12273_s5 = inlined_call_operand.vmem [shape: f32[32,64], index: 5, kind: input, shape index: {}]   ;;  %s12274_s6 = inlined_call_operand.vmem [shape: f32[32,64], index: 6, kind: input, shape index: {}]   ;;  %s12275_s7 = inlined_call_operand.vmem [shape: f32[32,1], index: 7, kind: input, shape index: {}]   ;;  %s12276_s8 = inlined_call_operand.vmem [shape: bf16[4096,256], index: 8, kind: input, shape index: {}]   ;;  %s12277_s9 = inlined_call_operand.vmem [shape: f32[1,256], index: 9, kind: input, shape index: {}]   ;;  %s12278_s10 = inlined_call_operand.hbm [shape: f32[256,128], index: 10, kind: input, shape index: {}]   ;;  %s12279_s11 = inlined_call_operand.vmem [shape: f32[4,128], index: 11, kind: input, shape index: {}]   ;;  %s12280_s12 = inlined_call_operand.vmem [shape: f32[1,128], index: 12, kind: input, shape index: {}]   ;;  %s12281_s13 = inlined_call_operand.vmem [shape: f32[128,4], index: 13, kind: input, shape index: {}]   ;;  %s12282_s14 = inlined_call_operand.vmem [shape: f32[1,4], index: 14, kind: input, shape index: {}]   ;;  %s12283_s15 = inlined_call_operand.vmem [shape: f32[1,4], index: 15, kind: input, shape index: {}]   ;;  %s12284_s16 = inlined_call_operand.vmem [shape: f32[4,4], index: 16, kind: input, shape index: {}]   ;;  %s12285_s17 = inlined_call_operand.hbm [shape: f32[4,4], index: 17, kind: output, shape index: {0}]   ;;  %s12286_s18 = inlined_call_operand.vmem [shape: f32[4,1], index: 18, kind: output, shape index: {1}]   ;;  %s12287_s19 = inlined_call_operand.hbm [shape: f32[4,4], index: 19, kind: output, shape index: {2}]  }
   0x1   :  { %12291 = sst [smem:[#allocation12_spill]] %s12268_s0 }
   0x2   :  { %12292 = sst [smem:[#allocation13_spill]] %s12269_s1 }
   0x3   :  { %12293 = sst [smem:[#allocation14_spill]] %s12270_s2 }
   0x4   :  { %12294 = sst [smem:[#allocation15_spill]] %s12271_s3 }
   0x5   :  { %25 = vsyncpa [#allocation4], 0 }
   0x6   :  { %26 = vsyncpa [#allocation5], 0 }
   0x7   :  { %27 = vsyncpa [#allocation8], 0  ;;  %s9631_s0 = smov [#allocation3]   ;;  %s9559_s1 = scalar_lea.hbm %s12278_s10, 4096 }
   0x8   :  { %s53_s30 = sshll.u32 %s9631_s0, 4  ;;  %p9560_p0 = scmp.ne.s32.totalorder %s12278_s10, %s9559_s1  ;;  %s54_s30 = int_to_ptr.vmem [resolvable:$true] %s53_s30 }
   0x9   :  { %p9563_p1 = scmp.lt.u32.totalorder %s9559_s1, %s12278_s10 }
   0xb   :  { %p9565_p2 = pnand %p9563_p1, %p9560_p0 }
   0xd   :  { %9568 = shalt.err (!%p9565_p2)
}
   0xe   :  { %s9569_s25 = scalar_lea.vmem %s54_s30, 4096  ;;  %p9574_p4 = scmp.lt.s32.totalorder %s54_s30, %s54_s30 }
   0xf   :  { %p9570_p3 = scmp.ne.s32.totalorder %s54_s30, %s9569_s25  ;;  %p9575_p5 = scmp.lt.s32.totalorder %s9569_s25, %s9569_s25 }
  0x11   :  { %p9576_p6 = por %p9575_p5, %p9574_p4 }
  0x13   :  { %p9577_p7 = pnand %p9576_p6, %p9570_p3 }
  0x15   :  { %9580 = shalt.err (!%p9577_p7)
}
  0x16   :  { %s9632_s3 = smov 128   ;;  %s9633_s26 = smov 8  }
  0x17   :  { %59 = dma.hbm_to_vmem [thread:$0]  %s12278_s10, 4096, %s54_s30, [#allocation4], %s9632_s3, %s9632_s3, %s9633_s26  }
  0x18   :  { %9625 = dma.done.wait [#allocation4], 4096  }
  0x19   :  { %9626 = vsyncadd [#allocation4], 4294963200  ;;  %vm184_vm0 = vcmask 1043456   ;;  %vm9634_vm1 = vmmov 1   ;;  %s12297_s20 = sld [smem:[#allocation12_spill]]  ;;  %vm159_vm3 = vcmask 97280  }
  0x1a   :  { %vm9756_vm2 = vmpackc.low %vm184_vm0, %vm9634_vm1  ;;  %s12298_s25 = sld [smem:[#allocation14_spill]]  ;;  %s12299_s27 = sld [smem:[#allocation15_spill]]  ;;  %v91_v16 = vld [vmem:[%s12272_s4] sm:$0xff]  ;;  %v9636_v18 = vmov 0   ;;  %v93_v19 = vld [vmem:[%s12272_s4 + $0x10] sm:$0xff]  ;;  %vm155_vm4 = vcmask 1039360  }
  0x1b   :  { %s9635_s28 = smov 127   ;;  %8646 = vset.pattern.permute.xlu1 %v9636_v18  ;;  %v92_v20 = vld [vmem:[%s12272_s4 + $0x8] sm:$0xff]  ;;  %8647 = vset.pattern.permute.xlu0 %v9636_v18  ;;  %v94_v22 = vld [vmem:[%s12272_s4 + $0x18] sm:$0xff]  ;;  %v95_v24 = vld [vmem:[%s12272_s4 + $0x20] sm:$0xff]  ;;  %vm528_vm5 = vcmask 523264   ;;  %vm519_vm9 = vcmask 7168  }
  0x1c   :  { %425 = vperm.xlu1 %8646, %v91_v16   ;;  %v96_v21 = vld [vmem:[%s12272_s4 + $0x28] sm:$0xff]  ;;  %v98_v23 = vld [vmem:[%s12272_s4 + $0x38] sm:$0xff]  ;;  %v97_v25 = vld [vmem:[%s12272_s4 + $0x30] sm:$0xff]  ;;  %s12304_s24 = sld [smem:[#allocation13_spill]]  ;;  %vm6515_vm12 = vcmask 31744   ;;  %vm9639_vm13 = vmmov 0  }
  0x1d   :  { %vm6866_vm10 = vmneg %vm519_vm9  ;;  %vm6795_vm14 = vcmask 27648   ;;  %vm6800_vm15 = vcmask 3072  }
  0x1e   :  { %vm10122_vm11 = vmpackc.low %vm6866_vm10, %vm6866_vm10 }
  0x1f   :  { %v139_v1 = vld [vmem:[%s12297_s20] sm:$0xff]  ;;  %v140_v2 = vld [vmem:[%s12297_s20 + $0x8] sm:$0xff]  ;;  %v141_v3 = vld [vmem:[%s12297_s20 + $0x10] sm:$0xf] }
  0x20   :  { %v8636_v4 = vpack.i.bf16 %v140_v2, %v139_v1  ;;  %v142_v5 = vld [vmem:[%s12297_s20 + $0x18] sm:$0xf]  ;;  %v8242_v6 = vpack.c.bf16 %v141_v3, %v139_v1  ;;  %v75_v7 = vld [vmem:[%s12298_s25] sm:$0xff]  ;;  %v76_v10 = vld [vmem:[%s12298_s25 + $0x8] sm:$0xff]  ;;  %430 = vperm.xlu1 %8646, %v92_v20  }
  0x21   :  { %v83_v8 = vld [vmem:[%s12299_s27] sm:$0xff]  ;;  %7912 = vmatprep.mubr.msk.f32.mxu0 %vm159_vm3, %v75_v7  ;;  %v8641_v9 = vpack.i.bf16 %v142_v5, %v141_v3  ;;  %v77_v11 = vld [vmem:[%s12298_s25 + $0x10] sm:$0xff]  ;;  %v78_v12 = vld [vmem:[%s12298_s25 + $0x18] sm:$0xff] }
  0x22   :  { %7896 = vmatprep.mubr.msk.f32.mxu1 %vm159_vm3, %v83_v8  ;;  %8637 = vrot.lane.b32.xlu0 %v8636_v4, %s9635_s28  ;;  %v79_v13 = vld [vmem:[%s12298_s25 + $0x20] sm:$0xff]  ;;  %v80_v14 = vld [vmem:[%s12298_s25 + $0x28] sm:$0xff]  ;;  %v81_v15 = vld [vmem:[%s12298_s25 + $0x30] sm:$0xff] }
  0x23   :  { %8244 = vmatprep.subr.msk.bf16.mxu0 %vm9756_vm2, %v8242_v6  ;;  %v82_v17 = vld [vmem:[%s12298_s25 + $0x38] sm:$0xff]  ;;  %v9844_v35 = vld [vmem:[%s12299_s27 + $0x8] sm:$0xff]  ;;  %v9851_v36 = vld [vmem:[%s12299_s27 + $0x10] sm:$0xff] }
  0x24   :  { %8247 = vmatpush3.bf16.msk.msra.mxu0 %vm9756_vm2, %v8242_v6  ;;  %440 = vperm.xlu1 %8646, %v94_v22   ;;  %v9858_v37 = vld [vmem:[%s12299_s27 + $0x18] sm:$0xff]  ;;  %v9865_v38 = vld [vmem:[%s12299_s27 + $0x20] sm:$0xff]  ;;  %v9872_v39 = vld [vmem:[%s12299_s27 + $0x28] sm:$0xff] }
  0x25   :  { %v9879_v40 = vld [vmem:[%s12299_s27 + $0x30] sm:$0xff]  ;;  %v9886_v41 = vld [vmem:[%s12299_s27 + $0x38] sm:$0xff]  ;;  %v9908_v51 = vld [vmem:[%s12297_s20 + $0x20] sm:$0xff] }
  0x26   :  { %8642 = vrot.lane.b32.xlu0 %v8641_v9, %s9635_s28  ;;  %v9903_v50 = vld [vmem:[%s12297_s20 + $0x30] sm:$0xf]  ;;  %v9922_v54 = vld [vmem:[%s12297_s20 + $0x40] sm:$0xff]  ;;  %v9933_v56 = vld [vmem:[%s12298_s25 + $0x8] sm:$0xff] }
  0x27   :  { %7913 = vmatmul.mubr.msk.f32.vlgmr.msra.gmra.mrb[0].mxu0 %vm159_vm3, %v76_v10  ;;  %v8298_v52 = vpack.c.bf16 %v9903_v50, %v9908_v51  ;;  %v9917_v53 = vld [vmem:[%s12297_s20 + $0x50] sm:$0xf]  ;;  %v9952_v59 = vld [vmem:[%s12297_s20 + $0x60] sm:$0xff]  ;;  %v9961_v61 = vld [vmem:[%s12298_s25 + $0x18] sm:$0xff]  ;;  %v120_v10 = vlaneseq }
  0x28   :  { %7915 = vmatprep.mubr.msk.f32.mxu0 %vm159_vm3, %v77_v11  ;;  %445 = vperm.xlu1 %8646, %v95_v24   ;;  %v9928_v55 = vpack.c.bf16 %v9917_v53, %v9922_v54  ;;  %v9940_v57 = vld [vmem:[%s12298_s25 + $0x10] sm:$0xff]  ;;  %v9968_v62 = vld [vmem:[%s12298_s25 + $0x20] sm:$0xff]  ;;  %v9975_v63 = vld [vmem:[%s12298_s25 + $0x28] sm:$0xff] }
  0x29   :  { %8300 = vmatprep.subr.msk.bf16.mxu0 %vm9756_vm2, %v8298_v52  ;;  %v9947_v58 = vld [vmem:[%s12297_s20 + $0x70] sm:$0xf]  ;;  %v9989_v2 = vld [vmem:[%s12298_s25 + $0x38] sm:$0xff]  ;;  %v9996_v3 = vld [vmem:[%s12299_s27] sm:$0xff]  ;;  %v10018_v20 = vand.u32 127, %v120_v10  ;;  %s9637_s27 = smov 1  }
  0x2a   :  { %435 = vperm.xlu0 %8647, %v93_v19   ;;  %8303 = vmatpush3.bf16.msk.msra.mxu0 %vm9756_vm2, %v8298_v52  ;;  %v9956_v60 = vpack.c.bf16 %v9947_v58, %v9952_v59  ;;  %v9982_v1 = vld [vmem:[%s12298_s25 + $0x30] sm:$0xff] }
  0x2b   :  { %7916 = vmatmul.mubr.msk.f32.gmra.mrb[2].mxu0 %vm159_vm3, %v78_v12  ;;  %vm130_vm6 = vcmp.eq.s32.totalorder %v10018_v20, 127 }
  0x2c   :  { %7918 = vmatprep.mubr.msk.f32.mxu0 %vm159_vm3, %v79_v13  ;;  %455 = vperm.xlu1 %8646, %v97_v25   ;;  %vm6854_vm7 = vmneg %vm130_vm6 }
  0x2d   :  { %vm10041_vm8 = vmpackc.low %vm6854_vm7, %vm6854_vm7 }
  0x2e   :  { %450 = vperm.xlu0 %8647, %v96_v21  }
  0x2f   :  { %7919 = vmatmul.mubr.msk.f32.gmra.mrb[4].mxu0 %vm159_vm3, %v80_v14 }
  0x30   :  { %7921 = vmatprep.mubr.msk.f32.mxu0 %vm159_vm3, %v81_v15 }
  0x32   :  { %460 = vperm.xlu0 %8647, %v98_v23  }
  0x33   :  { %7922 = vmatmul.mubr.msk.f32.gmra.mrb[6].mxu0 %vm159_vm3, %v82_v17 }
  0x34   :  { %7988 = vmatprep.mubr.msk.f32.mxu0 %vm159_vm3, %v75_v7  ;;  %v10007_v7 = vld [vmem:[%s12274_s6] sm:$0xff] }
  0x37   :  { %7989 = vmatmul.mubr.msk.f32.vlgmr.msra.gmra.mrb[8].mxu0 %vm159_vm3, %v9933_v56 }
  0x38   :  { %7991 = vmatprep.mubr.msk.f32.mxu0 %vm159_vm3, %v9940_v57 }
  0x3b   :  { %7992 = vmatmul.mubr.msk.f32.gmra.mrb[10].mxu0 %vm159_vm3, %v9961_v61 }
  0x3c   :  { %7994 = vmatprep.mubr.msk.f32.mxu0 %vm159_vm3, %v9968_v62 }
  0x3f   :  { %7995 = vmatmul.mubr.msk.f32.gmra.mrb[12].mxu0 %vm159_vm3, %v9975_v63 }
  0x40   :  { %7997 = vmatprep.mubr.msk.f32.mxu0 %vm159_vm3, %v9982_v1 }
  0x43   :  { %7998 = vmatmul.mubr.msk.f32.gmra.mrb[14].mxu0 %vm159_vm3, %v9989_v2 }
  0x44   :  { %8048 = vmatprep.mubr.msk.f32.mxu0 %vm159_vm3, %v9996_v3 }
  0x94   :  { %v8638_v26 = vpop.permute.xlu0 %8637 }
  0x95   :  { %v8640_v27 = vunpack.i.h.bf16 %v8638_v26  ;;  %v8639_v28 = vunpack.i.l.bf16 %v8638_v26 }
  0x97   :  { %v156_v32 = vsel %vm155_vm4, %v8639_v28, %v8640_v27 }
  0x98   :  { %v8643_v29 = vpop.permute.xlu0 %8642 }
  0x99   :  { %v8645_v30 = vunpack.i.h.bf16 %v8643_v29  ;;  %v8644_v31 = vunpack.i.l.bf16 %v8643_v29 }
  0x9b   :  { %v157_v33 = vsel %vm155_vm4, %v8644_v31, %v8645_v30  ;;  %v10000_v4 = vpop.permute.xlu1 %425 }
  0x9c   :  { %v8236_v34 = vpack.c.bf16 %v157_v33, %v156_v32 }
  0x9e   :  { %8238 = vmatprep.subr.msk.bf16.mxu1 %vm9756_vm2, %v8236_v34 }
  0x9f   :  { %8241 = vmatpush3.bf16.msk.msra.mxu1 %vm9756_vm2, %v8236_v34  ;;  %v10002_v5 = vpop.permute.xlu1 %430 }
  0xa2   :  { %7897 = vmatmul.mubr.msk.f32.vlgmr.msra.gmra.mrb[0].mxu1 %vm159_vm3, %v9844_v35 }
  0xa3   :  { %7899 = vmatprep.mubr.msk.f32.mxu1 %vm159_vm3, %v9851_v36  ;;  %v10013_v13 = vpop.permute.xlu1 %440 }
  0xa6   :  { %7900 = vmatmul.mubr.msk.f32.gmra.mrb[2].mxu1 %vm159_vm3, %v9858_v37 }
  0xa7   :  { %7902 = vmatprep.mubr.msk.f32.mxu1 %vm159_vm3, %v9865_v38  ;;  %v10024_v29 = vpop.permute.xlu1 %445 }
  0xa9   :  { %v10011_v11 = vpop.permute.xlu0 %435 }
  0xaa   :  { %7903 = vmatmul.mubr.msk.f32.gmra.mrb[4].mxu1 %vm159_vm3, %v9872_v39 }
  0xab   :  { %7905 = vmatprep.mubr.msk.f32.mxu1 %vm159_vm3, %v9879_v40 }
  0xad   :  { %v10021_v24 = vpop.permute.xlu0 %450 }
  0xae   :  { %7906 = vmatmul.mubr.msk.f32.gmra.mrb[6].mxu1 %vm159_vm3, %v9886_v41 }
  0xaf   :  { %7940 = vmatprep.mubr.msk.f32.mxu1 %vm528_vm5, %v10007_v7 }
  0xfa   :  { %v7914_v42 = vpop.f32.mrb[0].mxu0 }
  0xfb   :  { %v384_v43 = vpop.f32.mrb[1].mxu0 }
  0xfe   :  { %v7917_v44 = vpop.f32.mrb[2].mxu0 }
  0xff   :  { %v394_v45 = vpop.f32.mrb[3].mxu0 }
 0x102   :  { %v7920_v46 = vpop.f32.mrb[4].mxu0 }
 0x103   :  { %v9894_v47 = vpop.f32.mrb[5].mxu0 }
 0x106   :  { %v9896_v48 = vpop.f32.mrb[6].mxu0 }
 0x107   :  { %v9898_v49 = vpop.f32.mrb[7].mxu0 }
 0x10a   :  { %v7990_v0 = vpop.f32.mrb[8].mxu0 }
 0x175   :  { %v7898_v6 = vpop.f32.mrb[0].mxu1 }
 0x176   :  { %v390_v8 = vadd.f32 %v7914_v42, %v7898_v6  ;;  %v253_v9 = vpop.f32.mrb[1].mxu1 }
 0x177   :  { %v385_v12 = vadd.f32 %v384_v43, %v253_v9 }
 0x178   :  { %v464_v14 = vadd.f32 %v10002_v5, %v390_v8 }
 0x179   :  { %v463_v15 = vadd.f32 %v10000_v4, %v385_v12  ;;  %v7901_v16 = vpop.f32.mrb[2].mxu1 }
 0x17a   :  { %v472_v17 = vmax.f32 %v464_v14, 0.0  ;;  %v400_v18 = vadd.f32 %v7917_v44, %v7901_v16  ;;  %v263_v19 = vpop.f32.mrb[3].mxu1  ;;  %v10038_v14 = vpop.permute.xlu1 %455 }
 0x17b   :  { %v471_v21 = vmax.f32 %v463_v15, 0.0  ;;  %v395_v22 = vadd.f32 %v394_v45, %v263_v19 }
 0x17c   :  { %v466_v23 = vadd.f32 %v10013_v13, %v400_v18 }
 0x17d   :  { %v465_v25 = vadd.f32 %v10011_v11, %v395_v22  ;;  %v7904_v26 = vpop.f32.mrb[4].mxu1  ;;  %v8648_v27 = vpack.i.bf16 %v472_v17, %v471_v21  ;;  %v8248_v28 = vpack.c.bf16 %v472_v17, %v471_v21  ;;  %v6911_v22 = vld [vmem:[%s12297_s20 + $0x28] sm:$0xff] }
 0x17e   :  { %v474_v30 = vmax.f32 %v466_v23, 0.0  ;;  %v410_v31 = vadd.f32 %v7920_v46, %v7904_v26  ;;  %v273_v32 = vpop.f32.mrb[5].mxu1 }
 0x17f   :  { %v473_v33 = vmax.f32 %v465_v25, 0.0  ;;  %v405_v34 = vadd.f32 %v9894_v47, %v273_v32  ;;  %8649 = vrot.lane.b32.xlu1 %v8648_v27, %s9637_s27  ;;  %8249 = vmatprep.subr.bf16.mxu1 %v8248_v28  ;;  %v10034_v47 = vpop.permute.xlu0 %460  ;;  %v6989_v32 = vld [vmem:[%s12297_s20 + $0x48] sm:$0xff] }
 0x180   :  { %v468_v42 = vadd.f32 %v10021_v24, %v410_v31  ;;  %8251 = vmatpush3.bf16.msra.mxu1 %v8248_v28  ;;  %v6913_v28 = vld [vmem:[%s12297_s20 + $0x38] sm:$0xf] }
 0x181   :  { %v467_v43 = vadd.f32 %v10024_v29, %v405_v34  ;;  %v7907_v44 = vpop.f32.mrb[6].mxu1  ;;  %v8653_v45 = vpack.i.bf16 %v474_v30, %v473_v33  ;;  %v8252_v52 = vpack.c.bf16 %v474_v30, %v473_v33  ;;  %v8668_v30 = vpack.i.bf16 %v6911_v22, %v9908_v51  ;;  %v10078_v34 = vld [vmem:[%s12274_s6 + $0x8] sm:$0xff]  ;;  %v6991_v51 = vld [vmem:[%s12297_s20 + $0x58] sm:$0xf] }
 0x182   :  { %v476_v46 = vmax.f32 %v468_v42, 0.0  ;;  %v420_v6 = vadd.f32 %v9896_v48, %v7907_v44  ;;  %v283_v8 = vpop.f32.mrb[7].mxu1  ;;  %v8673_v33 = vpack.i.bf16 %v6913_v28, %v9903_v50  ;;  %v8678_v42 = vpack.i.bf16 %v6989_v32, %v9922_v54  ;;  %v7067_v50 = vld [vmem:[%s12297_s20 + $0x68] sm:$0xff]  ;;  %v10102_v54 = vld [vmem:[%s12274_s6 + $0x18] sm:$0xff] }
 0x183   :  { %v475_v9 = vmax.f32 %v467_v43, 0.0  ;;  %v415_v12 = vadd.f32 %v9898_v49, %v283_v8  ;;  %8654 = vrot.lane.b32.xlu0 %v8653_v45, %s9637_s27  ;;  %8253 = vmatprep.subr.bf16.mxu1 %v8252_v52  ;;  %v10088_v43 = vld [vmem:[%s12274_s6 + $0x10] sm:$0xff]  ;;  %v8683_v44 = vpack.i.bf16 %v6991_v51, %v9917_v53  ;;  %v7069_v45 = vld [vmem:[%s12297_s20 + $0x78] sm:$0xf]  ;;  %v10112_v53 = vld [vmem:[%s12273_s5] sm:$0xff] }
 0x184   :  { %v470_v15 = vadd.f32 %v10034_v47, %v420_v6  ;;  %8255 = vmatpush3.bf16.msra.mxu1 %v8252_v52  ;;  %v484_v48 = vsel %vm130_vm6, 0.0, %v476_v46  ;;  %v8688_v52 = vpack.i.bf16 %v7067_v50, %v9952_v59 }
 0x185   :  { %v8256_v17 = vpack.c.bf16 %v476_v46, %v475_v9  ;;  %v469_v18 = vadd.f32 %v10038_v14, %v415_v12  ;;  %v483_v49 = vsel %vm130_vm6, 0.0, %v475_v9  ;;  %v8693_v46 = vpack.i.bf16 %v7069_v45, %v9947_v58  ;;  %v10146_v45 = vld [vmem:[%s12273_s5 + $0x8] sm:$0xff] }
 0x186   :  { %v478_v19 = vmax.f32 %v470_v15, 0.0  ;;  %v8658_v21 = vpack.i.bf16 %v484_v48, %v483_v49 }
 0x187   :  { %v477_v23 = vmax.f32 %v469_v18, 0.0  ;;  %8258 = vmatprep.subr.msk.bf16.mxu1 %vm10041_vm8, %v8256_v17 }
 0x188   :  { %8659 = vrot.lane.b32.xlu1 %v8658_v21, %s9637_s27  ;;  %8261 = vmatpush3.bf16.msk.msra.mxu1 %vm10041_vm8, %v8256_v17  ;;  %v486_v25 = vsel %vm130_vm6, 0.0, %v478_v19 }
 0x189   :  { %v8262_v26 = vpack.c.bf16 %v478_v19, %v477_v23  ;;  %v485_v27 = vsel %vm130_vm6, 0.0, %v477_v23 }
 0x18a   :  { %v8663_v31 = vpack.i.bf16 %v486_v25, %v485_v27 }
 0x18b   :  { %8264 = vmatprep.subr.msk.bf16.mxu1 %vm10041_vm8, %v8262_v26 }
 0x18c   :  { %8664 = vrot.lane.b32.xlu0 %v8663_v31, %s9637_s27  ;;  %8267 = vmatpush3.bf16.msk.msra.mxu1 %vm10041_vm8, %v8262_v26 }
 0x18d   :  { %8669 = vrot.lane.b32.xlu1 %v8668_v30, %s9635_s28 }
 0x18f   :  { %7941 = vmatmul.mubr.msk.f32.vlgmr.msra.gmra.mrb[8].mxu1 %vm528_vm5, %v10078_v34 }
 0x190   :  { %8674 = vrot.lane.b32.xlu0 %v8673_v33, %s9635_s28  ;;  %7943 = vmatprep.mubr.msk.f32.mxu1 %vm528_vm5, %v10088_v43 }
 0x191   :  { %8679 = vrot.lane.b32.xlu1 %v8678_v42, %s9635_s28 }
 0x193   :  { %7944 = vmatmul.mubr.msk.f32.gmra.mrb[10].mxu1 %vm528_vm5, %v10102_v54 }
 0x194   :  { %8684 = vrot.lane.b32.xlu0 %v8683_v44, %s9635_s28  ;;  %7962 = vmatprep.mubr.msk.f32.mxu1 %vm528_vm5, %v10112_v53 }
 0x195   :  { %8689 = vrot.lane.b32.xlu1 %v8688_v52, %s9635_s28 }
 0x198   :  { %8694 = vrot.lane.b32.xlu0 %v8693_v46, %s9635_s28  ;;  %v10152_v46 = vld [vmem:[%s12273_s5 + $0x10] sm:$0xff] }
 0x1f1   :  { %v8650_v59 = vpop.permute.xlu1 %8649 }
 0x1f2   :  { %v8652_v6 = vunpack.i.h.bf16 %v8650_v59  ;;  %v8651_v8 = vunpack.i.l.bf16 %v8650_v59 }
 0x1f4   :  { %v8268_v12 = vpack.c.bf16 %v8652_v6, %v8651_v8 }
 0x1f5   :  { %v8655_v15 = vpop.permute.xlu0 %8654 }
 0x1f6   :  { %v8657_v48 = vunpack.i.h.bf16 %v8655_v15  ;;  %v8656_v58 = vunpack.i.l.bf16 %v8655_v15  ;;  %8270 = vmatprep.subr.msk.bf16.mxu1 %vm10122_vm11, %v8268_v12 }
 0x1f7   :  { %8273 = vmatpush3.bf16.msk.msra.mxu1 %vm10122_vm11, %v8268_v12 }
 0x1f8   :  { %v8274_v17 = vpack.c.bf16 %v8657_v48, %v8656_v58  ;;  %v10164_v58 = vld [vmem:[%s12273_s5 + $0x18] sm:$0xff] }
 0x1fa   :  { %v8660_v18 = vpop.permute.xlu1 %8659  ;;  %8276 = vmatprep.subr.msk.bf16.mxu1 %vm10122_vm11, %v8274_v17 }
 0x1fb   :  { %v8662_v49 = vunpack.i.h.bf16 %v8660_v18  ;;  %v8661_v19 = vunpack.i.l.bf16 %v8660_v18  ;;  %8279 = vmatpush3.bf16.msk.msra.mxu1 %vm10122_vm11, %v8274_v17 }
 0x1fd   :  { %v8280_v21 = vpack.c.bf16 %v8662_v49, %v8661_v19 }
 0x1fe   :  { %v8665_v22 = vpop.permute.xlu0 %8664 }
 0x1ff   :  { %v8667_v23 = vunpack.i.h.bf16 %v8665_v22  ;;  %v8666_v25 = vunpack.i.l.bf16 %v8665_v22  ;;  %8282 = vmatprep.subr.msk.bf16.mxu1 %vm10122_vm11, %v8280_v21  ;;  %v8670_v26 = vpop.permute.xlu1 %8669 }
 0x200   :  { %8285 = vmatpush3.bf16.msk.msra.mxu1 %vm10122_vm11, %v8280_v21  ;;  %v8672_v27 = vunpack.i.h.bf16 %v8670_v26  ;;  %v8671_v28 = vunpack.i.l.bf16 %v8670_v26 }
 0x201   :  { %v8286_v30 = vpack.c.bf16 %v8667_v23, %v8666_v25 }
 0x202   :  { %v8675_v31 = vpop.permute.xlu0 %8674  ;;  %v884_v51 = vsel %vm155_vm4, %v8671_v28, %v8672_v27 }
 0x203   :  { %v8677_v32 = vunpack.i.h.bf16 %v8675_v31  ;;  %v8676_v33 = vunpack.i.l.bf16 %v8675_v31  ;;  %8288 = vmatprep.subr.msk.bf16.mxu1 %vm10122_vm11, %v8286_v30  ;;  %v8680_v42 = vpop.permute.xlu1 %8679 }
 0x204   :  { %8291 = vmatpush3.bf16.msk.msra.mxu1 %vm10122_vm11, %v8286_v30  ;;  %v8682_v50 = vunpack.i.h.bf16 %v8680_v42  ;;  %v8681_v44 = vunpack.i.l.bf16 %v8680_v42 }
 0x205   :  { %v885_v52 = vsel %vm155_vm4, %v8676_v33, %v8677_v32 }
 0x206   :  { %v8292_v59 = vpack.c.bf16 %v885_v52, %v884_v51  ;;  %v8685_v6 = vpop.permute.xlu0 %8684  ;;  %v1476_v15 = vsel %vm155_vm4, %v8681_v44, %v8682_v50 }
 0x207   :  { %v8687_v8 = vunpack.i.h.bf16 %v8685_v6  ;;  %v8686_v12 = vunpack.i.l.bf16 %v8685_v6  ;;  %7963 = vmatmul.mubr.msk.f32.vlgmr.msra.gmra.mrb[8].mxu1 %vm528_vm5, %v10146_v45  ;;  %v8690_v48 = vpop.permute.xlu1 %8689 }
 0x208   :  { %8294 = vmatprep.subr.msk.bf16.mxu1 %vm9756_vm2, %v8292_v59  ;;  %7965 = vmatprep.mubr.msk.f32.mxu1 %vm528_vm5, %v10152_v46  ;;  %v8692_v17 = vunpack.i.h.bf16 %v8690_v48  ;;  %v8691_v18 = vunpack.i.l.bf16 %v8690_v48 }
 0x209   :  { %v1477_v49 = vsel %vm155_vm4, %v8686_v12, %v8687_v8  ;;  %8297 = vmatpush3.bf16.msk.msra.mxu1 %vm9756_vm2, %v8292_v59 }
 0x20a   :  { %v8348_v19 = vpack.c.bf16 %v1477_v49, %v1476_v15  ;;  %v8695_v21 = vpop.permute.xlu0 %8694  ;;  %v2068_v25 = vsel %vm155_vm4, %v8691_v18, %v8692_v17 }
 0x20b   :  { %7966 = vmatmul.mubr.msk.f32.gmra.mrb[10].mxu1 %vm528_vm5, %v10164_v58  ;;  %v8697_v22 = vunpack.i.h.bf16 %v8695_v21  ;;  %v8696_v23 = vunpack.i.l.bf16 %v8695_v21 }
 0x20c   :  { %8350 = vmatprep.subr.msk.bf16.mxu0 %vm9756_vm2, %v8348_v19  ;;  %7972 = vmatprep.mubr.msk.f32.mxu1 %vm159_vm3, %v9996_v3 }
 0x20d   :  { %8353 = vmatpush3.bf16.msk.msra.mxu0 %vm9756_vm2, %v8348_v19  ;;  %v2069_v26 = vsel %vm155_vm4, %v8696_v23, %v8697_v22 }
 0x20e   :  { %8356 = vmatprep.subr.msk.bf16.mxu0 %vm9756_vm2, %v9928_v55  ;;  %v8404_v27 = vpack.c.bf16 %v2069_v26, %v2068_v25 }
 0x20f   :  { %7973 = vmatmul.mubr.msk.f32.vlgmr.msra.gmra.mrb[12].mxu1 %vm159_vm3, %v9844_v35 }
 0x210   :  { %8049 = vmatmul.mubr.msk.f32.vlgmr.msra.gmra.mrb[16].mxu0 %vm159_vm3, %v9844_v35  ;;  %7975 = vmatprep.mubr.msk.f32.mxu1 %vm159_vm3, %v9851_v36 }
 0x211   :  { %8051 = vmatprep.mubr.msk.f32.mxu0 %vm159_vm3, %v9851_v36  ;;  %8359 = vmatpush3.bf16.msk.msra.mxu0 %vm9756_vm2, %v9928_v55  ;;  %v9558_v55 = vld [vmem:[%s12298_s25] sm:$0xff] }
 0x212   :  { %8406 = vmatprep.subr.msk.bf16.mxu0 %vm9756_vm2, %v8404_v27 }
 0x213   :  { %7976 = vmatmul.mubr.msk.f32.gmra.mrb[14].mxu1 %vm159_vm3, %v9858_v37 }
 0x214   :  { %8052 = vmatmul.mubr.msk.f32.gmra.mrb[18].mxu0 %vm159_vm3, %v9858_v37  ;;  %7978 = vmatprep.mubr.msk.f32.mxu1 %vm159_vm3, %v9865_v38 }
 0x215   :  { %8054 = vmatprep.mubr.msk.f32.mxu0 %vm159_vm3, %v9865_v38 }
 0x217   :  { %7979 = vmatmul.mubr.msk.f32.gmra.mrb[16].mxu1 %vm159_vm3, %v9872_v39 }
 0x218   :  { %8055 = vmatmul.mubr.msk.f32.gmra.mrb[20].mxu0 %vm159_vm3, %v9872_v39  ;;  %7981 = vmatprep.mubr.msk.f32.mxu1 %vm159_vm3, %v9879_v40 }
 0x219   :  { %8057 = vmatprep.mubr.msk.f32.mxu0 %vm159_vm3, %v9879_v40 }
 0x21b   :  { %7982 = vmatmul.mubr.msk.f32.gmra.mrb[18].mxu1 %vm159_vm3, %v9886_v41 }
 0x21c   :  { %8058 = vmatmul.mubr.msk.f32.gmra.mrb[22].mxu0 %vm159_vm3, %v9886_v41  ;;  %8016 = vmatprep.mubr.msk.f32.mxu1 %vm528_vm5, %v10007_v7 }
 0x21d   :  { %8064 = vmatprep.mubr.msk.f32.mxu0 %vm159_vm3, %v9558_v55 }
 0x220   :  { %8065 = vmatmul.mubr.msk.f32.vlgmr.msra.gmra.mrb[16].mxu0 %vm159_vm3, %v9933_v56 }
 0x221   :  { %8067 = vmatprep.mubr.msk.f32.mxu0 %vm159_vm3, %v9940_v57  ;;  %8409 = vmatpush3.bf16.msk.msra.mxu0 %vm9756_vm2, %v8404_v27 }
 0x222   :  { %8412 = vmatprep.subr.msk.bf16.mxu0 %vm9756_vm2, %v9956_v60 }
 0x224   :  { %8068 = vmatmul.mubr.msk.f32.gmra.mrb[18].mxu0 %vm159_vm3, %v9961_v61 }
 0x225   :  { %8070 = vmatprep.mubr.msk.f32.mxu0 %vm159_vm3, %v9968_v62 }
 0x228   :  { %8071 = vmatmul.mubr.msk.f32.gmra.mrb[20].mxu0 %vm159_vm3, %v9975_v63 }
 0x229   :  { %8073 = vmatprep.mubr.msk.f32.mxu0 %vm159_vm3, %v9982_v1 }
 0x22c   :  { %8074 = vmatmul.mubr.msk.f32.gmra.mrb[22].mxu0 %vm159_vm3, %v9989_v2 }
 0x22d   :  { %8124 = vmatprep.mubr.msk.f32.mxu0 %vm159_vm3, %v9996_v3 }
 0x230   :  { %8125 = vmatmul.mubr.msk.f32.vlgmr.msra.gmra.mrb[24].mxu0 %vm159_vm3, %v9844_v35  ;;  %v1062_v35 = vpop.f32.mrb[9].mxu0 }
 0x231   :  { %8127 = vmatprep.mubr.msk.f32.mxu0 %vm159_vm3, %v9851_v36  ;;  %8415 = vmatpush3.bf16.msk.msra.mxu0 %vm9756_vm2, %v9956_v60  ;;  %v7993_v36 = vpop.f32.mrb[10].mxu0 }
 0x234   :  { %8128 = vmatmul.mubr.msk.f32.gmra.mrb[26].mxu0 %vm159_vm3, %v9858_v37  ;;  %v1072_v37 = vpop.f32.mrb[11].mxu0 }
 0x235   :  { %8130 = vmatprep.mubr.msk.f32.mxu0 %vm159_vm3, %v9865_v38  ;;  %v7996_v38 = vpop.f32.mrb[12].mxu0 }
 0x238   :  { %8131 = vmatmul.mubr.msk.f32.gmra.mrb[28].mxu0 %vm159_vm3, %v9872_v39  ;;  %v1082_v39 = vpop.f32.mrb[13].mxu0 }
 0x239   :  { %8133 = vmatprep.mubr.msk.f32.mxu0 %vm159_vm3, %v9879_v40  ;;  %v7999_v40 = vpop.f32.mrb[14].mxu0 }
 0x23c   :  { %8134 = vmatmul.mubr.msk.f32.gmra.mrb[30].mxu0 %vm159_vm3, %v9886_v41  ;;  %v1092_v41 = vpop.f32.mrb[15].mxu0 }
 0x23d   :  { %8140 = vmatprep.mubr.msk.f32.mxu0 %vm159_vm3, %v9558_v55 }
 0x240   :  { %8141 = vmatmul.mubr.msk.f32.vlgmr.msra.gmra.mrb[24].mxu0 %vm159_vm3, %v9933_v56 }
 0x241   :  { %8143 = vmatprep.mubr.msk.f32.mxu0 %vm159_vm3, %v9940_v57 }
 0x244   :  { %8144 = vmatmul.mubr.msk.f32.gmra.mrb[26].mxu0 %vm159_vm3, %v9961_v61 }
 0x245   :  { %8146 = vmatprep.mubr.msk.f32.mxu0 %vm159_vm3, %v9968_v62 }
 0x248   :  { %8147 = vmatmul.mubr.msk.f32.gmra.mrb[28].mxu0 %vm159_vm3, %v9975_v63 }
 0x249   :  { %8149 = vmatprep.mubr.msk.f32.mxu0 %vm159_vm3, %v9982_v1 }
 0x24c   :  { %8150 = vmatmul.mubr.msk.f32.gmra.mrb[30].mxu0 %vm159_vm3, %v9989_v2 }
 0x2da   :  { %v10274_v56 = vpop.f32.mrb[8].mxu1 }
 0x2db   :  { %v10276_v57 = vpop.f32.mrb[9].mxu1 }
 0x2de   :  { %v10278_v60 = vpop.f32.mrb[10].mxu1 }
 0x2df   :  { %v10280_v61 = vpop.f32.mrb[11].mxu1 }
 0x2e2   :  { %v7974_v62 = vpop.f32.mrb[12].mxu1 }
 0x2e3   :  { %v1068_v63 = vadd.f32 %v7990_v0, %v7974_v62  ;;  %v955_v1 = vpop.f32.mrb[13].mxu1 }
 0x2e4   :  { %v1063_v2 = vadd.f32 %v1062_v35, %v955_v1 }
 0x2e5   :  { %v1102_v3 = vadd.f32 %v1068_v63, %v10002_v5 }
 0x2e6   :  { %v1101_v28 = vadd.f32 %v1063_v2, %v10000_v4  ;;  %v7977_v30 = vpop.f32.mrb[14].mxu1 }
 0x2e7   :  { %v1110_v31 = vmax.f32 %v1102_v3, 0.0  ;;  %v1078_v32 = vadd.f32 %v7993_v36, %v7977_v30  ;;  %v965_v33 = vpop.f32.mrb[15].mxu1 }
 0x2e8   :  { %v1109_v51 = vmax.f32 %v1101_v28, 0.0  ;;  %v1073_v42 = vadd.f32 %v1072_v37, %v965_v33 }
 0x2e9   :  { %v1104_v50 = vadd.f32 %v1078_v32, %v10013_v13 }
 0x2ea   :  { %v1103_v44 = vadd.f32 %v1073_v42, %v10011_v11  ;;  %v7980_v52 = vpop.f32.mrb[16].mxu1  ;;  %v8698_v59 = vpack.i.bf16 %v1110_v31, %v1109_v51  ;;  %v8304_v6 = vpack.c.bf16 %v1110_v31, %v1109_v51 }
 0x2eb   :  { %v1112_v8 = vmax.f32 %v1104_v50, 0.0  ;;  %v1088_v12 = vadd.f32 %v7996_v38, %v7980_v52  ;;  %v975_v15 = vpop.f32.mrb[17].mxu1 }
 0x2ec   :  { %v1111_v48 = vmax.f32 %v1103_v44, 0.0  ;;  %v1083_v17 = vadd.f32 %v1082_v39, %v975_v15  ;;  %8699 = vrot.lane.b32.xlu1 %v8698_v59, %s9637_s27  ;;  %8305 = vmatprep.subr.bf16.mxu1 %v8304_v6 }
 0x2ed   :  { %v1106_v18 = vadd.f32 %v1088_v12, %v10021_v24  ;;  %8307 = vmatpush3.bf16.msra.mxu1 %v8304_v6 }
 0x2ee   :  { %v1105_v49 = vadd.f32 %v1083_v17, %v10024_v29  ;;  %v7983_v19 = vpop.f32.mrb[18].mxu1  ;;  %v8703_v21 = vpack.i.bf16 %v1112_v8, %v1111_v48  ;;  %v8308_v22 = vpack.c.bf16 %v1112_v8, %v1111_v48 }
 0x2ef   :  { %v1114_v23 = vmax.f32 %v1106_v18, 0.0  ;;  %v1098_v25 = vadd.f32 %v7999_v40, %v7983_v19  ;;  %v985_v26 = vpop.f32.mrb[19].mxu1 }
 0x2f0   :  { %v1113_v27 = vmax.f32 %v1105_v49, 0.0  ;;  %v1093_v55 = vadd.f32 %v1092_v41, %v985_v26  ;;  %8704 = vrot.lane.b32.xlu0 %v8703_v21, %s9637_s27  ;;  %8309 = vmatprep.subr.bf16.mxu1 %v8308_v22 }
 0x2f1   :  { %v1108_v0 = vadd.f32 %v1098_v25, %v10034_v47  ;;  %8311 = vmatpush3.bf16.msra.mxu1 %v8308_v22  ;;  %v1122_v35 = vsel %vm130_vm6, 0.0, %v1114_v23 }
 0x2f2   :  { %v8312_v36 = vpack.c.bf16 %v1114_v23, %v1113_v27  ;;  %v1107_v37 = vadd.f32 %v1093_v55, %v10038_v14  ;;  %v1121_v38 = vsel %vm130_vm6, 0.0, %v1113_v27 }
 0x2f3   :  { %v1116_v39 = vmax.f32 %v1108_v0, 0.0  ;;  %v8066_v40 = vpop.f32.mrb[16].mxu0  ;;  %v8708_v62 = vpack.i.bf16 %v1122_v35, %v1121_v38 }
 0x2f4   :  { %v1115_v63 = vmax.f32 %v1107_v37, 0.0  ;;  %v1694_v41 = vadd.f32 %v8066_v40, %v10002_v5  ;;  %8314 = vmatprep.subr.msk.bf16.mxu1 %vm10041_vm8, %v8312_v36  ;;  %v1654_v1 = vpop.f32.mrb[17].mxu0 }
 0x2f5   :  { %v1693_v2 = vadd.f32 %v1654_v1, %v10000_v4  ;;  %8317 = vmatpush3.bf16.msk.msra.mxu1 %vm10041_vm8, %v8312_v36  ;;  %8709 = vrot.lane.b32.xlu1 %v8708_v62, %s9637_s27  ;;  %v1124_v3 = vsel %vm130_vm6, 0.0, %v1116_v39 }
 0x2f6   :  { %v8318_v28 = vpack.c.bf16 %v1116_v39, %v1115_v63  ;;  %v1702_v30 = vmax.f32 %v1694_v41, 0.0  ;;  %v1123_v31 = vsel %vm130_vm6, 0.0, %v1115_v63 }
 0x2f7   :  { %v1701_v32 = vmax.f32 %v1693_v2, 0.0  ;;  %v8069_v33 = vpop.f32.mrb[18].mxu0  ;;  %v8713_v51 = vpack.i.bf16 %v1124_v3, %v1123_v31 }
 0x2f8   :  { %v1696_v42 = vadd.f32 %v8069_v33, %v10013_v13  ;;  %8320 = vmatprep.subr.msk.bf16.mxu1 %vm10041_vm8, %v8318_v28  ;;  %v1664_v50 = vpop.f32.mrb[19].mxu0 }
 0x2f9   :  { %v8718_v44 = vpack.i.bf16 %v1702_v30, %v1701_v32  ;;  %v10310_v52 = vpack.c.bf16 %v1702_v30, %v1701_v32  ;;  %v1695_v59 = vadd.f32 %v1664_v50, %v10011_v11  ;;  %8323 = vmatpush3.bf16.msk.msra.mxu1 %vm10041_vm8, %v8318_v28  ;;  %8714 = vrot.lane.b32.xlu0 %v8713_v51, %s9637_s27 }
 0x2fa   :  { %v1704_v6 = vmax.f32 %v1696_v42, 0.0 }
 0x2fb   :  { %v1703_v8 = vmax.f32 %v1695_v59, 0.0  ;;  %v8072_v12 = vpop.f32.mrb[20].mxu0  ;;  %8719 = vrot.lane.b32.xlu1 %v8718_v44, %s9637_s27 }
 0x2fc   :  { %v1698_v15 = vadd.f32 %v8072_v12, %v10021_v24  ;;  %v1674_v48 = vpop.f32.mrb[21].mxu0  ;;  %8017 = vmatmul.mubr.msk.f32.vlgmr.msra.gmra.mrb[20].mxu1 %vm528_vm5, %v10078_v34 }
 0x2fd   :  { %v8723_v17 = vpack.i.bf16 %v1704_v6, %v1703_v8  ;;  %v10320_v18 = vpack.c.bf16 %v1704_v6, %v1703_v8  ;;  %v1697_v49 = vadd.f32 %v1674_v48, %v10024_v29  ;;  %8019 = vmatprep.mubr.msk.f32.mxu1 %vm528_vm5, %v10088_v43 }
 0x2fe   :  { %v1706_v19 = vmax.f32 %v1698_v15, 0.0 }
 0x2ff   :  { %v1705_v21 = vmax.f32 %v1697_v49, 0.0  ;;  %v8075_v22 = vpop.f32.mrb[22].mxu0  ;;  %8724 = vrot.lane.b32.xlu0 %v8723_v17, %s9637_s27 }
 0x300   :  { %v1714_v23 = vsel %vm130_vm6, 0.0, %v1706_v19  ;;  %v1700_v25 = vadd.f32 %v8075_v22, %v10034_v47  ;;  %v1684_v26 = vpop.f32.mrb[23].mxu0  ;;  %8020 = vmatmul.mubr.msk.f32.gmra.mrb[22].mxu1 %vm528_vm5, %v10102_v54 }
 0x301   :  { %v1713_v27 = vsel %vm130_vm6, 0.0, %v1705_v21  ;;  %v10333_v55 = vpack.c.bf16 %v1706_v19, %v1705_v21  ;;  %v1699_v0 = vadd.f32 %v1684_v26, %v10038_v14  ;;  %8038 = vmatprep.mubr.msk.f32.mxu1 %vm528_vm5, %v10112_v53 }
 0x302   :  { %v1708_v35 = vmax.f32 %v1700_v25, 0.0  ;;  %v8728_v36 = vpack.i.bf16 %v1714_v23, %v1713_v27  ;;  %v108_v27 = vld [vmem:[%s12275_s7 + $0x8] sm:$0xff] }
 0x303   :  { %v1707_v37 = vmax.f32 %v1699_v0, 0.0 }
 0x304   :  { %v1716_v38 = vsel %vm130_vm6, 0.0, %v1708_v35  ;;  %8729 = vrot.lane.b32.xlu1 %v8728_v36, %s9637_s27  ;;  %v110_v36 = vld [vmem:[%s12275_s7 + $0x18] sm:$0xff] }
 0x305   :  { %v1715_v39 = vsel %vm130_vm6, 0.0, %v1707_v37  ;;  %v10343_v40 = vpack.c.bf16 %v1708_v35, %v1707_v37  ;;  %v109_v35 = vld [vmem:[%s12275_s7 + $0x10] sm:$0xff] }
 0x306   :  { %v8733_v62 = vpack.i.bf16 %v1716_v38, %v1715_v39 }
 0x308   :  { %8734 = vrot.lane.b32.xlu0 %v8733_v62, %s9637_s27 }
 0x313   :  { %v8142_v63 = vpop.f32.mrb[24].mxu0 }
 0x314   :  { %v2286_v41 = vadd.f32 %v8142_v63, %v10002_v5  ;;  %v2246_v1 = vpop.f32.mrb[25].mxu0 }
 0x315   :  { %v2285_v2 = vadd.f32 %v2246_v1, %v10000_v4 }
 0x316   :  { %v2294_v3 = vmax.f32 %v2286_v41, 0.0 }
 0x317   :  { %v2293_v28 = vmax.f32 %v2285_v2, 0.0  ;;  %v8145_v30 = vpop.f32.mrb[26].mxu0 }
 0x318   :  { %v2288_v31 = vadd.f32 %v8145_v30, %v10013_v13  ;;  %v2256_v32 = vpop.f32.mrb[27].mxu0 }
 0x319   :  { %v8738_v33 = vpack.i.bf16 %v2294_v3, %v2293_v28  ;;  %v10349_v51 = vpack.c.bf16 %v2294_v3, %v2293_v28  ;;  %v2287_v42 = vadd.f32 %v2256_v32, %v10011_v11 }
 0x31a   :  { %v2296_v50 = vmax.f32 %v2288_v31, 0.0 }
 0x31b   :  { %v2295_v44 = vmax.f32 %v2287_v42, 0.0  ;;  %v8148_v59 = vpop.f32.mrb[28].mxu0  ;;  %8739 = vrot.lane.b32.xlu1 %v8738_v33, %s9637_s27 }
 0x31c   :  { %v2290_v5 = vadd.f32 %v8148_v59, %v10021_v24  ;;  %v2266_v6 = vpop.f32.mrb[29].mxu0 }
 0x31d   :  { %v8743_v4 = vpack.i.bf16 %v2296_v50, %v2295_v44  ;;  %v10354_v8 = vpack.c.bf16 %v2296_v50, %v2295_v44  ;;  %v2289_v12 = vadd.f32 %v2266_v6, %v10024_v29 }
 0x31e   :  { %v2298_v13 = vmax.f32 %v2290_v5, 0.0 }
 0x31f   :  { %v2297_v15 = vmax.f32 %v2289_v12, 0.0  ;;  %v8151_v48 = vpop.f32.mrb[30].mxu0  ;;  %8744 = vrot.lane.b32.xlu0 %v8743_v4, %s9637_s27 }
 0x320   :  { %v2306_v11 = vsel %vm130_vm6, 0.0, %v2298_v13  ;;  %v2292_v17 = vadd.f32 %v8151_v48, %v10034_v47  ;;  %v2276_v49 = vpop.f32.mrb[31].mxu0 }
 0x321   :  { %v2305_v24 = vsel %vm130_vm6, 0.0, %v2297_v15  ;;  %v10363_v19 = vpack.c.bf16 %v2298_v13, %v2297_v15  ;;  %v2291_v21 = vadd.f32 %v2276_v49, %v10038_v14  ;;  %v107_v14 = vld [vmem:[%s12275_s7] sm:$0xff] }
 0x322   :  { %v2300_v22 = vmax.f32 %v2292_v17, 0.0  ;;  %v8748_v29 = vpack.i.bf16 %v2306_v11, %v2305_v24 }
 0x323   :  { %v2299_v23 = vmax.f32 %v2291_v21, 0.0 }
 0x324   :  { %v2308_v25 = vsel %vm130_vm6, 0.0, %v2300_v22  ;;  %8749 = vrot.lane.b32.xlu1 %v8748_v29, %s9637_s27 }
 0x325   :  { %v2307_v26 = vsel %vm130_vm6, 0.0, %v2299_v23  ;;  %v10371_v47 = vpack.c.bf16 %v2300_v22, %v2299_v23 }
 0x326   :  { %v8753_v0 = vpack.i.bf16 %v2308_v25, %v2307_v26 }
 0x328   :  { %730 = vperm.xlu1 %8646, %v108_v27   ;;  %8754 = vrot.lane.b32.xlu0 %v8753_v0, %s9637_s27 }
 0x32c   :  { %725 = vperm.xlu1 %8646, %v107_v14   ;;  %735 = vperm.xlu0 %8647, %v109_v35  }
 0x330   :  { %740 = vperm.xlu0 %8647, %v110_v36  }
 0x35e   :  { %v8700_v37 = vpop.permute.xlu1 %8699 }
 0x35f   :  { %v8702_v38 = vunpack.i.h.bf16 %v8700_v37  ;;  %v8701_v39 = vunpack.i.l.bf16 %v8700_v37 }
 0x361   :  { %v8324_v62 = vpack.c.bf16 %v8702_v38, %v8701_v39 }
 0x362   :  { %v8705_v63 = vpop.permute.xlu0 %8704 }
 0x363   :  { %v8707_v41 = vunpack.i.h.bf16 %v8705_v63  ;;  %v8706_v1 = vunpack.i.l.bf16 %v8705_v63  ;;  %8326 = vmatprep.subr.msk.bf16.mxu1 %vm10122_vm11, %v8324_v62 }
 0x364   :  { %8329 = vmatpush3.bf16.msk.msra.mxu1 %vm10122_vm11, %v8324_v62 }
 0x365   :  { %v8330_v2 = vpack.c.bf16 %v8707_v41, %v8706_v1 }
 0x367   :  { %v8710_v3 = vpop.permute.xlu1 %8709  ;;  %8332 = vmatprep.subr.msk.bf16.mxu1 %vm10122_vm11, %v8330_v2 }
 0x368   :  { %v8712_v28 = vunpack.i.h.bf16 %v8710_v3  ;;  %v8711_v30 = vunpack.i.l.bf16 %v8710_v3  ;;  %8335 = vmatpush3.bf16.msk.msra.mxu1 %vm10122_vm11, %v8330_v2 }
 0x36a   :  { %v8336_v31 = vpack.c.bf16 %v8712_v28, %v8711_v30 }
 0x36b   :  { %v8715_v32 = vpop.permute.xlu0 %8714 }
 0x36c   :  { %v8717_v33 = vunpack.i.h.bf16 %v8715_v32  ;;  %v8716_v42 = vunpack.i.l.bf16 %v8715_v32  ;;  %8338 = vmatprep.subr.msk.bf16.mxu1 %vm10122_vm11, %v8336_v31 }
 0x36d   :  { %8341 = vmatpush3.bf16.msk.msra.mxu1 %vm10122_vm11, %v8336_v31  ;;  %v8720_v44 = vpop.permute.xlu1 %8719 }
 0x36e   :  { %v8342_v50 = vpack.c.bf16 %v8717_v33, %v8716_v42  ;;  %v8722_v59 = vunpack.i.h.bf16 %v8720_v44 }
 0x370   :  { %8344 = vmatprep.subr.msk.bf16.mxu1 %vm10122_vm11, %v8342_v50 }
 0x371   :  { %8347 = vmatpush3.bf16.msk.msra.mxu1 %vm10122_vm11, %v8342_v50  ;;  %v8725_v5 = vpop.permute.xlu0 %8724 }
 0x372   :  { %8361 = vmatprep.subr.bf16.mxu1 %v10310_v52  ;;  %v8726_v4 = vunpack.i.l.bf16 %v8725_v5 }
 0x374   :  { %8039 = vmatmul.mubr.msk.f32.vlgmr.msra.gmra.mrb[20].mxu1 %vm528_vm5, %v10146_v45 }
 0x375   :  { %8363 = vmatpush3.bf16.msra.mxu1 %v10310_v52  ;;  %8041 = vmatprep.mubr.msk.f32.mxu1 %vm528_vm5, %v10152_v46  ;;  %v8721_v52 = vunpack.i.l.bf16 %v8720_v44 }
 0x376   :  { %8365 = vmatprep.subr.bf16.mxu1 %v10320_v18  ;;  %v8730_v12 = vpop.permute.xlu1 %8729 }
 0x377   :  { %v8380_v6 = vpack.c.bf16 %v8722_v59, %v8721_v52  ;;  %v8732_v15 = vunpack.i.h.bf16 %v8730_v12  ;;  %v8731_v48 = vunpack.i.l.bf16 %v8730_v12 }
 0x378   :  { %8042 = vmatmul.mubr.msk.f32.gmra.mrb[22].mxu1 %vm528_vm5, %v10164_v58 }
 0x379   :  { %8367 = vmatpush3.bf16.msra.mxu1 %v10320_v18  ;;  %8092 = vmatprep.mubr.msk.f32.mxu1 %vm528_vm5, %v10007_v7  ;;  %v8727_v18 = vunpack.i.h.bf16 %v8725_v5 }
 0x37a   :  { %8370 = vmatprep.subr.msk.bf16.mxu1 %vm10041_vm8, %v10333_v55 }
 0x37b   :  { %v8386_v13 = vpack.c.bf16 %v8727_v18, %v8726_v4 }
 0x37d   :  { %8373 = vmatpush3.bf16.msk.msra.mxu1 %vm10041_vm8, %v10333_v55  ;;  %v8735_v55 = vpop.permute.xlu0 %8734 }
 0x37e   :  { %8376 = vmatprep.subr.msk.bf16.mxu1 %vm10041_vm8, %v10343_v40  ;;  %v8737_v11 = vunpack.i.h.bf16 %v8735_v55  ;;  %v8736_v17 = vunpack.i.l.bf16 %v8735_v55 }
 0x380   :  { %v8398_v49 = vpack.c.bf16 %v8737_v11, %v8736_v17  ;;  %v8761_v11 = vld [vmem:[%s12276_s8 + $0x700] ss:$8 sps:$4 sm:$0xff]   ;;  %v8763_v17 = vld [vmem:[%s12276_s8 + $0x704] ss:$8 sps:$4 sm:$0xff]  }
 0x381   :  { %8379 = vmatpush3.bf16.msk.msra.mxu1 %vm10041_vm8, %v10343_v40  ;;  %v8392_v40 = vpack.c.bf16 %v8732_v15, %v8731_v48  ;;  %6110 = vmatprep.subr.bf16.mxu0 %v8763_v17  ;;  %v8850_v17 = vld [vmem:[%s12276_s8 + $0xf4] ss:$8 sps:$4 sm:$0xff]  }
 0x382   :  { %8382 = vmatprep.subr.msk.bf16.mxu1 %vm10122_vm11, %v8380_v6  ;;  %6111 = vmatpush1.bf16.msra.mxu0 %v8761_v11  ;;  %v8848_v11 = vld [vmem:[%s12276_s8 + $0xf0] ss:$8 sps:$4 sm:$0xff]  }
 0x384   :  { %8093 = vmatmul.mubr.msk.f32.vlgmr.msra.gmra.mrb[24].mxu1 %vm528_vm5, %v10078_v34 }
 0x385   :  { %8385 = vmatpush3.bf16.msk.msra.mxu1 %vm10122_vm11, %v8380_v6  ;;  %8095 = vmatprep.mubr.msk.f32.mxu1 %vm528_vm5, %v10088_v43 }
 0x386   :  { %8388 = vmatprep.subr.msk.bf16.mxu1 %vm10122_vm11, %v8386_v13 }
 0x388   :  { %8096 = vmatmul.mubr.msk.f32.gmra.mrb[26].mxu1 %vm528_vm5, %v10102_v54 }
 0x389   :  { %8391 = vmatpush3.bf16.msk.msra.mxu1 %vm10122_vm11, %v8386_v13  ;;  %8114 = vmatprep.mubr.msk.f32.mxu1 %vm528_vm5, %v10112_v53 }
 0x38a   :  { %8394 = vmatprep.subr.msk.bf16.mxu1 %vm10122_vm11, %v8392_v40 }
 0x38d   :  { %8397 = vmatpush3.bf16.msk.msra.mxu1 %vm10122_vm11, %v8392_v40  ;;  %v8740_v24 = vpop.permute.xlu1 %8739  ;;  %v8760_v40 = vld [vmem:[%s12276_s8 + $0x4] ss:$8 sps:$4 sm:$0xff]  }
 0x38e   :  { %8400 = vmatprep.subr.msk.bf16.mxu1 %vm10122_vm11, %v8398_v49  ;;  %v8742_v21 = vunpack.i.h.bf16 %v8740_v24 }
 0x391   :  { %8403 = vmatpush3.bf16.msk.msra.mxu1 %vm10122_vm11, %v8398_v49  ;;  %v8745_v22 = vpop.permute.xlu0 %8744  ;;  %v8769_v49 = vld [vmem:[%s12276_s8 + $0x714] ss:$8 sps:$4 sm:$0xff]  }
 0x392   :  { %8417 = vmatprep.subr.bf16.mxu1 %v10349_v51  ;;  %v8746_v23 = vunpack.i.l.bf16 %v8745_v22  ;;  %6112 = vmatprep.subr.bf16.mxu0 %v8769_v49  ;;  %v8853_v49 = vld [vmem:[%s12276_s8 + $0x7f4] ss:$8 sps:$4 sm:$0xff]  }
 0x394   :  { %8115 = vmatmul.mubr.msk.f32.vlgmr.msra.gmra.mrb[24].mxu1 %vm528_vm5, %v10146_v45 }
 0x395   :  { %8419 = vmatpush3.bf16.msra.mxu1 %v10349_v51  ;;  %8117 = vmatprep.mubr.msk.f32.mxu1 %vm528_vm5, %v10152_v46  ;;  %v8741_v51 = vunpack.i.l.bf16 %v8740_v24  ;;  %v8764_v24 = vld [vmem:[%s12276_s8 + $0x10] ss:$8 sps:$4 sm:$0xff]  }
 0x396   :  { %8421 = vmatprep.subr.bf16.mxu1 %v10354_v8  ;;  %v8750_v25 = vpop.permute.xlu1 %8749 }
 0x397   :  { %v8436_v29 = vpack.c.bf16 %v8742_v21, %v8741_v51  ;;  %v8752_v26 = vunpack.i.h.bf16 %v8750_v25  ;;  %v8751_v27 = vunpack.i.l.bf16 %v8750_v25  ;;  %v8767_v21 = vld [vmem:[%s12276_s8 + $0x710] ss:$8 sps:$4 sm:$0xff]   ;;  %v8772_v51 = vld [vmem:[%s12276_s8 + $0x24] ss:$8 sps:$4 sm:$0xff]  }
 0x398   :  { %8118 = vmatmul.mubr.msk.f32.gmra.mrb[26].mxu1 %vm528_vm5, %v10164_v58  ;;  %6113 = vmatpush1.bf16.msra.mxu0 %v8767_v21  ;;  %v8776_v25 = vld [vmem:[%s12276_s8 + $0x30] ss:$8 sps:$4 sm:$0xff]   ;;  %v8861_v21 = vld [vmem:[%s12276_s8 + $0x804] ss:$8 sps:$4 sm:$0xff]  }
 0x399   :  { %8423 = vmatpush3.bf16.msra.mxu1 %v10354_v8  ;;  %8168 = vmatprep.mubr.msk.f32.mxu1 %vm528_vm5, %v10007_v7  ;;  %v8747_v8 = vunpack.i.h.bf16 %v8745_v22  ;;  %v8448_v14 = vpack.c.bf16 %v8752_v26, %v8751_v27  ;;  %v8775_v22 = vld [vmem:[%s12276_s8 + $0x724] ss:$8 sps:$4 sm:$0xff]   ;;  %v8779_v26 = vld [vmem:[%s12276_s8 + $0x730] ss:$8 sps:$4 sm:$0xff]  }
 0x39a   :  { %8426 = vmatprep.subr.msk.bf16.mxu1 %vm10041_vm8, %v10363_v19  ;;  %v8755_v0 = vpop.permute.xlu0 %8754  ;;  %6114 = vmatprep.subr.bf16.mxu0 %v8775_v22  ;;  %v8784_v27 = vld [vmem:[%s12276_s8 + $0x44] ss:$8 sps:$4 sm:$0xff]  }
 0x39b   :  { %v8442_v7 = vpack.c.bf16 %v8747_v8, %v8746_v23  ;;  %v8757_v16 = vunpack.i.h.bf16 %v8755_v0  ;;  %v8773_v8 = vld [vmem:[%s12276_s8 + $0x720] ss:$8 sps:$4 sm:$0xff]   ;;  %v8778_v23 = vld [vmem:[%s12276_s8 + $0x34] ss:$8 sps:$4 sm:$0xff]  }
 0x39c   :  { %6115 = vmatpush1.bf16.msra.mxu0 %v8773_v8 }
 0x39d   :  { %8429 = vmatpush3.bf16.msk.msra.mxu1 %vm10041_vm8, %v10363_v19  ;;  %v8756_v19 = vunpack.i.l.bf16 %v8755_v0  ;;  %v8782_v0 = vld [vmem:[%s12276_s8 + $0x40] ss:$8 sps:$4 sm:$0xff]  }
 0x39e   :  { %8432 = vmatprep.subr.msk.bf16.mxu1 %vm10041_vm8, %v10371_v47 }
 0x3a1   :  { %8435 = vmatpush3.bf16.msk.msra.mxu1 %vm10041_vm8, %v10371_v47 }
 0x3a2   :  { %8438 = vmatprep.subr.msk.bf16.mxu1 %vm10122_vm11, %v8436_v29 }
 0x3a4   :  { %8169 = vmatmul.mubr.msk.f32.vlgmr.msra.gmra.mrb[28].mxu1 %vm528_vm5, %v10078_v34 }
 0x3a5   :  { %8441 = vmatpush3.bf16.msk.msra.mxu1 %vm10122_vm11, %v8436_v29  ;;  %8171 = vmatprep.mubr.msk.f32.mxu1 %vm528_vm5, %v10088_v43  ;;  %v8454_v43 = vpack.c.bf16 %v8757_v16, %v8756_v19  ;;  %v8770_v29 = vld [vmem:[%s12276_s8 + $0x20] ss:$8 sps:$4 sm:$0xff]   ;;  %v8787_v16 = vld [vmem:[%s12276_s8 + $0x744] ss:$8 sps:$4 sm:$0xff]  }
 0x3a6   :  { %8444 = vmatprep.subr.msk.bf16.mxu1 %vm10122_vm11, %v8442_v7  ;;  %v8785_v19 = vld [vmem:[%s12276_s8 + $0x740] ss:$8 sps:$4 sm:$0xff]  }
 0x3a7   :  { %v10484_v47 = vpop.permute.xlu1 %730 }
 0x3a8   :  { %v744_v35 = vadd.f32 %v10274_v56, %v10484_v47  ;;  %8172 = vmatmul.mubr.msk.f32.gmra.mrb[30].mxu1 %vm528_vm5, %v10102_v54 }
 0x3a9   :  { %8447 = vmatpush3.bf16.msk.msra.mxu1 %vm10122_vm11, %v8442_v7  ;;  %8190 = vmatprep.mubr.msk.f32.mxu1 %vm528_vm5, %v10112_v53  ;;  %v8781_v7 = vld [vmem:[%s12276_s8 + $0x734] ss:$8 sps:$4 sm:$0xff]  }
 0x3aa   :  { %v748_v34 = vmax.f32 %v744_v35, 0.0  ;;  %8450 = vmatprep.subr.msk.bf16.mxu1 %vm10122_vm11, %v8448_v14  ;;  %6116 = vmatprep.subr.bf16.mxu0 %v8781_v7  ;;  %v8788_v35 = vld [vmem:[%s12276_s8 + $0x50] ss:$8 sps:$4 sm:$0xff]  }
 0x3ab   :  { %v10496_v36 = vpop.permute.xlu1 %725  ;;  %v10498_v37 = vpop.permute.xlu0 %735  ;;  %6117 = vmatpush1.bf16.msra.mxu0 %v8779_v26 }
 0x3ac   :  { %780 = vst [vmem:[#allocation2 + $0x20] sm:$0x1] %v748_v34  ;;  %v6892_v56 = vrot.slane %v748_v34, 9  ;;  %v6893_v38 = vrot.slane %v748_v34, 10  ;;  %v6894_v39 = vrot.slane %v748_v34, 11  ;;  %v794_v54 = vcombine.high %v748_v34, %v748_v34  ;;  %6118 = vmatprep.subr.bf16.mxu0 %v8787_v16 }
 0x3ad   :  { %v743_v62 = vadd.f32 %v10496_v36, %v10276_v57  ;;  %v745_v53 = vadd.f32 %v10498_v37, %v10280_v61  ;;  %8453 = vmatpush3.bf16.msk.msra.mxu1 %vm10122_vm11, %v8448_v14  ;;  %v8790_v14 = vld [vmem:[%s12276_s8 + $0x54] ss:$8 sps:$4 sm:$0xff]  }
 0x3ae   :  { %785 = vst [vmem:[#allocation2 + $0x24] sm:$0x1] %v6892_v56  ;;  %789 = vst [vmem:[#allocation2 + $0x28] sm:$0x1] %v6893_v38  ;;  %v6895_v63 = vrot.slane %v794_v54, 9  ;;  %v6896_v41 = vrot.slane %v794_v54, 10  ;;  %8456 = vmatprep.subr.msk.bf16.mxu1 %vm10122_vm11, %v8454_v43 }
 0x3af   :  { %793 = vst [vmem:[#allocation2 + $0x2c] sm:$0x1] %v6894_v39  ;;  %796 = vst [vmem:[#allocation2 + $0x30] sm:$0x1] %v794_v54  ;;  %v6897_v1 = vrot.slane %v794_v54, 11  ;;  %v747_v2 = vmax.f32 %v743_v62, 0.0  ;;  %v10508_v28 = vpop.permute.xlu0 %740  ;;  %6119 = vmatpush1.bf16.msra.mxu0 %v8785_v19 }
 0x3b0   :  { %v749_v3 = vmax.f32 %v745_v53, 0.0  ;;  %800 = vst [vmem:[#allocation2 + $0x34] sm:$0x1] %v6895_v63  ;;  %804 = vst [vmem:[#allocation2 + $0x38] sm:$0x1] %v6896_v41  ;;  %v746_v57 = vadd.f32 %v10278_v60, %v10508_v28 }
 0x3b1   :  { %808 = vst [vmem:[#allocation2 + $0x3c] sm:$0x1] %v6897_v1  ;;  %751 = vst [vmem:[#allocation2] sm:$0x1] %v747_v2  ;;  %v6886_v61 = vrot.slane %v747_v2, 9  ;;  %v6887_v30 = vrot.slane %v747_v2, 10  ;;  %v765_v32 = vcombine.high %v747_v2, %v747_v2  ;;  %8459 = vmatpush3.bf16.msk.msra.mxu1 %vm10122_vm11, %v8454_v43 }
 0x3b2   :  { %v6888_v31 = vrot.slane %v747_v2, 11  ;;  %809 = vst [vmem:[#allocation2 + $0x40] sm:$0x1] %v749_v3  ;;  %v6898_v33 = vrot.slane %v749_v3, 9  ;;  %v6899_v42 = vrot.slane %v749_v3, 10  ;;  %v6900_v50 = vrot.slane %v749_v3, 11  ;;  %5823 = vmatprep.subr.bf16.mxu1 %v8760_v40 }
 0x3b3   :  { %v823_v44 = vcombine.high %v749_v3, %v749_v3  ;;  %756 = vst [vmem:[#allocation2 + $0x4] sm:$0x1] %v6886_v61  ;;  %760 = vst [vmem:[#allocation2 + $0x8] sm:$0x1] %v6887_v30  ;;  %v6889_v59 = vrot.slane %v765_v32, 9  ;;  %v6890_v52 = vrot.slane %v765_v32, 10 }
 0x3b4   :  { %764 = vst [vmem:[#allocation2 + $0xc] sm:$0x1] %v6888_v31  ;;  %767 = vst [vmem:[#allocation2 + $0x10] sm:$0x1] %v765_v32  ;;  %v6891_v60 = vrot.slane %v765_v32, 11  ;;  %v750_v5 = vmax.f32 %v746_v57, 0.0  ;;  %8191 = vmatmul.mubr.msk.f32.vlgmr.msra.gmra.mrb[28].mxu1 %vm528_vm5, %v10146_v45 }
 0x3b5   :  { %814 = vst [vmem:[#allocation2 + $0x44] sm:$0x1] %v6898_v33  ;;  %818 = vst [vmem:[#allocation2 + $0x48] sm:$0x1] %v6899_v42  ;;  %v6901_v6 = vrot.slane %v823_v44, 9  ;;  %v6902_v18 = vrot.slane %v823_v44, 10  ;;  %8193 = vmatprep.mubr.msk.f32.mxu1 %vm528_vm5, %v10152_v46 }
 0x3b6   :  { %822 = vst [vmem:[#allocation2 + $0x4c] sm:$0x1] %v6900_v50  ;;  %825 = vst [vmem:[#allocation2 + $0x50] sm:$0x1] %v823_v44  ;;  %v6903_v9 = vrot.slane %v823_v44, 11  ;;  %v6904_v4 = vrot.slane %v750_v5, 9  ;;  %v852_v15 = vcombine.high %v750_v5, %v750_v5 }
 0x3b7   :  { %771 = vst [vmem:[#allocation2 + $0x14] sm:$0x1] %v6889_v59  ;;  %775 = vst [vmem:[#allocation2 + $0x18] sm:$0x1] %v6890_v52  ;;  %v6905_v12 = vrot.slane %v750_v5, 10  ;;  %v6906_v13 = vrot.slane %v750_v5, 11 }
 0x3b8   :  { %779 = vst [vmem:[#allocation2 + $0x1c] sm:$0x1] %v6891_v60  ;;  %838 = vst [vmem:[#allocation2 + $0x60] sm:$0x1] %v750_v5  ;;  %v6907_v48 = vrot.slane %v852_v15, 9  ;;  %v6908_v45 = vrot.slane %v852_v15, 10  ;;  %8194 = vmatmul.mubr.msk.f32.gmra.mrb[30].mxu1 %vm528_vm5, %v10164_v58 }
 0x3b9   :  { %829 = vst [vmem:[#allocation2 + $0x54] sm:$0x1] %v6901_v6  ;;  %833 = vst [vmem:[#allocation2 + $0x58] sm:$0x1] %v6902_v18  ;;  %v6909_v55 = vrot.slane %v852_v15, 11 }
 0x3ba   :  { %837 = vst [vmem:[#allocation2 + $0x5c] sm:$0x1] %v6903_v9  ;;  %843 = vst [vmem:[#allocation2 + $0x64] sm:$0x1] %v6904_v4  ;;  %v8758_v46 = vld [vmem:[%s12276_s8] ss:$8 sps:$4 sm:$0xff]  }
 0x3bb   :  { %847 = vst [vmem:[#allocation2 + $0x68] sm:$0x1] %v6905_v12  ;;  %851 = vst [vmem:[#allocation2 + $0x6c] sm:$0x1] %v6906_v13  ;;  %v8766_v58 = vld [vmem:[%s12276_s8 + $0x14] ss:$8 sps:$4 sm:$0xff]   ;;  %5824 = vmatpush1.bf16.msra.mxu1 %v8758_v46 }
 0x3bc   :  { %854 = vst [vmem:[#allocation2 + $0x70] sm:$0x1] %v852_v15  ;;  %858 = vst [vmem:[#allocation2 + $0x74] sm:$0x1] %v6907_v48  ;;  %5825 = vmatprep.subr.bf16.mxu1 %v8766_v58  ;;  %v8793_v34 = vld [vmem:[%s12276_s8 + $0x754] ss:$8 sps:$4 sm:$0xff]  }
 0x3bd   :  { %862 = vst [vmem:[#allocation2 + $0x78] sm:$0x1] %v6908_v45  ;;  %866 = vst [vmem:[#allocation2 + $0x7c] sm:$0x1] %v6909_v55  ;;  %v8791_v43 = vld [vmem:[%s12276_s8 + $0x750] ss:$8 sps:$4 sm:$0xff]   ;;  %6120 = vmatprep.subr.bf16.mxu0 %v8793_v34 }
 0x3be   :  { %6121 = vmatpush1.bf16.msra.mxu0 %v8791_v43  ;;  %v8796_v56 = vld [vmem:[%s12276_s8 + $0x64] ss:$8 sps:$4 sm:$0xff]   ;;  %v8794_v38 = vld [vmem:[%s12276_s8 + $0x60] ss:$8 sps:$4 sm:$0xff]   ;;  %v8800_v62 = vld [vmem:[%s12276_s8 + $0x70] ss:$8 sps:$4 sm:$0xff]  }
 0x3bf   :  { %5826 = vmatpush1.bf16.msra.mxu1 %v8764_v24  ;;  %v8799_v39 = vld [vmem:[%s12276_s8 + $0x764] ss:$8 sps:$4 sm:$0xff]   ;;  %v8797_v54 = vld [vmem:[%s12276_s8 + $0x760] ss:$8 sps:$4 sm:$0xff]   ;;  %v8802_v53 = vld [vmem:[%s12276_s8 + $0x74] ss:$8 sps:$4 sm:$0xff]  }
 0x3c0   :  { %5827 = vmatprep.subr.bf16.mxu1 %v8772_v51  ;;  %6122 = vmatprep.subr.bf16.mxu0 %v8799_v39  ;;  %v8803_v63 = vld [vmem:[%s12276_s8 + $0x770] ss:$8 sps:$4 sm:$0xff]   ;;  %v8805_v41 = vld [vmem:[%s12276_s8 + $0x774] ss:$8 sps:$4 sm:$0xff]   ;;  %v8808_v1 = vld [vmem:[%s12276_s8 + $0x84] ss:$8 sps:$4 sm:$0xff]  }
 0x3c1   :  { %v8811_v2 = vld [vmem:[%s12276_s8 + $0x784] ss:$8 sps:$4 sm:$0xff]   ;;  %v8806_v3 = vld [vmem:[%s12276_s8 + $0x80] ss:$8 sps:$4 sm:$0xff]   ;;  %v8814_v61 = vld [vmem:[%s12276_s8 + $0x94] ss:$8 sps:$4 sm:$0xff]  }
 0x3c2   :  { %6123 = vmatpush1.bf16.msra.mxu0 %v8797_v54  ;;  %v8809_v57 = vld [vmem:[%s12276_s8 + $0x780] ss:$8 sps:$4 sm:$0xff]   ;;  %v8817_v30 = vld [vmem:[%s12276_s8 + $0x794] ss:$8 sps:$4 sm:$0xff]   ;;  %v8812_v31 = vld [vmem:[%s12276_s8 + $0x90] ss:$8 sps:$4 sm:$0xff]  }
 0x3c3   :  { %5828 = vmatpush1.bf16.msra.mxu1 %v8770_v29  ;;  %6124 = vmatprep.subr.bf16.mxu0 %v8805_v41  ;;  %v8815_v32 = vld [vmem:[%s12276_s8 + $0x790] ss:$8 sps:$4 sm:$0xff]   ;;  %v8820_v33 = vld [vmem:[%s12276_s8 + $0xa4] ss:$8 sps:$4 sm:$0xff]   ;;  %v8818_v50 = vld [vmem:[%s12276_s8 + $0xa0] ss:$8 sps:$4 sm:$0xff]  }
 0x3c4   :  { %5829 = vmatprep.subr.bf16.mxu1 %v8778_v23  ;;  %v8823_v42 = vld [vmem:[%s12276_s8 + $0x7a4] ss:$8 sps:$4 sm:$0xff]   ;;  %v8821_v44 = vld [vmem:[%s12276_s8 + $0x7a0] ss:$8 sps:$4 sm:$0xff]   ;;  %v8826_v59 = vld [vmem:[%s12276_s8 + $0xb4] ss:$8 sps:$4 sm:$0xff]  }
 0x3c5   :  { %v8824_v52 = vld [vmem:[%s12276_s8 + $0xb0] ss:$8 sps:$4 sm:$0xff]   ;;  %v8829_v60 = vld [vmem:[%s12276_s8 + $0x7b4] ss:$8 sps:$4 sm:$0xff]   ;;  %v8832_v6 = vld [vmem:[%s12276_s8 + $0xc4] ss:$8 sps:$4 sm:$0xff]  }
 0x3c6   :  { %6125 = vmatpush1.bf16.msra.mxu0 %v8803_v63  ;;  %v8827_v5 = vld [vmem:[%s12276_s8 + $0x7b0] ss:$8 sps:$4 sm:$0xff]   ;;  %v8830_v18 = vld [vmem:[%s12276_s8 + $0xc0] ss:$8 sps:$4 sm:$0xff]   ;;  %v8835_v9 = vld [vmem:[%s12276_s8 + $0x7c4] ss:$8 sps:$4 sm:$0xff]  }
 0x3c7   :  { %5830 = vmatpush1.bf16.msra.mxu1 %v8776_v25  ;;  %6126 = vmatprep.subr.bf16.mxu0 %v8811_v2  ;;  %v8833_v4 = vld [vmem:[%s12276_s8 + $0x7c0] ss:$8 sps:$4 sm:$0xff]   ;;  %v8838_v12 = vld [vmem:[%s12276_s8 + $0xd4] ss:$8 sps:$4 sm:$0xff]   ;;  %v8836_v13 = vld [vmem:[%s12276_s8 + $0xd0] ss:$8 sps:$4 sm:$0xff]  }
 0x3c8   :  { %5831 = vmatprep.subr.bf16.mxu1 %v8784_v27  ;;  %v8841_v15 = vld [vmem:[%s12276_s8 + $0x7d4] ss:$8 sps:$4 sm:$0xff]   ;;  %v8839_v48 = vld [vmem:[%s12276_s8 + $0x7d0] ss:$8 sps:$4 sm:$0xff]   ;;  %v8844_v45 = vld [vmem:[%s12276_s8 + $0xe4] ss:$8 sps:$4 sm:$0xff]  }
 0x3c9   :  { %v8842_v55 = vld [vmem:[%s12276_s8 + $0xe0] ss:$8 sps:$4 sm:$0xff]   ;;  %v8847_v46 = vld [vmem:[%s12276_s8 + $0x7e4] ss:$8 sps:$4 sm:$0xff]   ;;  %v8851_v58 = vld [vmem:[%s12276_s8 + $0x7f0] ss:$8 sps:$4 sm:$0xff]  }
 0x3ca   :  { %6127 = vmatpush1.bf16.msra.mxu0 %v8809_v57  ;;  %v8845_v40 = vld [vmem:[%s12276_s8 + $0x7e0] ss:$8 sps:$4 sm:$0xff]   ;;  %v8857_v24 = vld [vmem:[%s12276_s8 + $0x104] ss:$8 sps:$4 sm:$0xff]  }
 0x3cb   :  { %5832 = vmatpush1.bf16.msra.mxu1 %v8782_v0  ;;  %6128 = vmatprep.subr.bf16.mxu0 %v8817_v30 }
 0x3cc   :  { %5833 = vmatprep.subr.bf16.mxu1 %v8790_v14 }
 0x3ce   :  { %6129 = vmatpush1.bf16.msra.mxu0 %v8815_v32 }
 0x3cf   :  { %5834 = vmatpush1.bf16.msra.mxu1 %v8788_v35  ;;  %6130 = vmatprep.subr.bf16.mxu0 %v8823_v42 }
 0x3d0   :  { %5835 = vmatprep.subr.bf16.mxu1 %v8796_v56 }
 0x3d2   :  { %6131 = vmatpush1.bf16.msra.mxu0 %v8821_v44 }
 0x3d3   :  { %5836 = vmatpush1.bf16.msra.mxu1 %v8794_v38  ;;  %6132 = vmatprep.subr.bf16.mxu0 %v8829_v60 }
 0x3d4   :  { %5837 = vmatprep.subr.bf16.mxu1 %v8802_v53 }
 0x3d6   :  { %6133 = vmatpush1.bf16.msra.mxu0 %v8827_v5 }
 0x3d7   :  { %5838 = vmatpush1.bf16.msra.mxu1 %v8800_v62  ;;  %6134 = vmatprep.subr.bf16.mxu0 %v8835_v9 }
 0x3d8   :  { %5839 = vmatprep.subr.bf16.mxu1 %v8808_v1 }
 0x3da   :  { %6135 = vmatpush1.bf16.msra.mxu0 %v8833_v4 }
 0x3db   :  { %5840 = vmatpush1.bf16.msra.mxu1 %v8806_v3  ;;  %6136 = vmatprep.subr.bf16.mxu0 %v8841_v15 }
 0x3dc   :  { %5841 = vmatprep.subr.bf16.mxu1 %v8814_v61 }
 0x3de   :  { %6137 = vmatpush1.bf16.msra.mxu0 %v8839_v48 }
 0x3df   :  { %5842 = vmatpush1.bf16.msra.mxu1 %v8812_v31  ;;  %6138 = vmatprep.subr.bf16.mxu0 %v8847_v46 }
 0x3e0   :  { %5843 = vmatprep.subr.bf16.mxu1 %v8820_v33 }
 0x3e2   :  { %6139 = vmatpush1.bf16.msra.mxu0 %v8845_v40 }
 0x3e3   :  { %5844 = vmatpush1.bf16.msra.mxu1 %v8818_v50  ;;  %6140 = vmatprep.subr.bf16.mxu0 %v8853_v49 }
 0x3e4   :  { %5845 = vmatprep.subr.bf16.mxu1 %v8826_v59 }
 0x3e6   :  { %6141 = vmatpush1.bf16.msra.mxu0 %v8851_v58 }
 0x3e7   :  { %5846 = vmatpush1.bf16.msra.mxu1 %v8824_v52  ;;  %6151 = vmatprep.subr.bf16.mxu0 %v8861_v21 }
 0x3e8   :  { %5847 = vmatprep.subr.bf16.mxu1 %v8832_v6 }
 0x3eb   :  { %5848 = vmatpush1.bf16.msra.mxu1 %v8830_v18 }
 0x3ec   :  { %5849 = vmatprep.subr.bf16.mxu1 %v8838_v12 }
 0x3ef   :  { %5850 = vmatpush1.bf16.msra.mxu1 %v8836_v13 }
 0x3f0   :  { %5851 = vmatprep.subr.bf16.mxu1 %v8844_v45 }
 0x3f3   :  { %5852 = vmatpush1.bf16.msra.mxu1 %v8842_v55 }
 0x3f4   :  { %5853 = vmatprep.subr.bf16.mxu1 %v8850_v17 }
 0x3f7   :  { %5854 = vmatpush1.bf16.msra.mxu1 %v8848_v11 }
 0x3f8   :  { %5864 = vmatprep.subr.bf16.mxu1 %v8857_v24 }
 0x447   :  { %v8040_v51 = vpop.f32.mrb[20].mxu1 }
 0x448   :  { %v1336_v22 = vadd.f32 %v8040_v51, %v10484_v47  ;;  %v1316_v29 = vpop.f32.mrb[21].mxu1 }
 0x449   :  { %v1335_v8 = vadd.f32 %v1316_v29, %v10496_v36 }
 0x44a   :  { %v1340_v23 = vmax.f32 %v1336_v22, 0.0 }
 0x44b   :  { %v1339_v25 = vmax.f32 %v1335_v8, 0.0  ;;  %v8043_v7 = vpop.f32.mrb[22].mxu1 }
 0x44c   :  { %1372 = vst [vmem:[#allocation2 + $0x21] sm:$0x1] %v1340_v23  ;;  %v6970_v26 = vrot.slane %v1340_v23, 9  ;;  %v6971_v27 = vrot.slane %v1340_v23, 10  ;;  %v6972_v0 = vrot.slane %v1340_v23, 11  ;;  %v1386_v16 = vcombine.high %v1340_v23, %v1340_v23  ;;  %v1326_v19 = vpop.f32.mrb[23].mxu1 }
 0x44d   :  { %1343 = vst [vmem:[#allocation2 + $0x1] sm:$0x1] %v1339_v25  ;;  %v6964_v14 = vrot.slane %v1339_v25, 9  ;;  %v6965_v35 = vrot.slane %v1339_v25, 10  ;;  %v6966_v34 = vrot.slane %v1339_v25, 11  ;;  %v1357_v43 = vcombine.high %v1339_v25, %v1339_v25 }
 0x44e   :  { %1377 = vst [vmem:[#allocation2 + $0x25] sm:$0x1] %v6970_v26  ;;  %1381 = vst [vmem:[#allocation2 + $0x29] sm:$0x1] %v6971_v27  ;;  %v6973_v56 = vrot.slane %v1386_v16, 9  ;;  %v6974_v38 = vrot.slane %v1386_v16, 10  ;;  %v1338_v54 = vadd.f32 %v8043_v7, %v10508_v28  ;;  %v1337_v41 = vadd.f32 %v1326_v19, %v10498_v37 }
 0x44f   :  { %1385 = vst [vmem:[#allocation2 + $0x2d] sm:$0x1] %v6972_v0  ;;  %1388 = vst [vmem:[#allocation2 + $0x31] sm:$0x1] %v1386_v16  ;;  %v6975_v39 = vrot.slane %v1386_v16, 11  ;;  %v6967_v62 = vrot.slane %v1357_v43, 9 }
 0x450   :  { %1348 = vst [vmem:[#allocation2 + $0x5] sm:$0x1] %v6964_v14  ;;  %1352 = vst [vmem:[#allocation2 + $0x9] sm:$0x1] %v6965_v35  ;;  %v6968_v53 = vrot.slane %v1357_v43, 10  ;;  %v6969_v63 = vrot.slane %v1357_v43, 11 }
 0x451   :  { %1356 = vst [vmem:[#allocation2 + $0xd] sm:$0x1] %v6966_v34  ;;  %1359 = vst [vmem:[#allocation2 + $0x11] sm:$0x1] %v1357_v43  ;;  %v1342_v1 = vmax.f32 %v1338_v54, 0.0  ;;  %v1341_v2 = vmax.f32 %v1337_v41, 0.0 }
 0x452   :  { %1392 = vst [vmem:[#allocation2 + $0x35] sm:$0x1] %v6973_v56  ;;  %1396 = vst [vmem:[#allocation2 + $0x39] sm:$0x1] %v6974_v38 }
 0x453   :  { %1400 = vst [vmem:[#allocation2 + $0x3d] sm:$0x1] %v6975_v39  ;;  %1363 = vst [vmem:[#allocation2 + $0x15] sm:$0x1] %v6967_v62  ;;  %v6982_v3 = vrot.slane %v1342_v1, 9  ;;  %v6983_v57 = vrot.slane %v1342_v1, 10  ;;  %v1444_v30 = vcombine.high %v1342_v1, %v1342_v1  ;;  %v1415_v42 = vcombine.high %v1341_v2, %v1341_v2 }
 0x454   :  { %1367 = vst [vmem:[#allocation2 + $0x19] sm:$0x1] %v6968_v53  ;;  %1371 = vst [vmem:[#allocation2 + $0x1d] sm:$0x1] %v6969_v63  ;;  %v6984_v61 = vrot.slane %v1342_v1, 11  ;;  %v6976_v31 = vrot.slane %v1341_v2, 9 }
 0x455   :  { %1430 = vst [vmem:[#allocation2 + $0x61] sm:$0x1] %v1342_v1  ;;  %1401 = vst [vmem:[#allocation2 + $0x41] sm:$0x1] %v1341_v2  ;;  %v6977_v32 = vrot.slane %v1341_v2, 10  ;;  %v6978_v33 = vrot.slane %v1341_v2, 11 }
 0x456   :  { %1435 = vst [vmem:[#allocation2 + $0x65] sm:$0x1] %v6982_v3  ;;  %1439 = vst [vmem:[#allocation2 + $0x69] sm:$0x1] %v6983_v57  ;;  %v6985_v50 = vrot.slane %v1444_v30, 9  ;;  %v6986_v44 = vrot.slane %v1444_v30, 10 }
 0x457   :  { %1443 = vst [vmem:[#allocation2 + $0x6d] sm:$0x1] %v6984_v61  ;;  %1446 = vst [vmem:[#allocation2 + $0x71] sm:$0x1] %v1444_v30  ;;  %v6987_v59 = vrot.slane %v1444_v30, 11  ;;  %v6979_v52 = vrot.slane %v1415_v42, 9 }
 0x458   :  { %1406 = vst [vmem:[#allocation2 + $0x45] sm:$0x1] %v6976_v31  ;;  %1410 = vst [vmem:[#allocation2 + $0x49] sm:$0x1] %v6977_v32  ;;  %v6980_v60 = vrot.slane %v1415_v42, 10  ;;  %v6981_v5 = vrot.slane %v1415_v42, 11 }
 0x459   :  { %1414 = vst [vmem:[#allocation2 + $0x4d] sm:$0x1] %v6978_v33  ;;  %1417 = vst [vmem:[#allocation2 + $0x51] sm:$0x1] %v1415_v42 }
 0x45a   :  { %1450 = vst [vmem:[#allocation2 + $0x75] sm:$0x1] %v6985_v50  ;;  %1454 = vst [vmem:[#allocation2 + $0x79] sm:$0x1] %v6986_v44 }
 0x45b   :  { %1458 = vst [vmem:[#allocation2 + $0x7d] sm:$0x1] %v6987_v59  ;;  %1421 = vst [vmem:[#allocation2 + $0x55] sm:$0x1] %v6979_v52 }
 0x45c   :  { %1425 = vst [vmem:[#allocation2 + $0x59] sm:$0x1] %v6980_v60  ;;  %1429 = vst [vmem:[#allocation2 + $0x5d] sm:$0x1] %v6981_v5 }
 0x467   :  { %v8116_v6 = vpop.f32.mrb[24].mxu1 }
 0x468   :  { %v1928_v18 = vadd.f32 %v8116_v6, %v10484_v47  ;;  %v1908_v9 = vpop.f32.mrb[25].mxu1 }
 0x469   :  { %v1927_v4 = vadd.f32 %v1908_v9, %v10496_v36 }
 0x46a   :  { %v1932_v12 = vmax.f32 %v1928_v18, 0.0 }
 0x46b   :  { %v1931_v13 = vmax.f32 %v1927_v4, 0.0  ;;  %v8119_v15 = vpop.f32.mrb[26].mxu1 }
 0x46c   :  { %1964 = vst [vmem:[#allocation2 + $0x22] sm:$0x1] %v1932_v12  ;;  %v7048_v48 = vrot.slane %v1932_v12, 9  ;;  %v7049_v45 = vrot.slane %v1932_v12, 10  ;;  %v7050_v55 = vrot.slane %v1932_v12, 11  ;;  %v1978_v46 = vcombine.high %v1932_v12, %v1932_v12  ;;  %v1918_v40 = vpop.f32.mrb[27].mxu1 }
 0x46d   :  { %1935 = vst [vmem:[#allocation2 + $0x2] sm:$0x1] %v1931_v13  ;;  %v7042_v11 = vrot.slane %v1931_v13, 9  ;;  %v7043_v17 = vrot.slane %v1931_v13, 10  ;;  %v7044_v58 = vrot.slane %v1931_v13, 11  ;;  %v1949_v49 = vcombine.high %v1931_v13, %v1931_v13 }
 0x46e   :  { %1969 = vst [vmem:[#allocation2 + $0x26] sm:$0x1] %v7048_v48  ;;  %1973 = vst [vmem:[#allocation2 + $0x2a] sm:$0x1] %v7049_v45  ;;  %v7051_v24 = vrot.slane %v1978_v46, 9  ;;  %v7052_v21 = vrot.slane %v1978_v46, 10  ;;  %v1930_v22 = vadd.f32 %v8119_v15, %v10508_v28  ;;  %v1929_v25 = vadd.f32 %v1918_v40, %v10498_v37 }
 0x46f   :  { %1977 = vst [vmem:[#allocation2 + $0x2e] sm:$0x1] %v7050_v55  ;;  %1980 = vst [vmem:[#allocation2 + $0x32] sm:$0x1] %v1978_v46  ;;  %v7053_v51 = vrot.slane %v1978_v46, 11  ;;  %v7045_v29 = vrot.slane %v1949_v49, 9 }
 0x470   :  { %1940 = vst [vmem:[#allocation2 + $0x6] sm:$0x1] %v7042_v11  ;;  %1944 = vst [vmem:[#allocation2 + $0xa] sm:$0x1] %v7043_v17  ;;  %v7046_v8 = vrot.slane %v1949_v49, 10  ;;  %v7047_v23 = vrot.slane %v1949_v49, 11 }
 0x471   :  { %1948 = vst [vmem:[#allocation2 + $0xe] sm:$0x1] %v7044_v58  ;;  %1951 = vst [vmem:[#allocation2 + $0x12] sm:$0x1] %v1949_v49  ;;  %v1934_v7 = vmax.f32 %v1930_v22, 0.0  ;;  %v1933_v26 = vmax.f32 %v1929_v25, 0.0 }
 0x472   :  { %1984 = vst [vmem:[#allocation2 + $0x36] sm:$0x1] %v7051_v24  ;;  %1988 = vst [vmem:[#allocation2 + $0x3a] sm:$0x1] %v7052_v21 }
 0x473   :  { %1992 = vst [vmem:[#allocation2 + $0x3e] sm:$0x1] %v7053_v51  ;;  %1955 = vst [vmem:[#allocation2 + $0x16] sm:$0x1] %v7045_v29  ;;  %v7060_v27 = vrot.slane %v1934_v7, 9  ;;  %v7061_v0 = vrot.slane %v1934_v7, 10  ;;  %v2036_v19 = vcombine.high %v1934_v7, %v1934_v7  ;;  %v2007_v43 = vcombine.high %v1933_v26, %v1933_v26 }
 0x474   :  { %1959 = vst [vmem:[#allocation2 + $0x1a] sm:$0x1] %v7046_v8  ;;  %1963 = vst [vmem:[#allocation2 + $0x1e] sm:$0x1] %v7047_v23  ;;  %v7062_v16 = vrot.slane %v1934_v7, 11  ;;  %v7054_v14 = vrot.slane %v1933_v26, 9 }
 0x475   :  { %2022 = vst [vmem:[#allocation2 + $0x62] sm:$0x1] %v1934_v7  ;;  %1993 = vst [vmem:[#allocation2 + $0x42] sm:$0x1] %v1933_v26  ;;  %v7055_v35 = vrot.slane %v1933_v26, 10  ;;  %v7056_v34 = vrot.slane %v1933_v26, 11 }
 0x476   :  { %2027 = vst [vmem:[#allocation2 + $0x66] sm:$0x1] %v7060_v27  ;;  %2031 = vst [vmem:[#allocation2 + $0x6a] sm:$0x1] %v7061_v0  ;;  %v7063_v56 = vrot.slane %v2036_v19, 9  ;;  %v7064_v38 = vrot.slane %v2036_v19, 10 }
 0x477   :  { %2035 = vst [vmem:[#allocation2 + $0x6e] sm:$0x1] %v7062_v16  ;;  %2038 = vst [vmem:[#allocation2 + $0x72] sm:$0x1] %v2036_v19  ;;  %v7065_v39 = vrot.slane %v2036_v19, 11  ;;  %v7057_v54 = vrot.slane %v2007_v43, 9 }
 0x478   :  { %1998 = vst [vmem:[#allocation2 + $0x46] sm:$0x1] %v7054_v14  ;;  %2002 = vst [vmem:[#allocation2 + $0x4a] sm:$0x1] %v7055_v35  ;;  %v7058_v62 = vrot.slane %v2007_v43, 10  ;;  %v7059_v53 = vrot.slane %v2007_v43, 11 }
 0x479   :  { %2006 = vst [vmem:[#allocation2 + $0x4e] sm:$0x1] %v7056_v34  ;;  %2009 = vst [vmem:[#allocation2 + $0x52] sm:$0x1] %v2007_v43  ;;  %v8855_v26 = vld [vmem:[%s12276_s8 + $0x100] ss:$8 sps:$4 sm:$0xff]  }
 0x47a   :  { %2042 = vst [vmem:[#allocation2 + $0x76] sm:$0x1] %v7063_v56  ;;  %2046 = vst [vmem:[#allocation2 + $0x7a] sm:$0x1] %v7064_v38  ;;  %v8865_v16 = vld [vmem:[%s12276_s8 + $0x114] ss:$8 sps:$4 sm:$0xff]  }
 0x47b   :  { %2050 = vst [vmem:[#allocation2 + $0x7e] sm:$0x1] %v7065_v39  ;;  %2013 = vst [vmem:[#allocation2 + $0x56] sm:$0x1] %v7057_v54  ;;  %v8859_v19 = vld [vmem:[%s12276_s8 + $0x800] ss:$8 sps:$4 sm:$0xff]  }
 0x47c   :  { %2017 = vst [vmem:[#allocation2 + $0x5a] sm:$0x1] %v7058_v62  ;;  %2021 = vst [vmem:[#allocation2 + $0x5e] sm:$0x1] %v7059_v53  ;;  %v8869_v43 = vld [vmem:[%s12276_s8 + $0x814] ss:$8 sps:$4 sm:$0xff]  }
 0x47d   :  { %v8863_v56 = vld [vmem:[%s12276_s8 + $0x110] ss:$8 sps:$4 sm:$0xff]   ;;  %v8872_v39 = vld [vmem:[%s12276_s8 + $0x124] ss:$8 sps:$4 sm:$0xff]  }
 0x47e   :  { %v8867_v62 = vld [vmem:[%s12276_s8 + $0x810] ss:$8 sps:$4 sm:$0xff]   ;;  %v8875_v53 = vld [vmem:[%s12276_s8 + $0x824] ss:$8 sps:$4 sm:$0xff]  }
 0x487   :  { %v8192_v63 = vpop.f32.mrb[28].mxu1 }
 0x488   :  { %v2520_v41 = vadd.f32 %v8192_v63, %v10484_v47  ;;  %v2500_v1 = vpop.f32.mrb[29].mxu1  ;;  %v8870_v63 = vld [vmem:[%s12276_s8 + $0x120] ss:$8 sps:$4 sm:$0xff]  }
 0x489   :  { %v2519_v2 = vadd.f32 %v2500_v1, %v10496_v36  ;;  %v8873_v1 = vld [vmem:[%s12276_s8 + $0x820] ss:$8 sps:$4 sm:$0xff]  }
 0x48a   :  { %v2524_v3 = vmax.f32 %v2520_v41, 0.0  ;;  %v8878_v41 = vld [vmem:[%s12276_s8 + $0x134] ss:$8 sps:$4 sm:$0xff]  }
 0x48b   :  { %v2523_v57 = vmax.f32 %v2519_v2, 0.0  ;;  %v8195_v61 = vpop.f32.mrb[30].mxu1  ;;  %v8881_v2 = vld [vmem:[%s12276_s8 + $0x834] ss:$8 sps:$4 sm:$0xff]  }
 0x48c   :  { %2556 = vst [vmem:[#allocation2 + $0x23] sm:$0x1] %v2524_v3  ;;  %v7126_v30 = vrot.slane %v2524_v3, 9  ;;  %v7127_v31 = vrot.slane %v2524_v3, 10  ;;  %v7128_v32 = vrot.slane %v2524_v3, 11  ;;  %v2570_v33 = vcombine.high %v2524_v3, %v2524_v3  ;;  %v2510_v42 = vpop.f32.mrb[31].mxu1 }
 0x48d   :  { %2527 = vst [vmem:[#allocation2 + $0x3] sm:$0x1] %v2523_v57  ;;  %v7120_v50 = vrot.slane %v2523_v57, 9  ;;  %v7121_v44 = vrot.slane %v2523_v57, 10  ;;  %v7122_v59 = vrot.slane %v2523_v57, 11  ;;  %v2541_v52 = vcombine.high %v2523_v57, %v2523_v57 }
 0x48e   :  { %2561 = vst [vmem:[#allocation2 + $0x27] sm:$0x1] %v7126_v30  ;;  %2565 = vst [vmem:[#allocation2 + $0x2b] sm:$0x1] %v7127_v31  ;;  %v7129_v47 = vrot.slane %v2570_v33, 9  ;;  %v7130_v36 = vrot.slane %v2570_v33, 10  ;;  %v2522_v5 = vadd.f32 %v8195_v61, %v10508_v28  ;;  %v2521_v4 = vadd.f32 %v2510_v42, %v10498_v37 }
 0x48f   :  { %2569 = vst [vmem:[#allocation2 + $0x2f] sm:$0x1] %v7128_v32  ;;  %2572 = vst [vmem:[#allocation2 + $0x33] sm:$0x1] %v2570_v33  ;;  %v7131_v60 = vrot.slane %v2570_v33, 11  ;;  %v7123_v6 = vrot.slane %v2541_v52, 9 }
 0x490   :  { %2532 = vst [vmem:[#allocation2 + $0x7] sm:$0x1] %v7120_v50  ;;  %2536 = vst [vmem:[#allocation2 + $0xb] sm:$0x1] %v7121_v44  ;;  %v7124_v18 = vrot.slane %v2541_v52, 10  ;;  %v7125_v9 = vrot.slane %v2541_v52, 11 }
 0x491   :  { %2540 = vst [vmem:[#allocation2 + $0xf] sm:$0x1] %v7122_v59  ;;  %2543 = vst [vmem:[#allocation2 + $0x13] sm:$0x1] %v2541_v52  ;;  %v2526_v12 = vmax.f32 %v2522_v5, 0.0  ;;  %v2525_v13 = vmax.f32 %v2521_v4, 0.0 }
 0x492   :  { %2576 = vst [vmem:[#allocation2 + $0x37] sm:$0x1] %v7129_v47  ;;  %2580 = vst [vmem:[#allocation2 + $0x3b] sm:$0x1] %v7130_v36  ;;  %v8876_v3 = vld [vmem:[%s12276_s8 + $0x130] ss:$8 sps:$4 sm:$0xff]  }
 0x493   :  { %2584 = vst [vmem:[#allocation2 + $0x3f] sm:$0x1] %v7131_v60  ;;  %2547 = vst [vmem:[#allocation2 + $0x17] sm:$0x1] %v7123_v6  ;;  %v7138_v15 = vrot.slane %v2526_v12, 9  ;;  %v7139_v28 = vrot.slane %v2526_v12, 10  ;;  %v2628_v45 = vcombine.high %v2526_v12, %v2526_v12  ;;  %v2599_v11 = vcombine.high %v2525_v13, %v2525_v13 }
 0x494   :  { %2551 = vst [vmem:[#allocation2 + $0x1b] sm:$0x1] %v7124_v18  ;;  %2555 = vst [vmem:[#allocation2 + $0x1f] sm:$0x1] %v7125_v9  ;;  %v7140_v48 = vrot.slane %v2526_v12, 11  ;;  %v7132_v55 = vrot.slane %v2525_v13, 9 }
 0x495   :  { %2614 = vst [vmem:[#allocation2 + $0x63] sm:$0x1] %v2526_v12  ;;  %2585 = vst [vmem:[#allocation2 + $0x43] sm:$0x1] %v2525_v13  ;;  %v7133_v46 = vrot.slane %v2525_v13, 10  ;;  %v7134_v40 = vrot.slane %v2525_v13, 11 }
 0x496   :  { %2619 = vst [vmem:[#allocation2 + $0x67] sm:$0x1] %v7138_v15  ;;  %2623 = vst [vmem:[#allocation2 + $0x6b] sm:$0x1] %v7139_v28  ;;  %v7141_v37 = vrot.slane %v2628_v45, 9  ;;  %v7142_v17 = vrot.slane %v2628_v45, 10 }
 0x497   :  { %2627 = vst [vmem:[#allocation2 + $0x6f] sm:$0x1] %v7140_v48  ;;  %2630 = vst [vmem:[#allocation2 + $0x73] sm:$0x1] %v2628_v45  ;;  %v7143_v58 = vrot.slane %v2628_v45, 11  ;;  %v7135_v49 = vrot.slane %v2599_v11, 9 }
 0x498   :  { %2590 = vst [vmem:[#allocation2 + $0x47] sm:$0x1] %v7132_v55  ;;  %2594 = vst [vmem:[#allocation2 + $0x4b] sm:$0x1] %v7133_v46  ;;  %v7136_v24 = vrot.slane %v2599_v11, 10  ;;  %v7137_v21 = vrot.slane %v2599_v11, 11 }
 0x499   :  { %2598 = vst [vmem:[#allocation2 + $0x4f] sm:$0x1] %v7134_v40  ;;  %2601 = vst [vmem:[#allocation2 + $0x53] sm:$0x1] %v2599_v11  ;;  %v2643_v51 = vld [vmem:[#allocation2] sm:$0xff]  ;;  %v10730_v22 = vld [vmem:[#allocation2 + $0x8] sm:$0xff] }
 0x49a   :  { %2634 = vst [vmem:[#allocation2 + $0x77] sm:$0x1] %v7141_v37  ;;  %2638 = vst [vmem:[#allocation2 + $0x7b] sm:$0x1] %v7142_v17  ;;  %v2675_v29 = vcombine.high %v2643_v51, %v2643_v51  ;;  %v2650_v8 = vld [vmem:[#allocation2 + $0x38] sm:$0xff]  ;;  %v2676_v23 = vcombine.high %v10730_v22, %v10730_v22  ;;  %v2707_v27 = vpack.c.bf16 %v2643_v51, %v2643_v51 }
 0x49b   :  { %2642 = vst [vmem:[#allocation2 + $0x7f] sm:$0x1] %v7143_v58  ;;  %2605 = vst [vmem:[#allocation2 + $0x57] sm:$0x1] %v7135_v49  ;;  %v2682_v25 = vcombine.high %v2650_v8, %v2650_v8  ;;  %v2721_v35 = vpack.c.bf16 %v2650_v8, %v2650_v8  ;;  %v8884_v57 = vld [vmem:[%s12276_s8 + $0x144] ss:$8 sps:$4 sm:$0xff]  }
 0x49c   :  { %2609 = vst [vmem:[#allocation2 + $0x5b] sm:$0x1] %v7136_v24  ;;  %2613 = vst [vmem:[#allocation2 + $0x5f] sm:$0x1] %v7137_v21  ;;  %v2708_v7 = vpack.c.bf16 %v2675_v29, %v2675_v29  ;;  %v2710_v14 = vpack.c.bf16 %v2676_v23, %v2676_v23  ;;  %v8879_v61 = vld [vmem:[%s12276_s8 + $0x830] ss:$8 sps:$4 sm:$0xff]  }
 0x49d   :  { %v2722_v0 = vpack.c.bf16 %v2682_v25, %v2682_v25  ;;  %v8887_v30 = vld [vmem:[%s12276_s8 + $0x844] ss:$8 sps:$4 sm:$0xff]   ;;  %v8882_v31 = vld [vmem:[%s12276_s8 + $0x140] ss:$8 sps:$4 sm:$0xff]   ;;  %v8890_v32 = vld [vmem:[%s12276_s8 + $0x154] ss:$8 sps:$4 sm:$0xff]  }
 0x49e   :  { %5855 = vmatprep.mubr.bf16.mxu1 %v2708_v7  ;;  %v8885_v33 = vld [vmem:[%s12276_s8 + $0x840] ss:$8 sps:$4 sm:$0xff]   ;;  %v8893_v42 = vld [vmem:[%s12276_s8 + $0x854] ss:$8 sps:$4 sm:$0xff]   ;;  %v8888_v50 = vld [vmem:[%s12276_s8 + $0x150] ss:$8 sps:$4 sm:$0xff]  }
 0x49f   :  { %5856 = vmatmul.mubr.bf16.vlgmr.msra.gmra.mrb[32].mxu1 %v2707_v27  ;;  %6142 = vmatprep.mubr.bf16.mxu0 %v2722_v0  ;;  %v10743_v34 = vld [vmem:[#allocation2 + $0x40] sm:$0xff]  ;;  %v8891_v59 = vld [vmem:[%s12276_s8 + $0x850] ss:$8 sps:$4 sm:$0xff]   ;;  %v8902_v36 = vld [vmem:[%s12276_s8 + $0x174] ss:$8 sps:$4 sm:$0xff]  }
 0x4a0   :  { %5865 = vmatpush1.bf16.msra.mxu1 %v8855_v26  ;;  %5896 = vmatprep.mubr.bf16.mxu1 %v2710_v14  ;;  %v2683_v38 = vcombine.high %v10743_v34, %v10743_v34  ;;  %v8896_v44 = vld [vmem:[%s12276_s8 + $0x164] ss:$8 sps:$4 sm:$0xff]   ;;  %v8894_v47 = vld [vmem:[%s12276_s8 + $0x160] ss:$8 sps:$4 sm:$0xff]   ;;  %v8905_v5 = vld [vmem:[%s12276_s8 + $0x874] ss:$8 sps:$4 sm:$0xff]  }
 0x4a1   :  { %6143 = vmatmul.mubr.bf16.vlgmr.msra.gmra.mrb[32].mxu0 %v2721_v35  ;;  %5866 = vmatprep.subr.bf16.mxu1 %v8865_v16  ;;  %v8899_v52 = vld [vmem:[%s12276_s8 + $0x864] ss:$8 sps:$4 sm:$0xff]   ;;  %v8897_v60 = vld [vmem:[%s12276_s8 + $0x860] ss:$8 sps:$4 sm:$0xff]   ;;  %v8900_v6 = vld [vmem:[%s12276_s8 + $0x170] ss:$8 sps:$4 sm:$0xff]  }
 0x4a2   :  { %6152 = vmatpush1.bf16.msra.mxu0 %v8859_v19  ;;  %v2724_v54 = vpack.c.bf16 %v2683_v38, %v2683_v38  ;;  %v8908_v18 = vld [vmem:[%s12276_s8 + $0x184] ss:$8 sps:$4 sm:$0xff]   ;;  %v8903_v9 = vld [vmem:[%s12276_s8 + $0x870] ss:$8 sps:$4 sm:$0xff]   ;;  %v8906_v12 = vld [vmem:[%s12276_s8 + $0x180] ss:$8 sps:$4 sm:$0xff]  }
 0x4a3   :  { %6153 = vmatprep.subr.bf16.mxu0 %v8869_v43  ;;  %v8911_v4 = vld [vmem:[%s12276_s8 + $0x884] ss:$8 sps:$4 sm:$0xff]   ;;  %v8914_v13 = vld [vmem:[%s12276_s8 + $0x194] ss:$8 sps:$4 sm:$0xff]   ;;  %v8909_v15 = vld [vmem:[%s12276_s8 + $0x880] ss:$8 sps:$4 sm:$0xff]  }
 0x4a4   :  { %6183 = vmatprep.mubr.bf16.mxu0 %v2724_v54  ;;  %5867 = vmatpush1.bf16.msra.mxu1 %v8863_v56  ;;  %v8917_v28 = vld [vmem:[%s12276_s8 + $0x894] ss:$8 sps:$4 sm:$0xff]   ;;  %v8912_v48 = vld [vmem:[%s12276_s8 + $0x190] ss:$8 sps:$4 sm:$0xff]   ;;  %v8920_v45 = vld [vmem:[%s12276_s8 + $0x1a4] ss:$8 sps:$4 sm:$0xff]  }
 0x4a5   :  { %5868 = vmatprep.subr.bf16.mxu1 %v8872_v39  ;;  %v8915_v55 = vld [vmem:[%s12276_s8 + $0x890] ss:$8 sps:$4 sm:$0xff]   ;;  %v8923_v46 = vld [vmem:[%s12276_s8 + $0x8a4] ss:$8 sps:$4 sm:$0xff]   ;;  %v8918_v40 = vld [vmem:[%s12276_s8 + $0x1a0] ss:$8 sps:$4 sm:$0xff]  }
 0x4a6   :  { %6154 = vmatpush1.bf16.msra.mxu0 %v8867_v62  ;;  %v8926_v11 = vld [vmem:[%s12276_s8 + $0x1b4] ss:$8 sps:$4 sm:$0xff]   ;;  %v8921_v37 = vld [vmem:[%s12276_s8 + $0x8a0] ss:$8 sps:$4 sm:$0xff]   ;;  %v8924_v58 = vld [vmem:[%s12276_s8 + $0x1b0] ss:$8 sps:$4 sm:$0xff]  }
 0x4a7   :  { %6155 = vmatprep.subr.bf16.mxu0 %v8875_v53  ;;  %v8929_v17 = vld [vmem:[%s12276_s8 + $0x8b4] ss:$8 sps:$4 sm:$0xff]   ;;  %v8932_v49 = vld [vmem:[%s12276_s8 + $0x1c4] ss:$8 sps:$4 sm:$0xff]   ;;  %v8927_v24 = vld [vmem:[%s12276_s8 + $0x8b0] ss:$8 sps:$4 sm:$0xff]  }
 0x4a8   :  { %5869 = vmatpush1.bf16.msra.mxu1 %v8870_v63  ;;  %v8935_v21 = vld [vmem:[%s12276_s8 + $0x8c4] ss:$8 sps:$4 sm:$0xff]   ;;  %v8930_v51 = vld [vmem:[%s12276_s8 + $0x1c0] ss:$8 sps:$4 sm:$0xff]   ;;  %v8938_v29 = vld [vmem:[%s12276_s8 + $0x1d4] ss:$8 sps:$4 sm:$0xff]  }
 0x4a9   :  { %5870 = vmatprep.subr.bf16.mxu1 %v8878_v41  ;;  %v8933_v8 = vld [vmem:[%s12276_s8 + $0x8c0] ss:$8 sps:$4 sm:$0xff]   ;;  %v8941_v23 = vld [vmem:[%s12276_s8 + $0x8d4] ss:$8 sps:$4 sm:$0xff]   ;;  %v8936_v25 = vld [vmem:[%s12276_s8 + $0x1d0] ss:$8 sps:$4 sm:$0xff]   ;;  %v2709_v41 = vpack.c.bf16 %v10730_v22, %v10730_v22 }
 0x4aa   :  { %6156 = vmatpush1.bf16.msra.mxu0 %v8873_v1  ;;  %v8944_v7 = vld [vmem:[%s12276_s8 + $0x1e4] ss:$8 sps:$4 sm:$0xff]   ;;  %v8939_v26 = vld [vmem:[%s12276_s8 + $0x8d0] ss:$8 sps:$4 sm:$0xff]   ;;  %v8942_v0 = vld [vmem:[%s12276_s8 + $0x1e0] ss:$8 sps:$4 sm:$0xff]  }
 0x4ab   :  { %6157 = vmatprep.subr.bf16.mxu0 %v8881_v2  ;;  %v8947_v27 = vld [vmem:[%s12276_s8 + $0x8e4] ss:$8 sps:$4 sm:$0xff]   ;;  %v8950_v16 = vld [vmem:[%s12276_s8 + $0x1f4] ss:$8 sps:$4 sm:$0xff]   ;;  %v8945_v19 = vld [vmem:[%s12276_s8 + $0x8e0] ss:$8 sps:$4 sm:$0xff]  }
 0x4ac   :  { %5871 = vmatpush1.bf16.msra.mxu1 %v8876_v3  ;;  %v8953_v14 = vld [vmem:[%s12276_s8 + $0x8f4] ss:$8 sps:$4 sm:$0xff]   ;;  %v8948_v43 = vld [vmem:[%s12276_s8 + $0x1f0] ss:$8 sps:$4 sm:$0xff]   ;;  %v8956_v56 = vld [vmem:[%s12276_s8 + $0x204] ss:$8 sps:$4 sm:$0xff]  }
 0x4ad   :  { %5872 = vmatprep.subr.bf16.mxu1 %v8884_v57  ;;  %v10918_v35 = vld [vmem:[#allocation2 + $0x10] sm:$0xff]  ;;  %v10926_v38 = vld [vmem:[#allocation2 + $0x48] sm:$0xff]  ;;  %v2723_v57 = vpack.c.bf16 %v10743_v34, %v10743_v34 }
 0x4ae   :  { %6158 = vmatpush1.bf16.msra.mxu0 %v8879_v61  ;;  %v8951_v39 = vld [vmem:[%s12276_s8 + $0x8f0] ss:$8 sps:$4 sm:$0xff]   ;;  %v2677_v54 = vcombine.high %v10918_v35, %v10918_v35  ;;  %v8960_v62 = vld [vmem:[%s12276_s8 + $0x904] ss:$8 sps:$4 sm:$0xff]   ;;  %v8954_v53 = vld [vmem:[%s12276_s8 + $0x200] ss:$8 sps:$4 sm:$0xff]   ;;  %v2684_v63 = vcombine.high %v10926_v38, %v10926_v38 }
 0x4af   :  { %6159 = vmatprep.subr.bf16.mxu0 %v8887_v30  ;;  %v8964_v1 = vld [vmem:[%s12276_s8 + $0x214] ss:$8 sps:$4 sm:$0xff]   ;;  %v8958_v3 = vld [vmem:[%s12276_s8 + $0x900] ss:$8 sps:$4 sm:$0xff]   ;;  %v8962_v30 = vld [vmem:[%s12276_s8 + $0x210] ss:$8 sps:$4 sm:$0xff]  }
 0x4b0   :  { %5873 = vmatpush1.bf16.msra.mxu1 %v8882_v31  ;;  %v2712_v2 = vpack.c.bf16 %v2677_v54, %v2677_v54  ;;  %v8967_v22 = vld [vmem:[%s12276_s8 + $0x914] ss:$8 sps:$4 sm:$0xff]   ;;  %v2726_v61 = vpack.c.bf16 %v2684_v63, %v2684_v63  ;;  %v8970_v31 = vld [vmem:[%s12276_s8 + $0x224] ss:$8 sps:$4 sm:$0xff]   ;;  %v8965_v34 = vld [vmem:[%s12276_s8 + $0x910] ss:$8 sps:$4 sm:$0xff]  }
 0x4b1   :  { %5874 = vmatprep.subr.bf16.mxu1 %v8890_v32  ;;  %v8973_v32 = vld [vmem:[%s12276_s8 + $0x924] ss:$8 sps:$4 sm:$0xff]   ;;  %v9040_v63 = vld [vmem:[%s12276_s8 + $0x2e0] ss:$8 sps:$4 sm:$0xff]  }
 0x4b2   :  { %6160 = vmatpush1.bf16.msra.mxu0 %v8885_v33  ;;  %v8968_v33 = vld [vmem:[%s12276_s8 + $0x220] ss:$8 sps:$4 sm:$0xff]   ;;  %v9042_v54 = vld [vmem:[%s12276_s8 + $0x2e4] ss:$8 sps:$4 sm:$0xff]  }
 0x4b3   :  { %6161 = vmatprep.subr.bf16.mxu0 %v8893_v42  ;;  %v8976_v42 = vld [vmem:[%s12276_s8 + $0x234] ss:$8 sps:$4 sm:$0xff]  }
 0x4b4   :  { %5875 = vmatpush1.bf16.msra.mxu1 %v8888_v50  ;;  %v8971_v50 = vld [vmem:[%s12276_s8 + $0x920] ss:$8 sps:$4 sm:$0xff]  }
 0x4b5   :  { %5876 = vmatprep.subr.bf16.mxu1 %v8896_v44  ;;  %v8979_v44 = vld [vmem:[%s12276_s8 + $0x934] ss:$8 sps:$4 sm:$0xff]  }
 0x4b6   :  { %6162 = vmatpush1.bf16.msra.mxu0 %v8891_v59  ;;  %v8974_v59 = vld [vmem:[%s12276_s8 + $0x230] ss:$8 sps:$4 sm:$0xff]  }
 0x4b7   :  { %6163 = vmatprep.subr.bf16.mxu0 %v8899_v52  ;;  %v8982_v52 = vld [vmem:[%s12276_s8 + $0x244] ss:$8 sps:$4 sm:$0xff]  }
 0x4b8   :  { %5877 = vmatpush1.bf16.msra.mxu1 %v8894_v47  ;;  %v8977_v47 = vld [vmem:[%s12276_s8 + $0x930] ss:$8 sps:$4 sm:$0xff]  }
 0x4b9   :  { %5878 = vmatprep.subr.bf16.mxu1 %v8902_v36  ;;  %v8985_v36 = vld [vmem:[%s12276_s8 + $0x944] ss:$8 sps:$4 sm:$0xff]  }
 0x4ba   :  { %6164 = vmatpush1.bf16.msra.mxu0 %v8897_v60  ;;  %v8980_v60 = vld [vmem:[%s12276_s8 + $0x240] ss:$8 sps:$4 sm:$0xff]  }
 0x4bb   :  { %6165 = vmatprep.subr.bf16.mxu0 %v8905_v5  ;;  %v8988_v5 = vld [vmem:[%s12276_s8 + $0x254] ss:$8 sps:$4 sm:$0xff]  }
 0x4bc   :  { %5879 = vmatpush1.bf16.msra.mxu1 %v8900_v6  ;;  %v8983_v6 = vld [vmem:[%s12276_s8 + $0x940] ss:$8 sps:$4 sm:$0xff]  }
 0x4bd   :  { %5880 = vmatprep.subr.bf16.mxu1 %v8908_v18  ;;  %v8991_v18 = vld [vmem:[%s12276_s8 + $0x954] ss:$8 sps:$4 sm:$0xff]  }
 0x4be   :  { %6166 = vmatpush1.bf16.msra.mxu0 %v8903_v9  ;;  %v8986_v9 = vld [vmem:[%s12276_s8 + $0x250] ss:$8 sps:$4 sm:$0xff]  }
 0x4bf   :  { %6167 = vmatprep.subr.bf16.mxu0 %v8911_v4  ;;  %v8994_v4 = vld [vmem:[%s12276_s8 + $0x264] ss:$8 sps:$4 sm:$0xff]  }
 0x4c0   :  { %5881 = vmatpush1.bf16.msra.mxu1 %v8906_v12  ;;  %v8989_v12 = vld [vmem:[%s12276_s8 + $0x950] ss:$8 sps:$4 sm:$0xff]  }
 0x4c1   :  { %5882 = vmatprep.subr.bf16.mxu1 %v8914_v13  ;;  %v8997_v13 = vld [vmem:[%s12276_s8 + $0x964] ss:$8 sps:$4 sm:$0xff]  }
 0x4c2   :  { %6168 = vmatpush1.bf16.msra.mxu0 %v8909_v15  ;;  %v8992_v15 = vld [vmem:[%s12276_s8 + $0x260] ss:$8 sps:$4 sm:$0xff]  }
 0x4c3   :  { %6169 = vmatprep.subr.bf16.mxu0 %v8917_v28  ;;  %v9000_v28 = vld [vmem:[%s12276_s8 + $0x274] ss:$8 sps:$4 sm:$0xff]  }
 0x4c4   :  { %5883 = vmatpush1.bf16.msra.mxu1 %v8912_v48  ;;  %v8995_v48 = vld [vmem:[%s12276_s8 + $0x960] ss:$8 sps:$4 sm:$0xff]  }
 0x4c5   :  { %5884 = vmatprep.subr.bf16.mxu1 %v8920_v45  ;;  %v9003_v45 = vld [vmem:[%s12276_s8 + $0x974] ss:$8 sps:$4 sm:$0xff]  }
 0x4c6   :  { %6170 = vmatpush1.bf16.msra.mxu0 %v8915_v55  ;;  %v8998_v55 = vld [vmem:[%s12276_s8 + $0x270] ss:$8 sps:$4 sm:$0xff]  }
 0x4c7   :  { %6171 = vmatprep.subr.bf16.mxu0 %v8923_v46  ;;  %v9006_v46 = vld [vmem:[%s12276_s8 + $0x284] ss:$8 sps:$4 sm:$0xff]  }
 0x4c8   :  { %5885 = vmatpush1.bf16.msra.mxu1 %v8918_v40  ;;  %v9001_v40 = vld [vmem:[%s12276_s8 + $0x970] ss:$8 sps:$4 sm:$0xff]  }
 0x4c9   :  { %5886 = vmatprep.subr.bf16.mxu1 %v8926_v11  ;;  %v9009_v11 = vld [vmem:[%s12276_s8 + $0x984] ss:$8 sps:$4 sm:$0xff]  }
 0x4ca   :  { %6172 = vmatpush1.bf16.msra.mxu0 %v8921_v37  ;;  %v9004_v37 = vld [vmem:[%s12276_s8 + $0x280] ss:$8 sps:$4 sm:$0xff]  }
 0x4cb   :  { %6173 = vmatprep.subr.bf16.mxu0 %v8929_v17  ;;  %v9012_v17 = vld [vmem:[%s12276_s8 + $0x294] ss:$8 sps:$4 sm:$0xff]  }
 0x4cc   :  { %5887 = vmatpush1.bf16.msra.mxu1 %v8924_v58  ;;  %v9007_v58 = vld [vmem:[%s12276_s8 + $0x980] ss:$8 sps:$4 sm:$0xff]  }
 0x4cd   :  { %5888 = vmatprep.subr.bf16.mxu1 %v8932_v49  ;;  %v9015_v49 = vld [vmem:[%s12276_s8 + $0x994] ss:$8 sps:$4 sm:$0xff]  }
 0x4ce   :  { %6174 = vmatpush1.bf16.msra.mxu0 %v8927_v24  ;;  %v9010_v24 = vld [vmem:[%s12276_s8 + $0x290] ss:$8 sps:$4 sm:$0xff]  }
 0x4cf   :  { %6175 = vmatprep.subr.bf16.mxu0 %v8935_v21  ;;  %v9018_v21 = vld [vmem:[%s12276_s8 + $0x2a4] ss:$8 sps:$4 sm:$0xff]  }
 0x4d0   :  { %5889 = vmatpush1.bf16.msra.mxu1 %v8930_v51  ;;  %v9013_v51 = vld [vmem:[%s12276_s8 + $0x990] ss:$8 sps:$4 sm:$0xff]  }
 0x4d1   :  { %5890 = vmatprep.subr.bf16.mxu1 %v8938_v29  ;;  %v9021_v29 = vld [vmem:[%s12276_s8 + $0x9a4] ss:$8 sps:$4 sm:$0xff]  }
 0x4d2   :  { %6176 = vmatpush1.bf16.msra.mxu0 %v8933_v8  ;;  %v9016_v8 = vld [vmem:[%s12276_s8 + $0x2a0] ss:$8 sps:$4 sm:$0xff]  }
 0x4d3   :  { %6177 = vmatprep.subr.bf16.mxu0 %v8941_v23  ;;  %v9024_v23 = vld [vmem:[%s12276_s8 + $0x2b4] ss:$8 sps:$4 sm:$0xff]  }
 0x4d4   :  { %5891 = vmatpush1.bf16.msra.mxu1 %v8936_v25  ;;  %v9019_v25 = vld [vmem:[%s12276_s8 + $0x9a0] ss:$8 sps:$4 sm:$0xff]  }
 0x4d5   :  { %5892 = vmatprep.subr.bf16.mxu1 %v8944_v7  ;;  %v9027_v7 = vld [vmem:[%s12276_s8 + $0x9b4] ss:$8 sps:$4 sm:$0xff]  }
 0x4d6   :  { %6178 = vmatpush1.bf16.msra.mxu0 %v8939_v26  ;;  %v9022_v26 = vld [vmem:[%s12276_s8 + $0x2b0] ss:$8 sps:$4 sm:$0xff]  }
 0x4d7   :  { %6179 = vmatprep.subr.bf16.mxu0 %v8947_v27  ;;  %v9030_v27 = vld [vmem:[%s12276_s8 + $0x2c4] ss:$8 sps:$4 sm:$0xff]  }
 0x4d8   :  { %5893 = vmatpush1.bf16.msra.mxu1 %v8942_v0  ;;  %v9025_v0 = vld [vmem:[%s12276_s8 + $0x9b0] ss:$8 sps:$4 sm:$0xff]  }
 0x4d9   :  { %5894 = vmatprep.subr.bf16.mxu1 %v8950_v16  ;;  %v9033_v16 = vld [vmem:[%s12276_s8 + $0x9c4] ss:$8 sps:$4 sm:$0xff]  }
 0x4da   :  { %6180 = vmatpush1.bf16.msra.mxu0 %v8945_v19  ;;  %v9028_v19 = vld [vmem:[%s12276_s8 + $0x2c0] ss:$8 sps:$4 sm:$0xff]  }
 0x4db   :  { %6181 = vmatprep.subr.bf16.mxu0 %v8953_v14  ;;  %v9036_v14 = vld [vmem:[%s12276_s8 + $0x2d4] ss:$8 sps:$4 sm:$0xff]  }
 0x4dc   :  { %5895 = vmatpush1.bf16.msra.mxu1 %v8948_v43  ;;  %v9031_v43 = vld [vmem:[%s12276_s8 + $0x9c0] ss:$8 sps:$4 sm:$0xff]  }
 0x4dd   :  { %5905 = vmatprep.subr.bf16.mxu1 %v8956_v56  ;;  %v9039_v56 = vld [vmem:[%s12276_s8 + $0x9d4] ss:$8 sps:$4 sm:$0xff]  }
 0x4de   :  { %6182 = vmatpush1.bf16.msra.mxu0 %v8951_v39  ;;  %v9034_v39 = vld [vmem:[%s12276_s8 + $0x2d0] ss:$8 sps:$4 sm:$0xff]  }
 0x4df   :  { %5897 = vmatmul.mubr.bf16.vlgmr.msra.gmra.mrb[32].mxu1 %v2709_v41  ;;  %6192 = vmatprep.subr.bf16.mxu0 %v8960_v62  ;;  %v9037_v62 = vld [vmem:[%s12276_s8 + $0x9d0] ss:$8 sps:$4 sm:$0xff]   ;;  %v9048_v41 = vld [vmem:[%s12276_s8 + $0x2f4] ss:$8 sps:$4 sm:$0xff]  }
 0x4e0   :  { %5906 = vmatpush1.bf16.msra.mxu1 %v8954_v53  ;;  %5937 = vmatprep.mubr.bf16.mxu1 %v2712_v2  ;;  %v9045_v53 = vld [vmem:[%s12276_s8 + $0x9e4] ss:$8 sps:$4 sm:$0xff]   ;;  %v9051_v2 = vld [vmem:[%s12276_s8 + $0x9f4] ss:$8 sps:$4 sm:$0xff]  }
 0x4e1   :  { %6184 = vmatmul.mubr.bf16.vlgmr.msra.gmra.mrb[32].mxu0 %v2723_v57  ;;  %5907 = vmatprep.subr.bf16.mxu1 %v8964_v1  ;;  %v9043_v1 = vld [vmem:[%s12276_s8 + $0x9e0] ss:$8 sps:$4 sm:$0xff]   ;;  %v9046_v57 = vld [vmem:[%s12276_s8 + $0x2f0] ss:$8 sps:$4 sm:$0xff]  }
 0x4e2   :  { %6193 = vmatpush1.bf16.msra.mxu0 %v8958_v3  ;;  %6224 = vmatprep.mubr.bf16.mxu0 %v2726_v61  ;;  %v11122_v3 = vld [vmem:[#allocation2 + $0x18] sm:$0xff]  ;;  %v11130_v61 = vld [vmem:[#allocation2 + $0x50] sm:$0xff] }
 0x4e3   :  { %6194 = vmatprep.subr.bf16.mxu0 %v8967_v22  ;;  %v9054_v22 = vld [vmem:[%s12276_s8 + $0x304] ss:$8 sps:$4 sm:$0xff]  }
 0x4e4   :  { %5908 = vmatpush1.bf16.msra.mxu1 %v8962_v30  ;;  %v9049_v30 = vld [vmem:[%s12276_s8 + $0x9f0] ss:$8 sps:$4 sm:$0xff]  }
 0x4e5   :  { %5909 = vmatprep.subr.bf16.mxu1 %v8970_v31  ;;  %v2678_v31 = vcombine.high %v11122_v3, %v11122_v3 }
 0x4e6   :  { %6195 = vmatpush1.bf16.msra.mxu0 %v8965_v34  ;;  %v9058_v34 = vld [vmem:[%s12276_s8 + $0xa04] ss:$8 sps:$4 sm:$0xff]  }
 0x4e7   :  { %6196 = vmatprep.subr.bf16.mxu0 %v8973_v32  ;;  %v9052_v32 = vld [vmem:[%s12276_s8 + $0x300] ss:$8 sps:$4 sm:$0xff]  }
 0x4e8   :  { %5910 = vmatpush1.bf16.msra.mxu1 %v8968_v33  ;;  %v2685_v33 = vcombine.high %v11130_v61, %v11130_v61 }
 0x4e9   :  { %5911 = vmatprep.subr.bf16.mxu1 %v8976_v42  ;;  %v2711_v42 = vpack.c.bf16 %v10918_v35, %v10918_v35  ;;  %v9065_v35 = vld [vmem:[%s12276_s8 + $0xa14] ss:$8 sps:$4 sm:$0xff]  }
 0x4ea   :  { %6197 = vmatpush1.bf16.msra.mxu0 %v8971_v50  ;;  %v9062_v50 = vld [vmem:[%s12276_s8 + $0x314] ss:$8 sps:$4 sm:$0xff]  }
 0x4eb   :  { %6198 = vmatprep.subr.bf16.mxu0 %v8979_v44  ;;  %v2714_v44 = vpack.c.bf16 %v2678_v31, %v2678_v31  ;;  %v9140_v31 = vld [vmem:[%s12276_s8 + $0x3e4] ss:$8 sps:$4 sm:$0xff]  }
 0x4ec   :  { %5912 = vmatpush1.bf16.msra.mxu1 %v8974_v59  ;;  %v9056_v59 = vld [vmem:[%s12276_s8 + $0xa00] ss:$8 sps:$4 sm:$0xff]  }
 0x4ed   :  { %5913 = vmatprep.subr.bf16.mxu1 %v8982_v52  ;;  %v2725_v52 = vpack.c.bf16 %v10926_v38, %v10926_v38  ;;  %v9063_v38 = vld [vmem:[%s12276_s8 + $0xa10] ss:$8 sps:$4 sm:$0xff]  }
 0x4ee   :  { %6199 = vmatpush1.bf16.msra.mxu0 %v8977_v47  ;;  %v2728_v47 = vpack.c.bf16 %v2685_v33, %v2685_v33  ;;  %v9138_v33 = vld [vmem:[%s12276_s8 + $0x3e0] ss:$8 sps:$4 sm:$0xff]  }
 0x4ef   :  { %6200 = vmatprep.subr.bf16.mxu0 %v8985_v36  ;;  %v9060_v36 = vld [vmem:[%s12276_s8 + $0x310] ss:$8 sps:$4 sm:$0xff]  }
 0x4f0   :  { %5914 = vmatpush1.bf16.msra.mxu1 %v8980_v60  ;;  %v9068_v60 = vld [vmem:[%s12276_s8 + $0x324] ss:$8 sps:$4 sm:$0xff]  }
 0x4f1   :  { %5915 = vmatprep.subr.bf16.mxu1 %v8988_v5  ;;  %v9071_v5 = vld [vmem:[%s12276_s8 + $0xa24] ss:$8 sps:$4 sm:$0xff]  }
 0x4f2   :  { %6201 = vmatpush1.bf16.msra.mxu0 %v8983_v6  ;;  %v9066_v6 = vld [vmem:[%s12276_s8 + $0x320] ss:$8 sps:$4 sm:$0xff]  }
 0x4f3   :  { %6202 = vmatprep.subr.bf16.mxu0 %v8991_v18  ;;  %v9074_v18 = vld [vmem:[%s12276_s8 + $0x334] ss:$8 sps:$4 sm:$0xff]  }
 0x4f4   :  { %5916 = vmatpush1.bf16.msra.mxu1 %v8986_v9  ;;  %v9069_v9 = vld [vmem:[%s12276_s8 + $0xa20] ss:$8 sps:$4 sm:$0xff]  }
 0x4f5   :  { %5917 = vmatprep.subr.bf16.mxu1 %v8994_v4  ;;  %v9077_v4 = vld [vmem:[%s12276_s8 + $0xa34] ss:$8 sps:$4 sm:$0xff]  }
 0x4f6   :  { %6203 = vmatpush1.bf16.msra.mxu0 %v8989_v12  ;;  %v9072_v12 = vld [vmem:[%s12276_s8 + $0x330] ss:$8 sps:$4 sm:$0xff]  }
 0x4f7   :  { %6204 = vmatprep.subr.bf16.mxu0 %v8997_v13  ;;  %v9080_v13 = vld [vmem:[%s12276_s8 + $0x344] ss:$8 sps:$4 sm:$0xff]  }
 0x4f8   :  { %5918 = vmatpush1.bf16.msra.mxu1 %v8992_v15  ;;  %v9075_v15 = vld [vmem:[%s12276_s8 + $0xa30] ss:$8 sps:$4 sm:$0xff]  }
 0x4f9   :  { %5919 = vmatprep.subr.bf16.mxu1 %v9000_v28  ;;  %v9083_v28 = vld [vmem:[%s12276_s8 + $0xa44] ss:$8 sps:$4 sm:$0xff]  }
 0x4fa   :  { %6205 = vmatpush1.bf16.msra.mxu0 %v8995_v48  ;;  %v9078_v48 = vld [vmem:[%s12276_s8 + $0x340] ss:$8 sps:$4 sm:$0xff]  }
 0x4fb   :  { %6206 = vmatprep.subr.bf16.mxu0 %v9003_v45  ;;  %v9086_v45 = vld [vmem:[%s12276_s8 + $0x354] ss:$8 sps:$4 sm:$0xff]  }
 0x4fc   :  { %5920 = vmatpush1.bf16.msra.mxu1 %v8998_v55  ;;  %v9081_v55 = vld [vmem:[%s12276_s8 + $0xa40] ss:$8 sps:$4 sm:$0xff]  }
 0x4fd   :  { %5921 = vmatprep.subr.bf16.mxu1 %v9006_v46  ;;  %v9089_v46 = vld [vmem:[%s12276_s8 + $0xa54] ss:$8 sps:$4 sm:$0xff]  }
 0x4fe   :  { %6207 = vmatpush1.bf16.msra.mxu0 %v9001_v40  ;;  %v9084_v40 = vld [vmem:[%s12276_s8 + $0x350] ss:$8 sps:$4 sm:$0xff]  }
 0x4ff   :  { %6208 = vmatprep.subr.bf16.mxu0 %v9009_v11  ;;  %v9092_v11 = vld [vmem:[%s12276_s8 + $0x364] ss:$8 sps:$4 sm:$0xff]  }
 0x500   :  { %5922 = vmatpush1.bf16.msra.mxu1 %v9004_v37  ;;  %v9087_v37 = vld [vmem:[%s12276_s8 + $0xa50] ss:$8 sps:$4 sm:$0xff]  }
 0x501   :  { %5923 = vmatprep.subr.bf16.mxu1 %v9012_v17  ;;  %v9095_v17 = vld [vmem:[%s12276_s8 + $0xa64] ss:$8 sps:$4 sm:$0xff]  }
 0x502   :  { %6209 = vmatpush1.bf16.msra.mxu0 %v9007_v58  ;;  %v9090_v58 = vld [vmem:[%s12276_s8 + $0x360] ss:$8 sps:$4 sm:$0xff]  }
 0x503   :  { %6210 = vmatprep.subr.bf16.mxu0 %v9015_v49  ;;  %v9098_v49 = vld [vmem:[%s12276_s8 + $0x374] ss:$8 sps:$4 sm:$0xff]  }
 0x504   :  { %5924 = vmatpush1.bf16.msra.mxu1 %v9010_v24  ;;  %v9093_v24 = vld [vmem:[%s12276_s8 + $0xa60] ss:$8 sps:$4 sm:$0xff]  }
 0x505   :  { %5925 = vmatprep.subr.bf16.mxu1 %v9018_v21  ;;  %v9101_v21 = vld [vmem:[%s12276_s8 + $0xa74] ss:$8 sps:$4 sm:$0xff]  }
 0x506   :  { %6211 = vmatpush1.bf16.msra.mxu0 %v9013_v51  ;;  %v9096_v51 = vld [vmem:[%s12276_s8 + $0x370] ss:$8 sps:$4 sm:$0xff]  }
 0x507   :  { %6212 = vmatprep.subr.bf16.mxu0 %v9021_v29  ;;  %v9104_v29 = vld [vmem:[%s12276_s8 + $0x384] ss:$8 sps:$4 sm:$0xff]  }
 0x508   :  { %5926 = vmatpush1.bf16.msra.mxu1 %v9016_v8  ;;  %v9099_v8 = vld [vmem:[%s12276_s8 + $0xa70] ss:$8 sps:$4 sm:$0xff]  }
 0x509   :  { %5927 = vmatprep.subr.bf16.mxu1 %v9024_v23  ;;  %v9107_v23 = vld [vmem:[%s12276_s8 + $0xa84] ss:$8 sps:$4 sm:$0xff]  }
 0x50a   :  { %6213 = vmatpush1.bf16.msra.mxu0 %v9019_v25  ;;  %v9102_v25 = vld [vmem:[%s12276_s8 + $0x380] ss:$8 sps:$4 sm:$0xff]  }
 0x50b   :  { %6214 = vmatprep.subr.bf16.mxu0 %v9027_v7  ;;  %v9110_v7 = vld [vmem:[%s12276_s8 + $0x394] ss:$8 sps:$4 sm:$0xff]  }
 0x50c   :  { %5928 = vmatpush1.bf16.msra.mxu1 %v9022_v26  ;;  %v9105_v26 = vld [vmem:[%s12276_s8 + $0xa80] ss:$8 sps:$4 sm:$0xff]  }
 0x50d   :  { %5929 = vmatprep.subr.bf16.mxu1 %v9030_v27  ;;  %v9113_v27 = vld [vmem:[%s12276_s8 + $0xa94] ss:$8 sps:$4 sm:$0xff]  }
 0x50e   :  { %6215 = vmatpush1.bf16.msra.mxu0 %v9025_v0  ;;  %v9108_v0 = vld [vmem:[%s12276_s8 + $0x390] ss:$8 sps:$4 sm:$0xff]  }
 0x50f   :  { %6216 = vmatprep.subr.bf16.mxu0 %v9033_v16  ;;  %v9116_v16 = vld [vmem:[%s12276_s8 + $0x3a4] ss:$8 sps:$4 sm:$0xff]  }
 0x510   :  { %5930 = vmatpush1.bf16.msra.mxu1 %v9028_v19  ;;  %v9111_v19 = vld [vmem:[%s12276_s8 + $0xa90] ss:$8 sps:$4 sm:$0xff]  }
 0x511   :  { %5931 = vmatprep.subr.bf16.mxu1 %v9036_v14  ;;  %v9119_v14 = vld [vmem:[%s12276_s8 + $0xaa4] ss:$8 sps:$4 sm:$0xff]  }
 0x512   :  { %6217 = vmatpush1.bf16.msra.mxu0 %v9031_v43  ;;  %v9114_v43 = vld [vmem:[%s12276_s8 + $0x3a0] ss:$8 sps:$4 sm:$0xff]  }
 0x513   :  { %6218 = vmatprep.subr.bf16.mxu0 %v9039_v56  ;;  %v9122_v56 = vld [vmem:[%s12276_s8 + $0x3b4] ss:$8 sps:$4 sm:$0xff]  }
 0x514   :  { %5932 = vmatpush1.bf16.msra.mxu1 %v9034_v39  ;;  %v9117_v39 = vld [vmem:[%s12276_s8 + $0xaa0] ss:$8 sps:$4 sm:$0xff]  }
 0x515   :  { %5933 = vmatprep.subr.bf16.mxu1 %v9042_v54  ;;  %v9125_v54 = vld [vmem:[%s12276_s8 + $0xab4] ss:$8 sps:$4 sm:$0xff]  }
 0x516   :  { %6219 = vmatpush1.bf16.msra.mxu0 %v9037_v62  ;;  %v9120_v62 = vld [vmem:[%s12276_s8 + $0x3b0] ss:$8 sps:$4 sm:$0xff]  }
 0x517   :  { %6220 = vmatprep.subr.bf16.mxu0 %v9045_v53  ;;  %v9128_v53 = vld [vmem:[%s12276_s8 + $0x3c4] ss:$8 sps:$4 sm:$0xff]  }
 0x518   :  { %5934 = vmatpush1.bf16.msra.mxu1 %v9040_v63  ;;  %v9123_v63 = vld [vmem:[%s12276_s8 + $0xab0] ss:$8 sps:$4 sm:$0xff]  }
 0x519   :  { %5935 = vmatprep.subr.bf16.mxu1 %v9048_v41  ;;  %v9131_v41 = vld [vmem:[%s12276_s8 + $0xac4] ss:$8 sps:$4 sm:$0xff]  }
 0x51a   :  { %6221 = vmatpush1.bf16.msra.mxu0 %v9043_v1  ;;  %v9126_v1 = vld [vmem:[%s12276_s8 + $0x3c0] ss:$8 sps:$4 sm:$0xff]  }
 0x51b   :  { %6222 = vmatprep.subr.bf16.mxu0 %v9051_v2  ;;  %v9134_v2 = vld [vmem:[%s12276_s8 + $0x3d4] ss:$8 sps:$4 sm:$0xff]  }
 0x51c   :  { %5936 = vmatpush1.bf16.msra.mxu1 %v9046_v57  ;;  %v9129_v57 = vld [vmem:[%s12276_s8 + $0xac0] ss:$8 sps:$4 sm:$0xff]  }
 0x51d   :  { %5946 = vmatprep.subr.bf16.mxu1 %v9054_v22  ;;  %v9137_v22 = vld [vmem:[%s12276_s8 + $0xad4] ss:$8 sps:$4 sm:$0xff]  }
 0x51e   :  { %6223 = vmatpush1.bf16.msra.mxu0 %v9049_v30  ;;  %v9132_v30 = vld [vmem:[%s12276_s8 + $0x3d0] ss:$8 sps:$4 sm:$0xff]  }
 0x51f   :  { %5938 = vmatmul.mubr.bf16.vlgmr.msra.gmra.mrb[32].mxu1 %v2711_v42  ;;  %6233 = vmatprep.subr.bf16.mxu0 %v9058_v34  ;;  %v9135_v34 = vld [vmem:[%s12276_s8 + $0xad0] ss:$8 sps:$4 sm:$0xff]   ;;  %v9146_v42 = vld [vmem:[%s12276_s8 + $0x3f4] ss:$8 sps:$4 sm:$0xff]  }
 0x520   :  { %5947 = vmatpush1.bf16.msra.mxu1 %v9052_v32  ;;  %5978 = vmatprep.mubr.bf16.mxu1 %v2714_v44  ;;  %v9143_v32 = vld [vmem:[%s12276_s8 + $0xae4] ss:$8 sps:$4 sm:$0xff]   ;;  %v9149_v44 = vld [vmem:[%s12276_s8 + $0xaf4] ss:$8 sps:$4 sm:$0xff]  }
 0x521   :  { %6225 = vmatmul.mubr.bf16.vlgmr.msra.gmra.mrb[32].mxu0 %v2725_v52  ;;  %5948 = vmatprep.subr.bf16.mxu1 %v9062_v50  ;;  %v9141_v50 = vld [vmem:[%s12276_s8 + $0xae0] ss:$8 sps:$4 sm:$0xff]   ;;  %v9144_v52 = vld [vmem:[%s12276_s8 + $0x3f0] ss:$8 sps:$4 sm:$0xff]  }
 0x522   :  { %6234 = vmatpush1.bf16.msra.mxu0 %v9056_v59  ;;  %6265 = vmatprep.mubr.bf16.mxu0 %v2728_v47  ;;  %v11326_v59 = vld [vmem:[#allocation2 + $0x20] sm:$0xff]  ;;  %v11334_v47 = vld [vmem:[#allocation2 + $0x58] sm:$0xff] }
 0x523   :  { %6235 = vmatprep.subr.bf16.mxu0 %v9065_v35  ;;  %v9152_v35 = vld [vmem:[%s12276_s8 + $0x404] ss:$8 sps:$4 sm:$0xff]  }
 0x524   :  { %5949 = vmatpush1.bf16.msra.mxu1 %v9060_v36  ;;  %v9147_v36 = vld [vmem:[%s12276_s8 + $0xaf0] ss:$8 sps:$4 sm:$0xff]  }
 0x525   :  { %5950 = vmatprep.subr.bf16.mxu1 %v9068_v60  ;;  %v2679_v60 = vcombine.high %v11326_v59, %v11326_v59 }
 0x526   :  { %6236 = vmatpush1.bf16.msra.mxu0 %v9063_v38  ;;  %v9156_v38 = vld [vmem:[%s12276_s8 + $0xb04] ss:$8 sps:$4 sm:$0xff]  }
 0x527   :  { %6237 = vmatprep.subr.bf16.mxu0 %v9071_v5  ;;  %v9150_v5 = vld [vmem:[%s12276_s8 + $0x400] ss:$8 sps:$4 sm:$0xff]  }
 0x528   :  { %5951 = vmatpush1.bf16.msra.mxu1 %v9066_v6  ;;  %v2686_v6 = vcombine.high %v11334_v47, %v11334_v47 }
 0x529   :  { %5952 = vmatprep.subr.bf16.mxu1 %v9074_v18  ;;  %v2713_v18 = vpack.c.bf16 %v11122_v3, %v11122_v3  ;;  %v9163_v3 = vld [vmem:[%s12276_s8 + $0xb14] ss:$8 sps:$4 sm:$0xff]  }
 0x52a   :  { %6238 = vmatpush1.bf16.msra.mxu0 %v9069_v9  ;;  %v9160_v9 = vld [vmem:[%s12276_s8 + $0x414] ss:$8 sps:$4 sm:$0xff]  }
 0x52b   :  { %6239 = vmatprep.subr.bf16.mxu0 %v9077_v4  ;;  %v2716_v4 = vpack.c.bf16 %v2679_v60, %v2679_v60  ;;  %v9238_v60 = vld [vmem:[%s12276_s8 + $0x4e4] ss:$8 sps:$4 sm:$0xff]  }
 0x52c   :  { %5953 = vmatpush1.bf16.msra.mxu1 %v9072_v12  ;;  %v9154_v12 = vld [vmem:[%s12276_s8 + $0xb00] ss:$8 sps:$4 sm:$0xff]  }
 0x52d   :  { %5954 = vmatprep.subr.bf16.mxu1 %v9080_v13  ;;  %v2727_v13 = vpack.c.bf16 %v11130_v61, %v11130_v61  ;;  %v9161_v61 = vld [vmem:[%s12276_s8 + $0xb10] ss:$8 sps:$4 sm:$0xff]  }
 0x52e   :  { %6240 = vmatpush1.bf16.msra.mxu0 %v9075_v15  ;;  %v2730_v15 = vpack.c.bf16 %v2686_v6, %v2686_v6  ;;  %v9236_v6 = vld [vmem:[%s12276_s8 + $0x4e0] ss:$8 sps:$4 sm:$0xff]  }
 0x52f   :  { %6241 = vmatprep.subr.bf16.mxu0 %v9083_v28  ;;  %v9158_v28 = vld [vmem:[%s12276_s8 + $0x410] ss:$8 sps:$4 sm:$0xff]  }
 0x530   :  { %5955 = vmatpush1.bf16.msra.mxu1 %v9078_v48  ;;  %v9166_v48 = vld [vmem:[%s12276_s8 + $0x424] ss:$8 sps:$4 sm:$0xff]  }
 0x531   :  { %5956 = vmatprep.subr.bf16.mxu1 %v9086_v45  ;;  %v9169_v45 = vld [vmem:[%s12276_s8 + $0xb24] ss:$8 sps:$4 sm:$0xff]  }
 0x532   :  { %6242 = vmatpush1.bf16.msra.mxu0 %v9081_v55  ;;  %v9164_v55 = vld [vmem:[%s12276_s8 + $0x420] ss:$8 sps:$4 sm:$0xff]  }
 0x533   :  { %6243 = vmatprep.subr.bf16.mxu0 %v9089_v46  ;;  %v9172_v46 = vld [vmem:[%s12276_s8 + $0x434] ss:$8 sps:$4 sm:$0xff]  }
 0x534   :  { %5957 = vmatpush1.bf16.msra.mxu1 %v9084_v40  ;;  %v9167_v40 = vld [vmem:[%s12276_s8 + $0xb20] ss:$8 sps:$4 sm:$0xff]  }
 0x535   :  { %5958 = vmatprep.subr.bf16.mxu1 %v9092_v11  ;;  %v9175_v11 = vld [vmem:[%s12276_s8 + $0xb34] ss:$8 sps:$4 sm:$0xff]  }
 0x536   :  { %6244 = vmatpush1.bf16.msra.mxu0 %v9087_v37  ;;  %v9170_v37 = vld [vmem:[%s12276_s8 + $0x430] ss:$8 sps:$4 sm:$0xff]  }
 0x537   :  { %6245 = vmatprep.subr.bf16.mxu0 %v9095_v17  ;;  %v9178_v17 = vld [vmem:[%s12276_s8 + $0x444] ss:$8 sps:$4 sm:$0xff]  }
 0x538   :  { %5959 = vmatpush1.bf16.msra.mxu1 %v9090_v58  ;;  %v9173_v58 = vld [vmem:[%s12276_s8 + $0xb30] ss:$8 sps:$4 sm:$0xff]  }
 0x539   :  { %5960 = vmatprep.subr.bf16.mxu1 %v9098_v49  ;;  %v9181_v49 = vld [vmem:[%s12276_s8 + $0xb44] ss:$8 sps:$4 sm:$0xff]  }
 0x53a   :  { %6246 = vmatpush1.bf16.msra.mxu0 %v9093_v24  ;;  %v9176_v24 = vld [vmem:[%s12276_s8 + $0x440] ss:$8 sps:$4 sm:$0xff]  }
 0x53b   :  { %6247 = vmatprep.subr.bf16.mxu0 %v9101_v21  ;;  %v9184_v21 = vld [vmem:[%s12276_s8 + $0x454] ss:$8 sps:$4 sm:$0xff]  }
 0x53c   :  { %5961 = vmatpush1.bf16.msra.mxu1 %v9096_v51  ;;  %v9179_v51 = vld [vmem:[%s12276_s8 + $0xb40] ss:$8 sps:$4 sm:$0xff]  }
 0x53d   :  { %5962 = vmatprep.subr.bf16.mxu1 %v9104_v29  ;;  %v9187_v29 = vld [vmem:[%s12276_s8 + $0xb54] ss:$8 sps:$4 sm:$0xff]  }
 0x53e   :  { %6248 = vmatpush1.bf16.msra.mxu0 %v9099_v8  ;;  %v9182_v8 = vld [vmem:[%s12276_s8 + $0x450] ss:$8 sps:$4 sm:$0xff]  }
 0x53f   :  { %6249 = vmatprep.subr.bf16.mxu0 %v9107_v23  ;;  %v9190_v23 = vld [vmem:[%s12276_s8 + $0x464] ss:$8 sps:$4 sm:$0xff]  }
 0x540   :  { %5963 = vmatpush1.bf16.msra.mxu1 %v9102_v25  ;;  %v9185_v25 = vld [vmem:[%s12276_s8 + $0xb50] ss:$8 sps:$4 sm:$0xff]  }
 0x541   :  { %5964 = vmatprep.subr.bf16.mxu1 %v9110_v7  ;;  %v9193_v7 = vld [vmem:[%s12276_s8 + $0xb64] ss:$8 sps:$4 sm:$0xff]  }
 0x542   :  { %6250 = vmatpush1.bf16.msra.mxu0 %v9105_v26  ;;  %v9188_v26 = vld [vmem:[%s12276_s8 + $0x460] ss:$8 sps:$4 sm:$0xff]  }
 0x543   :  { %6251 = vmatprep.subr.bf16.mxu0 %v9113_v27  ;;  %v9196_v27 = vld [vmem:[%s12276_s8 + $0x474] ss:$8 sps:$4 sm:$0xff]  }
 0x544   :  { %5965 = vmatpush1.bf16.msra.mxu1 %v9108_v0  ;;  %v9191_v0 = vld [vmem:[%s12276_s8 + $0xb60] ss:$8 sps:$4 sm:$0xff]  }
 0x545   :  { %5966 = vmatprep.subr.bf16.mxu1 %v9116_v16  ;;  %v9199_v16 = vld [vmem:[%s12276_s8 + $0xb74] ss:$8 sps:$4 sm:$0xff]  }
 0x546   :  { %6252 = vmatpush1.bf16.msra.mxu0 %v9111_v19  ;;  %v9194_v19 = vld [vmem:[%s12276_s8 + $0x470] ss:$8 sps:$4 sm:$0xff]  }
 0x547   :  { %6253 = vmatprep.subr.bf16.mxu0 %v9119_v14  ;;  %v9202_v14 = vld [vmem:[%s12276_s8 + $0x484] ss:$8 sps:$4 sm:$0xff]  }
 0x548   :  { %5967 = vmatpush1.bf16.msra.mxu1 %v9114_v43  ;;  %v9197_v43 = vld [vmem:[%s12276_s8 + $0xb70] ss:$8 sps:$4 sm:$0xff]  }
 0x549   :  { %5968 = vmatprep.subr.bf16.mxu1 %v9122_v56  ;;  %v9205_v56 = vld [vmem:[%s12276_s8 + $0xb84] ss:$8 sps:$4 sm:$0xff]  }
 0x54a   :  { %6254 = vmatpush1.bf16.msra.mxu0 %v9117_v39  ;;  %v9200_v39 = vld [vmem:[%s12276_s8 + $0x480] ss:$8 sps:$4 sm:$0xff]  }
 0x54b   :  { %6255 = vmatprep.subr.bf16.mxu0 %v9125_v54  ;;  %v9208_v54 = vld [vmem:[%s12276_s8 + $0x494] ss:$8 sps:$4 sm:$0xff]  }
 0x54c   :  { %5969 = vmatpush1.bf16.msra.mxu1 %v9120_v62  ;;  %v9203_v62 = vld [vmem:[%s12276_s8 + $0xb80] ss:$8 sps:$4 sm:$0xff]  }
 0x54d   :  { %5970 = vmatprep.subr.bf16.mxu1 %v9128_v53  ;;  %v9211_v53 = vld [vmem:[%s12276_s8 + $0xb94] ss:$8 sps:$4 sm:$0xff]  }
 0x54e   :  { %6256 = vmatpush1.bf16.msra.mxu0 %v9123_v63  ;;  %v9206_v63 = vld [vmem:[%s12276_s8 + $0x490] ss:$8 sps:$4 sm:$0xff]  }
 0x54f   :  { %6257 = vmatprep.subr.bf16.mxu0 %v9131_v41  ;;  %v9214_v41 = vld [vmem:[%s12276_s8 + $0x4a4] ss:$8 sps:$4 sm:$0xff]  }
 0x550   :  { %5971 = vmatpush1.bf16.msra.mxu1 %v9126_v1  ;;  %v9209_v1 = vld [vmem:[%s12276_s8 + $0xb90] ss:$8 sps:$4 sm:$0xff]  }
 0x551   :  { %5972 = vmatprep.subr.bf16.mxu1 %v9134_v2  ;;  %v9217_v2 = vld [vmem:[%s12276_s8 + $0xba4] ss:$8 sps:$4 sm:$0xff]  }
 0x552   :  { %6258 = vmatpush1.bf16.msra.mxu0 %v9129_v57  ;;  %v9212_v57 = vld [vmem:[%s12276_s8 + $0x4a0] ss:$8 sps:$4 sm:$0xff]  }
 0x553   :  { %6259 = vmatprep.subr.bf16.mxu0 %v9137_v22  ;;  %v9220_v22 = vld [vmem:[%s12276_s8 + $0x4b4] ss:$8 sps:$4 sm:$0xff]  }
 0x554   :  { %5973 = vmatpush1.bf16.msra.mxu1 %v9132_v30  ;;  %v9215_v30 = vld [vmem:[%s12276_s8 + $0xba0] ss:$8 sps:$4 sm:$0xff]  }
 0x555   :  { %5974 = vmatprep.subr.bf16.mxu1 %v9140_v31  ;;  %v9223_v31 = vld [vmem:[%s12276_s8 + $0xbb4] ss:$8 sps:$4 sm:$0xff]  }
 0x556   :  { %6260 = vmatpush1.bf16.msra.mxu0 %v9135_v34  ;;  %v9218_v34 = vld [vmem:[%s12276_s8 + $0x4b0] ss:$8 sps:$4 sm:$0xff]  }
 0x557   :  { %6261 = vmatprep.subr.bf16.mxu0 %v9143_v32  ;;  %v9226_v32 = vld [vmem:[%s12276_s8 + $0x4c4] ss:$8 sps:$4 sm:$0xff]  }
 0x558   :  { %5975 = vmatpush1.bf16.msra.mxu1 %v9138_v33  ;;  %v9221_v33 = vld [vmem:[%s12276_s8 + $0xbb0] ss:$8 sps:$4 sm:$0xff]  }
 0x559   :  { %5976 = vmatprep.subr.bf16.mxu1 %v9146_v42  ;;  %v9229_v42 = vld [vmem:[%s12276_s8 + $0xbc4] ss:$8 sps:$4 sm:$0xff]  }
 0x55a   :  { %6262 = vmatpush1.bf16.msra.mxu0 %v9141_v50  ;;  %v9224_v50 = vld [vmem:[%s12276_s8 + $0x4c0] ss:$8 sps:$4 sm:$0xff]  }
 0x55b   :  { %6263 = vmatprep.subr.bf16.mxu0 %v9149_v44  ;;  %v9232_v44 = vld [vmem:[%s12276_s8 + $0x4d4] ss:$8 sps:$4 sm:$0xff]  }
 0x55c   :  { %5977 = vmatpush1.bf16.msra.mxu1 %v9144_v52  ;;  %v9227_v52 = vld [vmem:[%s12276_s8 + $0xbc0] ss:$8 sps:$4 sm:$0xff]  }
 0x55d   :  { %5987 = vmatprep.subr.bf16.mxu1 %v9152_v35  ;;  %v9235_v35 = vld [vmem:[%s12276_s8 + $0xbd4] ss:$8 sps:$4 sm:$0xff]  }
 0x55e   :  { %6264 = vmatpush1.bf16.msra.mxu0 %v9147_v36  ;;  %v9230_v36 = vld [vmem:[%s12276_s8 + $0x4d0] ss:$8 sps:$4 sm:$0xff]  }
 0x55f   :  { %5979 = vmatmul.mubr.bf16.vlgmr.msra.gmra.mrb[32].mxu1 %v2713_v18  ;;  %6274 = vmatprep.subr.bf16.mxu0 %v9156_v38  ;;  %v9233_v38 = vld [vmem:[%s12276_s8 + $0xbd0] ss:$8 sps:$4 sm:$0xff]   ;;  %v9244_v18 = vld [vmem:[%s12276_s8 + $0x4f4] ss:$8 sps:$4 sm:$0xff]  }
 0x560   :  { %5988 = vmatpush1.bf16.msra.mxu1 %v9150_v5  ;;  %6019 = vmatprep.mubr.bf16.mxu1 %v2716_v4  ;;  %v9241_v5 = vld [vmem:[%s12276_s8 + $0xbe4] ss:$8 sps:$4 sm:$0xff]   ;;  %v9247_v4 = vld [vmem:[%s12276_s8 + $0xbf4] ss:$8 sps:$4 sm:$0xff]  }
 0x561   :  { %6266 = vmatmul.mubr.bf16.vlgmr.msra.gmra.mrb[32].mxu0 %v2727_v13  ;;  %5989 = vmatprep.subr.bf16.mxu1 %v9160_v9  ;;  %v9239_v9 = vld [vmem:[%s12276_s8 + $0xbe0] ss:$8 sps:$4 sm:$0xff]   ;;  %v9242_v13 = vld [vmem:[%s12276_s8 + $0x4f0] ss:$8 sps:$4 sm:$0xff]  }
 0x562   :  { %6275 = vmatpush1.bf16.msra.mxu0 %v9154_v12  ;;  %6306 = vmatprep.mubr.bf16.mxu0 %v2730_v15  ;;  %v11530_v12 = vld [vmem:[#allocation2 + $0x28] sm:$0xff]  ;;  %v11538_v15 = vld [vmem:[#allocation2 + $0x60] sm:$0xff] }
 0x563   :  { %6276 = vmatprep.subr.bf16.mxu0 %v9163_v3  ;;  %v9250_v3 = vld [vmem:[%s12276_s8 + $0x504] ss:$8 sps:$4 sm:$0xff]  }
 0x564   :  { %5990 = vmatpush1.bf16.msra.mxu1 %v9158_v28  ;;  %v9245_v28 = vld [vmem:[%s12276_s8 + $0xbf0] ss:$8 sps:$4 sm:$0xff]  }
 0x565   :  { %5991 = vmatprep.subr.bf16.mxu1 %v9166_v48  ;;  %v2680_v48 = vcombine.high %v11530_v12, %v11530_v12 }
 0x566   :  { %6277 = vmatpush1.bf16.msra.mxu0 %v9161_v61  ;;  %v9254_v61 = vld [vmem:[%s12276_s8 + $0xc04] ss:$8 sps:$4 sm:$0xff]  }
 0x567   :  { %6278 = vmatprep.subr.bf16.mxu0 %v9169_v45  ;;  %v9248_v45 = vld [vmem:[%s12276_s8 + $0x500] ss:$8 sps:$4 sm:$0xff]  }
 0x568   :  { %5992 = vmatpush1.bf16.msra.mxu1 %v9164_v55  ;;  %v2687_v55 = vcombine.high %v11538_v15, %v11538_v15 }
 0x569   :  { %5993 = vmatprep.subr.bf16.mxu1 %v9172_v46  ;;  %v2715_v46 = vpack.c.bf16 %v11326_v59, %v11326_v59  ;;  %v9261_v59 = vld [vmem:[%s12276_s8 + $0xc14] ss:$8 sps:$4 sm:$0xff]  }
 0x56a   :  { %6279 = vmatpush1.bf16.msra.mxu0 %v9167_v40  ;;  %v9258_v40 = vld [vmem:[%s12276_s8 + $0x514] ss:$8 sps:$4 sm:$0xff]  }
 0x56b   :  { %6280 = vmatprep.subr.bf16.mxu0 %v9175_v11  ;;  %v2718_v11 = vpack.c.bf16 %v2680_v48, %v2680_v48  ;;  %v9336_v48 = vld [vmem:[%s12276_s8 + $0x5e4] ss:$8 sps:$4 sm:$0xff]  }
 0x56c   :  { %5994 = vmatpush1.bf16.msra.mxu1 %v9170_v37  ;;  %v9252_v37 = vld [vmem:[%s12276_s8 + $0xc00] ss:$8 sps:$4 sm:$0xff]  }
 0x56d   :  { %5995 = vmatprep.subr.bf16.mxu1 %v9178_v17  ;;  %v2729_v17 = vpack.c.bf16 %v11334_v47, %v11334_v47  ;;  %v9259_v47 = vld [vmem:[%s12276_s8 + $0xc10] ss:$8 sps:$4 sm:$0xff]  }
 0x56e   :  { %6281 = vmatpush1.bf16.msra.mxu0 %v9173_v58  ;;  %v2732_v58 = vpack.c.bf16 %v2687_v55, %v2687_v55  ;;  %v9334_v55 = vld [vmem:[%s12276_s8 + $0x5e0] ss:$8 sps:$4 sm:$0xff]  }
 0x56f   :  { %6282 = vmatprep.subr.bf16.mxu0 %v9181_v49  ;;  %v9256_v49 = vld [vmem:[%s12276_s8 + $0x510] ss:$8 sps:$4 sm:$0xff]  }
 0x570   :  { %5996 = vmatpush1.bf16.msra.mxu1 %v9176_v24  ;;  %v9264_v24 = vld [vmem:[%s12276_s8 + $0x524] ss:$8 sps:$4 sm:$0xff]  }
 0x571   :  { %5997 = vmatprep.subr.bf16.mxu1 %v9184_v21  ;;  %v9267_v21 = vld [vmem:[%s12276_s8 + $0xc24] ss:$8 sps:$4 sm:$0xff]  }
 0x572   :  { %6283 = vmatpush1.bf16.msra.mxu0 %v9179_v51  ;;  %v9262_v51 = vld [vmem:[%s12276_s8 + $0x520] ss:$8 sps:$4 sm:$0xff]  }
 0x573   :  { %6284 = vmatprep.subr.bf16.mxu0 %v9187_v29  ;;  %v9270_v29 = vld [vmem:[%s12276_s8 + $0x534] ss:$8 sps:$4 sm:$0xff]  }
 0x574   :  { %5998 = vmatpush1.bf16.msra.mxu1 %v9182_v8  ;;  %v9265_v8 = vld [vmem:[%s12276_s8 + $0xc20] ss:$8 sps:$4 sm:$0xff]  }
 0x575   :  { %5999 = vmatprep.subr.bf16.mxu1 %v9190_v23  ;;  %v9273_v23 = vld [vmem:[%s12276_s8 + $0xc34] ss:$8 sps:$4 sm:$0xff]  }
 0x576   :  { %6285 = vmatpush1.bf16.msra.mxu0 %v9185_v25  ;;  %v9268_v25 = vld [vmem:[%s12276_s8 + $0x530] ss:$8 sps:$4 sm:$0xff]  }
 0x577   :  { %6286 = vmatprep.subr.bf16.mxu0 %v9193_v7  ;;  %v9276_v7 = vld [vmem:[%s12276_s8 + $0x544] ss:$8 sps:$4 sm:$0xff]  }
 0x578   :  { %6000 = vmatpush1.bf16.msra.mxu1 %v9188_v26  ;;  %v9271_v26 = vld [vmem:[%s12276_s8 + $0xc30] ss:$8 sps:$4 sm:$0xff]  }
 0x579   :  { %6001 = vmatprep.subr.bf16.mxu1 %v9196_v27  ;;  %v9279_v27 = vld [vmem:[%s12276_s8 + $0xc44] ss:$8 sps:$4 sm:$0xff]  }
 0x57a   :  { %6287 = vmatpush1.bf16.msra.mxu0 %v9191_v0  ;;  %v9274_v0 = vld [vmem:[%s12276_s8 + $0x540] ss:$8 sps:$4 sm:$0xff]  }
 0x57b   :  { %6288 = vmatprep.subr.bf16.mxu0 %v9199_v16  ;;  %v9282_v16 = vld [vmem:[%s12276_s8 + $0x554] ss:$8 sps:$4 sm:$0xff]  }
 0x57c   :  { %6002 = vmatpush1.bf16.msra.mxu1 %v9194_v19  ;;  %v9277_v19 = vld [vmem:[%s12276_s8 + $0xc40] ss:$8 sps:$4 sm:$0xff]  }
 0x57d   :  { %6003 = vmatprep.subr.bf16.mxu1 %v9202_v14  ;;  %v9285_v14 = vld [vmem:[%s12276_s8 + $0xc54] ss:$8 sps:$4 sm:$0xff]  }
 0x57e   :  { %6289 = vmatpush1.bf16.msra.mxu0 %v9197_v43  ;;  %v9280_v43 = vld [vmem:[%s12276_s8 + $0x550] ss:$8 sps:$4 sm:$0xff]  }
 0x57f   :  { %6290 = vmatprep.subr.bf16.mxu0 %v9205_v56  ;;  %v9288_v56 = vld [vmem:[%s12276_s8 + $0x564] ss:$8 sps:$4 sm:$0xff]  }
 0x580   :  { %6004 = vmatpush1.bf16.msra.mxu1 %v9200_v39  ;;  %v9283_v39 = vld [vmem:[%s12276_s8 + $0xc50] ss:$8 sps:$4 sm:$0xff]  }
 0x581   :  { %6005 = vmatprep.subr.bf16.mxu1 %v9208_v54  ;;  %v9291_v54 = vld [vmem:[%s12276_s8 + $0xc64] ss:$8 sps:$4 sm:$0xff]  }
 0x582   :  { %6291 = vmatpush1.bf16.msra.mxu0 %v9203_v62  ;;  %v9286_v62 = vld [vmem:[%s12276_s8 + $0x560] ss:$8 sps:$4 sm:$0xff]  }
 0x583   :  { %6292 = vmatprep.subr.bf16.mxu0 %v9211_v53  ;;  %v9294_v53 = vld [vmem:[%s12276_s8 + $0x574] ss:$8 sps:$4 sm:$0xff]  }
 0x584   :  { %6006 = vmatpush1.bf16.msra.mxu1 %v9206_v63  ;;  %v9289_v63 = vld [vmem:[%s12276_s8 + $0xc60] ss:$8 sps:$4 sm:$0xff]  }
 0x585   :  { %6007 = vmatprep.subr.bf16.mxu1 %v9214_v41  ;;  %v9297_v41 = vld [vmem:[%s12276_s8 + $0xc74] ss:$8 sps:$4 sm:$0xff]  }
 0x586   :  { %6293 = vmatpush1.bf16.msra.mxu0 %v9209_v1  ;;  %v9292_v1 = vld [vmem:[%s12276_s8 + $0x570] ss:$8 sps:$4 sm:$0xff]  }
 0x587   :  { %6294 = vmatprep.subr.bf16.mxu0 %v9217_v2  ;;  %v9300_v2 = vld [vmem:[%s12276_s8 + $0x584] ss:$8 sps:$4 sm:$0xff]  }
 0x588   :  { %6008 = vmatpush1.bf16.msra.mxu1 %v9212_v57  ;;  %v9295_v57 = vld [vmem:[%s12276_s8 + $0xc70] ss:$8 sps:$4 sm:$0xff]  }
 0x589   :  { %6009 = vmatprep.subr.bf16.mxu1 %v9220_v22  ;;  %v9303_v22 = vld [vmem:[%s12276_s8 + $0xc84] ss:$8 sps:$4 sm:$0xff]  }
 0x58a   :  { %6295 = vmatpush1.bf16.msra.mxu0 %v9215_v30  ;;  %v9298_v30 = vld [vmem:[%s12276_s8 + $0x580] ss:$8 sps:$4 sm:$0xff]  }
 0x58b   :  { %6296 = vmatprep.subr.bf16.mxu0 %v9223_v31  ;;  %v9306_v31 = vld [vmem:[%s12276_s8 + $0x594] ss:$8 sps:$4 sm:$0xff]  }
 0x58c   :  { %6010 = vmatpush1.bf16.msra.mxu1 %v9218_v34  ;;  %v9301_v34 = vld [vmem:[%s12276_s8 + $0xc80] ss:$8 sps:$4 sm:$0xff]  }
 0x58d   :  { %6011 = vmatprep.subr.bf16.mxu1 %v9226_v32  ;;  %v9309_v32 = vld [vmem:[%s12276_s8 + $0xc94] ss:$8 sps:$4 sm:$0xff]  }
 0x58e   :  { %6297 = vmatpush1.bf16.msra.mxu0 %v9221_v33  ;;  %v9304_v33 = vld [vmem:[%s12276_s8 + $0x590] ss:$8 sps:$4 sm:$0xff]  }
 0x58f   :  { %6298 = vmatprep.subr.bf16.mxu0 %v9229_v42  ;;  %v9312_v42 = vld [vmem:[%s12276_s8 + $0x5a4] ss:$8 sps:$4 sm:$0xff]  }
 0x590   :  { %6012 = vmatpush1.bf16.msra.mxu1 %v9224_v50  ;;  %v9307_v50 = vld [vmem:[%s12276_s8 + $0xc90] ss:$8 sps:$4 sm:$0xff]  }
 0x591   :  { %6013 = vmatprep.subr.bf16.mxu1 %v9232_v44  ;;  %v9315_v44 = vld [vmem:[%s12276_s8 + $0xca4] ss:$8 sps:$4 sm:$0xff]  }
 0x592   :  { %6299 = vmatpush1.bf16.msra.mxu0 %v9227_v52  ;;  %v9310_v52 = vld [vmem:[%s12276_s8 + $0x5a0] ss:$8 sps:$4 sm:$0xff]  }
 0x593   :  { %6300 = vmatprep.subr.bf16.mxu0 %v9235_v35  ;;  %v9318_v35 = vld [vmem:[%s12276_s8 + $0x5b4] ss:$8 sps:$4 sm:$0xff]  }
 0x594   :  { %6014 = vmatpush1.bf16.msra.mxu1 %v9230_v36  ;;  %v9313_v36 = vld [vmem:[%s12276_s8 + $0xca0] ss:$8 sps:$4 sm:$0xff]  }
 0x595   :  { %6015 = vmatprep.subr.bf16.mxu1 %v9238_v60  ;;  %v9321_v60 = vld [vmem:[%s12276_s8 + $0xcb4] ss:$8 sps:$4 sm:$0xff]  }
 0x596   :  { %6301 = vmatpush1.bf16.msra.mxu0 %v9233_v38  ;;  %v9316_v38 = vld [vmem:[%s12276_s8 + $0x5b0] ss:$8 sps:$4 sm:$0xff]  }
 0x597   :  { %6302 = vmatprep.subr.bf16.mxu0 %v9241_v5  ;;  %v9324_v5 = vld [vmem:[%s12276_s8 + $0x5c4] ss:$8 sps:$4 sm:$0xff]  }
 0x598   :  { %6016 = vmatpush1.bf16.msra.mxu1 %v9236_v6  ;;  %v9319_v6 = vld [vmem:[%s12276_s8 + $0xcb0] ss:$8 sps:$4 sm:$0xff]  }
 0x599   :  { %6017 = vmatprep.subr.bf16.mxu1 %v9244_v18  ;;  %v9327_v18 = vld [vmem:[%s12276_s8 + $0xcc4] ss:$8 sps:$4 sm:$0xff]  }
 0x59a   :  { %6303 = vmatpush1.bf16.msra.mxu0 %v9239_v9  ;;  %v9322_v9 = vld [vmem:[%s12276_s8 + $0x5c0] ss:$8 sps:$4 sm:$0xff]  }
 0x59b   :  { %6304 = vmatprep.subr.bf16.mxu0 %v9247_v4  ;;  %v9330_v4 = vld [vmem:[%s12276_s8 + $0x5d4] ss:$8 sps:$4 sm:$0xff]  }
 0x59c   :  { %6018 = vmatpush1.bf16.msra.mxu1 %v9242_v13  ;;  %v9325_v13 = vld [vmem:[%s12276_s8 + $0xcc0] ss:$8 sps:$4 sm:$0xff]  }
 0x59d   :  { %6028 = vmatprep.subr.bf16.mxu1 %v9250_v3  ;;  %v9333_v3 = vld [vmem:[%s12276_s8 + $0xcd4] ss:$8 sps:$4 sm:$0xff]  }
 0x59e   :  { %6305 = vmatpush1.bf16.msra.mxu0 %v9245_v28  ;;  %v9328_v28 = vld [vmem:[%s12276_s8 + $0x5d0] ss:$8 sps:$4 sm:$0xff]  }
 0x59f   :  { %6020 = vmatmul.mubr.bf16.vlgmr.msra.gmra.mrb[32].mxu1 %v2715_v46  ;;  %6315 = vmatprep.subr.bf16.mxu0 %v9254_v61  ;;  %v9331_v61 = vld [vmem:[%s12276_s8 + $0xcd0] ss:$8 sps:$4 sm:$0xff]   ;;  %v9342_v46 = vld [vmem:[%s12276_s8 + $0x5f4] ss:$8 sps:$4 sm:$0xff]  }
 0x5a0   :  { %6029 = vmatpush1.bf16.msra.mxu1 %v9248_v45  ;;  %6060 = vmatprep.mubr.bf16.mxu1 %v2718_v11  ;;  %v9339_v45 = vld [vmem:[%s12276_s8 + $0xce4] ss:$8 sps:$4 sm:$0xff]   ;;  %v9345_v11 = vld [vmem:[%s12276_s8 + $0xcf4] ss:$8 sps:$4 sm:$0xff]  }
 0x5a1   :  { %6307 = vmatmul.mubr.bf16.vlgmr.msra.gmra.mrb[32].mxu0 %v2729_v17  ;;  %6030 = vmatprep.subr.bf16.mxu1 %v9258_v40  ;;  %v9337_v40 = vld [vmem:[%s12276_s8 + $0xce0] ss:$8 sps:$4 sm:$0xff]   ;;  %v9340_v17 = vld [vmem:[%s12276_s8 + $0x5f0] ss:$8 sps:$4 sm:$0xff]  }
 0x5a2   :  { %6316 = vmatpush1.bf16.msra.mxu0 %v9252_v37  ;;  %6347 = vmatprep.mubr.bf16.mxu0 %v2732_v58  ;;  %v11734_v37 = vld [vmem:[#allocation2 + $0x30] sm:$0xff]  ;;  %v11742_v58 = vld [vmem:[#allocation2 + $0x68] sm:$0xff] }
 0x5a3   :  { %6317 = vmatprep.subr.bf16.mxu0 %v9261_v59  ;;  %v9348_v59 = vld [vmem:[%s12276_s8 + $0x604] ss:$8 sps:$4 sm:$0xff]  }
 0x5a4   :  { %6031 = vmatpush1.bf16.msra.mxu1 %v9256_v49  ;;  %v9343_v49 = vld [vmem:[%s12276_s8 + $0xcf0] ss:$8 sps:$4 sm:$0xff]  }
 0x5a5   :  { %6032 = vmatprep.subr.bf16.mxu1 %v9264_v24  ;;  %v2681_v24 = vcombine.high %v11734_v37, %v11734_v37 }
 0x5a6   :  { %6318 = vmatpush1.bf16.msra.mxu0 %v9259_v47  ;;  %v9352_v47 = vld [vmem:[%s12276_s8 + $0xd04] ss:$8 sps:$4 sm:$0xff]  }
 0x5a7   :  { %6319 = vmatprep.subr.bf16.mxu0 %v9267_v21  ;;  %v9346_v21 = vld [vmem:[%s12276_s8 + $0x600] ss:$8 sps:$4 sm:$0xff]  }
 0x5a8   :  { %6033 = vmatpush1.bf16.msra.mxu1 %v9262_v51  ;;  %v2688_v51 = vcombine.high %v11742_v58, %v11742_v58 }
 0x5a9   :  { %6034 = vmatprep.subr.bf16.mxu1 %v9270_v29  ;;  %v2717_v29 = vpack.c.bf16 %v11530_v12, %v11530_v12  ;;  %v9359_v12 = vld [vmem:[%s12276_s8 + $0xd14] ss:$8 sps:$4 sm:$0xff]  }
 0x5aa   :  { %6320 = vmatpush1.bf16.msra.mxu0 %v9265_v8  ;;  %v9356_v8 = vld [vmem:[%s12276_s8 + $0x614] ss:$8 sps:$4 sm:$0xff]  }
 0x5ab   :  { %6321 = vmatprep.subr.bf16.mxu0 %v9273_v23  ;;  %v2720_v23 = vpack.c.bf16 %v2681_v24, %v2681_v24  ;;  %v9434_v24 = vld [vmem:[%s12276_s8 + $0x6e4] ss:$8 sps:$4 sm:$0xff]  }
 0x5ac   :  { %6035 = vmatpush1.bf16.msra.mxu1 %v9268_v25  ;;  %v9350_v25 = vld [vmem:[%s12276_s8 + $0xd00] ss:$8 sps:$4 sm:$0xff]  }
 0x5ad   :  { %6036 = vmatprep.subr.bf16.mxu1 %v9276_v7  ;;  %v2731_v7 = vpack.c.bf16 %v11538_v15, %v11538_v15  ;;  %v9357_v15 = vld [vmem:[%s12276_s8 + $0xd10] ss:$8 sps:$4 sm:$0xff]  }
 0x5ae   :  { %6322 = vmatpush1.bf16.msra.mxu0 %v9271_v26  ;;  %v2734_v26 = vpack.c.bf16 %v2688_v51, %v2688_v51  ;;  %v9432_v51 = vld [vmem:[%s12276_s8 + $0x6e0] ss:$8 sps:$4 sm:$0xff]  }
 0x5af   :  { %6323 = vmatprep.subr.bf16.mxu0 %v9279_v27  ;;  %v9354_v27 = vld [vmem:[%s12276_s8 + $0x610] ss:$8 sps:$4 sm:$0xff]  }
 0x5b0   :  { %6037 = vmatpush1.bf16.msra.mxu1 %v9274_v0  ;;  %v9362_v0 = vld [vmem:[%s12276_s8 + $0x624] ss:$8 sps:$4 sm:$0xff]  }
 0x5b1   :  { %6038 = vmatprep.subr.bf16.mxu1 %v9282_v16  ;;  %v9365_v16 = vld [vmem:[%s12276_s8 + $0xd24] ss:$8 sps:$4 sm:$0xff]  }
 0x5b2   :  { %6324 = vmatpush1.bf16.msra.mxu0 %v9277_v19  ;;  %v9360_v19 = vld [vmem:[%s12276_s8 + $0x620] ss:$8 sps:$4 sm:$0xff]  }
 0x5b3   :  { %6325 = vmatprep.subr.bf16.mxu0 %v9285_v14  ;;  %v9368_v14 = vld [vmem:[%s12276_s8 + $0x634] ss:$8 sps:$4 sm:$0xff]  }
 0x5b4   :  { %6039 = vmatpush1.bf16.msra.mxu1 %v9280_v43  ;;  %v9363_v43 = vld [vmem:[%s12276_s8 + $0xd20] ss:$8 sps:$4 sm:$0xff]  }
 0x5b5   :  { %6040 = vmatprep.subr.bf16.mxu1 %v9288_v56  ;;  %v9371_v56 = vld [vmem:[%s12276_s8 + $0xd34] ss:$8 sps:$4 sm:$0xff]  }
 0x5b6   :  { %6326 = vmatpush1.bf16.msra.mxu0 %v9283_v39  ;;  %v9366_v39 = vld [vmem:[%s12276_s8 + $0x630] ss:$8 sps:$4 sm:$0xff]  }
 0x5b7   :  { %6327 = vmatprep.subr.bf16.mxu0 %v9291_v54  ;;  %v9374_v54 = vld [vmem:[%s12276_s8 + $0x644] ss:$8 sps:$4 sm:$0xff]  }
 0x5b8   :  { %6041 = vmatpush1.bf16.msra.mxu1 %v9286_v62  ;;  %v9369_v62 = vld [vmem:[%s12276_s8 + $0xd30] ss:$8 sps:$4 sm:$0xff]  }
 0x5b9   :  { %6042 = vmatprep.subr.bf16.mxu1 %v9294_v53  ;;  %v9377_v53 = vld [vmem:[%s12276_s8 + $0xd44] ss:$8 sps:$4 sm:$0xff]  }
 0x5ba   :  { %6328 = vmatpush1.bf16.msra.mxu0 %v9289_v63  ;;  %v9372_v63 = vld [vmem:[%s12276_s8 + $0x640] ss:$8 sps:$4 sm:$0xff]  }
 0x5bb   :  { %6329 = vmatprep.subr.bf16.mxu0 %v9297_v41  ;;  %v9380_v41 = vld [vmem:[%s12276_s8 + $0x654] ss:$8 sps:$4 sm:$0xff]  }
 0x5bc   :  { %6043 = vmatpush1.bf16.msra.mxu1 %v9292_v1  ;;  %v9375_v1 = vld [vmem:[%s12276_s8 + $0xd40] ss:$8 sps:$4 sm:$0xff]  }
 0x5bd   :  { %6044 = vmatprep.subr.bf16.mxu1 %v9300_v2  ;;  %v9383_v2 = vld [vmem:[%s12276_s8 + $0xd54] ss:$8 sps:$4 sm:$0xff]  }
 0x5be   :  { %6330 = vmatpush1.bf16.msra.mxu0 %v9295_v57  ;;  %v9378_v57 = vld [vmem:[%s12276_s8 + $0x650] ss:$8 sps:$4 sm:$0xff]  }
 0x5bf   :  { %6331 = vmatprep.subr.bf16.mxu0 %v9303_v22  ;;  %v9386_v22 = vld [vmem:[%s12276_s8 + $0x664] ss:$8 sps:$4 sm:$0xff]  }
 0x5c0   :  { %6045 = vmatpush1.bf16.msra.mxu1 %v9298_v30  ;;  %v9381_v30 = vld [vmem:[%s12276_s8 + $0xd50] ss:$8 sps:$4 sm:$0xff]  }
 0x5c1   :  { %6046 = vmatprep.subr.bf16.mxu1 %v9306_v31  ;;  %v9389_v31 = vld [vmem:[%s12276_s8 + $0xd64] ss:$8 sps:$4 sm:$0xff]  }
 0x5c2   :  { %6332 = vmatpush1.bf16.msra.mxu0 %v9301_v34  ;;  %v9384_v34 = vld [vmem:[%s12276_s8 + $0x660] ss:$8 sps:$4 sm:$0xff]  }
 0x5c3   :  { %6333 = vmatprep.subr.bf16.mxu0 %v9309_v32  ;;  %v9392_v32 = vld [vmem:[%s12276_s8 + $0x674] ss:$8 sps:$4 sm:$0xff]  }
 0x5c4   :  { %6047 = vmatpush1.bf16.msra.mxu1 %v9304_v33  ;;  %v9387_v33 = vld [vmem:[%s12276_s8 + $0xd60] ss:$8 sps:$4 sm:$0xff]  }
 0x5c5   :  { %6048 = vmatprep.subr.bf16.mxu1 %v9312_v42  ;;  %v9395_v42 = vld [vmem:[%s12276_s8 + $0xd74] ss:$8 sps:$4 sm:$0xff]  }
 0x5c6   :  { %6334 = vmatpush1.bf16.msra.mxu0 %v9307_v50  ;;  %v9390_v50 = vld [vmem:[%s12276_s8 + $0x670] ss:$8 sps:$4 sm:$0xff]  }
 0x5c7   :  { %6335 = vmatprep.subr.bf16.mxu0 %v9315_v44  ;;  %v9398_v44 = vld [vmem:[%s12276_s8 + $0x684] ss:$8 sps:$4 sm:$0xff]  }
 0x5c8   :  { %6049 = vmatpush1.bf16.msra.mxu1 %v9310_v52  ;;  %v9393_v52 = vld [vmem:[%s12276_s8 + $0xd70] ss:$8 sps:$4 sm:$0xff]  }
 0x5c9   :  { %6050 = vmatprep.subr.bf16.mxu1 %v9318_v35  ;;  %v9401_v35 = vld [vmem:[%s12276_s8 + $0xd84] ss:$8 sps:$4 sm:$0xff]  }
 0x5ca   :  { %6336 = vmatpush1.bf16.msra.mxu0 %v9313_v36  ;;  %v9396_v36 = vld [vmem:[%s12276_s8 + $0x680] ss:$8 sps:$4 sm:$0xff]  }
 0x5cb   :  { %6337 = vmatprep.subr.bf16.mxu0 %v9321_v60  ;;  %v9404_v60 = vld [vmem:[%s12276_s8 + $0x694] ss:$8 sps:$4 sm:$0xff]  }
 0x5cc   :  { %6051 = vmatpush1.bf16.msra.mxu1 %v9316_v38  ;;  %v9399_v38 = vld [vmem:[%s12276_s8 + $0xd80] ss:$8 sps:$4 sm:$0xff]  }
 0x5cd   :  { %6052 = vmatprep.subr.bf16.mxu1 %v9324_v5  ;;  %v9407_v5 = vld [vmem:[%s12276_s8 + $0xd94] ss:$8 sps:$4 sm:$0xff]  }
 0x5ce   :  { %6338 = vmatpush1.bf16.msra.mxu0 %v9319_v6  ;;  %v9402_v6 = vld [vmem:[%s12276_s8 + $0x690] ss:$8 sps:$4 sm:$0xff]  }
 0x5cf   :  { %6339 = vmatprep.subr.bf16.mxu0 %v9327_v18  ;;  %v9410_v18 = vld [vmem:[%s12276_s8 + $0x6a4] ss:$8 sps:$4 sm:$0xff]  }
 0x5d0   :  { %6053 = vmatpush1.bf16.msra.mxu1 %v9322_v9  ;;  %v9405_v9 = vld [vmem:[%s12276_s8 + $0xd90] ss:$8 sps:$4 sm:$0xff]  }
 0x5d1   :  { %6054 = vmatprep.subr.bf16.mxu1 %v9330_v4  ;;  %v9413_v4 = vld [vmem:[%s12276_s8 + $0xda4] ss:$8 sps:$4 sm:$0xff]  }
 0x5d2   :  { %6340 = vmatpush1.bf16.msra.mxu0 %v9325_v13  ;;  %v9408_v13 = vld [vmem:[%s12276_s8 + $0x6a0] ss:$8 sps:$4 sm:$0xff]  }
 0x5d3   :  { %6341 = vmatprep.subr.bf16.mxu0 %v9333_v3  ;;  %v9416_v3 = vld [vmem:[%s12276_s8 + $0x6b4] ss:$8 sps:$4 sm:$0xff]  }
 0x5d4   :  { %6055 = vmatpush1.bf16.msra.mxu1 %v9328_v28  ;;  %v9411_v28 = vld [vmem:[%s12276_s8 + $0xda0] ss:$8 sps:$4 sm:$0xff]  }
 0x5d5   :  { %6056 = vmatprep.subr.bf16.mxu1 %v9336_v48  ;;  %v9419_v48 = vld [vmem:[%s12276_s8 + $0xdb4] ss:$8 sps:$4 sm:$0xff]  }
 0x5d6   :  { %6342 = vmatpush1.bf16.msra.mxu0 %v9331_v61  ;;  %v9414_v61 = vld [vmem:[%s12276_s8 + $0x6b0] ss:$8 sps:$4 sm:$0xff]  }
 0x5d7   :  { %6343 = vmatprep.subr.bf16.mxu0 %v9339_v45  ;;  %v9422_v45 = vld [vmem:[%s12276_s8 + $0x6c4] ss:$8 sps:$4 sm:$0xff]  }
 0x5d8   :  { %6057 = vmatpush1.bf16.msra.mxu1 %v9334_v55  ;;  %v9417_v55 = vld [vmem:[%s12276_s8 + $0xdb0] ss:$8 sps:$4 sm:$0xff]  }
 0x5d9   :  { %6058 = vmatprep.subr.bf16.mxu1 %v9342_v46  ;;  %v9425_v46 = vld [vmem:[%s12276_s8 + $0xdc4] ss:$8 sps:$4 sm:$0xff]  }
 0x5da   :  { %6344 = vmatpush1.bf16.msra.mxu0 %v9337_v40  ;;  %v9420_v40 = vld [vmem:[%s12276_s8 + $0x6c0] ss:$8 sps:$4 sm:$0xff]  }
 0x5db   :  { %6345 = vmatprep.subr.bf16.mxu0 %v9345_v11  ;;  %v9428_v11 = vld [vmem:[%s12276_s8 + $0x6d4] ss:$8 sps:$4 sm:$0xff]  }
 0x5dc   :  { %6059 = vmatpush1.bf16.msra.mxu1 %v9340_v17  ;;  %v9423_v17 = vld [vmem:[%s12276_s8 + $0xdc0] ss:$8 sps:$4 sm:$0xff]  }
 0x5dd   :  { %6069 = vmatprep.subr.bf16.mxu1 %v9348_v59  ;;  %v9431_v59 = vld [vmem:[%s12276_s8 + $0xdd4] ss:$8 sps:$4 sm:$0xff]  }
 0x5de   :  { %6346 = vmatpush1.bf16.msra.mxu0 %v9343_v49  ;;  %v9426_v49 = vld [vmem:[%s12276_s8 + $0x6d0] ss:$8 sps:$4 sm:$0xff]  }
 0x5df   :  { %6061 = vmatmul.mubr.bf16.vlgmr.msra.gmra.mrb[32].mxu1 %v2717_v29  ;;  %6356 = vmatprep.subr.bf16.mxu0 %v9352_v47  ;;  %v9429_v47 = vld [vmem:[%s12276_s8 + $0xdd0] ss:$8 sps:$4 sm:$0xff]   ;;  %v9440_v29 = vld [vmem:[%s12276_s8 + $0x6f4] ss:$8 sps:$4 sm:$0xff]  }
 0x5e0   :  { %6070 = vmatpush1.bf16.msra.mxu1 %v9346_v21  ;;  %6101 = vmatprep.mubr.bf16.mxu1 %v2720_v23  ;;  %v9437_v21 = vld [vmem:[%s12276_s8 + $0xde4] ss:$8 sps:$4 sm:$0xff]   ;;  %v9443_v23 = vld [vmem:[%s12276_s8 + $0xdf4] ss:$8 sps:$4 sm:$0xff]  }
 0x5e1   :  { %6348 = vmatmul.mubr.bf16.vlgmr.msra.gmra.mrb[32].mxu0 %v2731_v7  ;;  %6071 = vmatprep.subr.bf16.mxu1 %v9356_v8  ;;  %v9435_v8 = vld [vmem:[%s12276_s8 + $0xde0] ss:$8 sps:$4 sm:$0xff]   ;;  %v11941_v7 = vld [vmem:[#allocation2 + $0x70] sm:$0xff] }
 0x5e2   :  { %6357 = vmatpush1.bf16.msra.mxu0 %v9350_v25  ;;  %6388 = vmatprep.mubr.bf16.mxu0 %v2734_v26  ;;  %v9438_v25 = vld [vmem:[%s12276_s8 + $0x6f0] ss:$8 sps:$4 sm:$0xff]   ;;  %v9446_v26 = vld [vmem:[%s12276_s8 + $0xe04] ss:$8 sps:$4 sm:$0xff]  }
 0x5e3   :  { %6358 = vmatprep.subr.bf16.mxu0 %v9359_v12  ;;  %v9441_v12 = vld [vmem:[%s12276_s8 + $0xdf0] ss:$8 sps:$4 sm:$0xff]  }
 0x5e4   :  { %6072 = vmatpush1.bf16.msra.mxu1 %v9354_v27  ;;  %v2689_v27 = vcombine.high %v11941_v7, %v11941_v7 }
 0x5e5   :  { %6073 = vmatprep.subr.bf16.mxu1 %v9362_v0  ;;  %v2719_v0 = vpack.c.bf16 %v11734_v37, %v11734_v37  ;;  %v9448_v37 = vld [vmem:[%s12276_s8 + $0xe10] ss:$8 sps:$4 sm:$0xff]  }
 0x5e6   :  { %6359 = vmatpush1.bf16.msra.mxu0 %v9357_v15  ;;  %v9444_v15 = vld [vmem:[%s12276_s8 + $0xe00] ss:$8 sps:$4 sm:$0xff]  }
 0x5e7   :  { %6360 = vmatprep.subr.bf16.mxu0 %v9365_v16  ;;  %v2733_v16 = vpack.c.bf16 %v11742_v58, %v11742_v58  ;;  %v9451_v58 = vld [vmem:[%s12276_s8 + $0xe20] ss:$8 sps:$4 sm:$0xff]  }
 0x5e8   :  { %6074 = vmatpush1.bf16.msra.mxu1 %v9360_v19  ;;  %v9450_v19 = vld [vmem:[%s12276_s8 + $0xe14] ss:$8 sps:$4 sm:$0xff]  }
 0x5e9   :  { %6075 = vmatprep.subr.bf16.mxu1 %v9368_v14  ;;  %v2736_v14 = vpack.c.bf16 %v2689_v27, %v2689_v27 }
 0x5ea   :  { %6361 = vmatpush1.bf16.msra.mxu0 %v9363_v43  ;;  %v9453_v43 = vld [vmem:[%s12276_s8 + $0xe24] ss:$8 sps:$4 sm:$0xff]  }
 0x5eb   :  { %6362 = vmatprep.subr.bf16.mxu0 %v9371_v56  ;;  %v9456_v56 = vld [vmem:[%s12276_s8 + $0xe34] ss:$8 sps:$4 sm:$0xff]  }
 0x5ec   :  { %6076 = vmatpush1.bf16.msra.mxu1 %v9366_v39  ;;  %v9454_v39 = vld [vmem:[%s12276_s8 + $0xe30] ss:$8 sps:$4 sm:$0xff]  }
 0x5ed   :  { %6077 = vmatprep.subr.bf16.mxu1 %v9374_v54  ;;  %v9459_v54 = vld [vmem:[%s12276_s8 + $0xe44] ss:$8 sps:$4 sm:$0xff]  }
 0x5ee   :  { %6363 = vmatpush1.bf16.msra.mxu0 %v9369_v62  ;;  %v9457_v62 = vld [vmem:[%s12276_s8 + $0xe40] ss:$8 sps:$4 sm:$0xff]  }
 0x5ef   :  { %6364 = vmatprep.subr.bf16.mxu0 %v9377_v53  ;;  %v9462_v53 = vld [vmem:[%s12276_s8 + $0xe54] ss:$8 sps:$4 sm:$0xff]  }
 0x5f0   :  { %6078 = vmatpush1.bf16.msra.mxu1 %v9372_v63  ;;  %v9460_v63 = vld [vmem:[%s12276_s8 + $0xe50] ss:$8 sps:$4 sm:$0xff]  }
 0x5f1   :  { %6079 = vmatprep.subr.bf16.mxu1 %v9380_v41  ;;  %v9465_v41 = vld [vmem:[%s12276_s8 + $0xe64] ss:$8 sps:$4 sm:$0xff]  }
 0x5f2   :  { %6365 = vmatpush1.bf16.msra.mxu0 %v9375_v1  ;;  %v9463_v1 = vld [vmem:[%s12276_s8 + $0xe60] ss:$8 sps:$4 sm:$0xff]  }
 0x5f3   :  { %6366 = vmatprep.subr.bf16.mxu0 %v9383_v2  ;;  %v9468_v2 = vld [vmem:[%s12276_s8 + $0xe74] ss:$8 sps:$4 sm:$0xff]  }
 0x5f4   :  { %6080 = vmatpush1.bf16.msra.mxu1 %v9378_v57  ;;  %v9466_v57 = vld [vmem:[%s12276_s8 + $0xe70] ss:$8 sps:$4 sm:$0xff]  }
 0x5f5   :  { %6081 = vmatprep.subr.bf16.mxu1 %v9386_v22  ;;  %v9471_v22 = vld [vmem:[%s12276_s8 + $0xe84] ss:$8 sps:$4 sm:$0xff]  }
 0x5f6   :  { %6367 = vmatpush1.bf16.msra.mxu0 %v9381_v30  ;;  %v9469_v30 = vld [vmem:[%s12276_s8 + $0xe80] ss:$8 sps:$4 sm:$0xff]  }
 0x5f7   :  { %6368 = vmatprep.subr.bf16.mxu0 %v9389_v31  ;;  %v9474_v31 = vld [vmem:[%s12276_s8 + $0xe94] ss:$8 sps:$4 sm:$0xff]  }
 0x5f8   :  { %6082 = vmatpush1.bf16.msra.mxu1 %v9384_v34  ;;  %v9472_v34 = vld [vmem:[%s12276_s8 + $0xe90] ss:$8 sps:$4 sm:$0xff]  }
 0x5f9   :  { %6083 = vmatprep.subr.bf16.mxu1 %v9392_v32  ;;  %v9477_v32 = vld [vmem:[%s12276_s8 + $0xea4] ss:$8 sps:$4 sm:$0xff]  }
 0x5fa   :  { %6369 = vmatpush1.bf16.msra.mxu0 %v9387_v33  ;;  %v9475_v33 = vld [vmem:[%s12276_s8 + $0xea0] ss:$8 sps:$4 sm:$0xff]  }
 0x5fb   :  { %6370 = vmatprep.subr.bf16.mxu0 %v9395_v42  ;;  %v9480_v42 = vld [vmem:[%s12276_s8 + $0xeb4] ss:$8 sps:$4 sm:$0xff]  }
 0x5fc   :  { %6084 = vmatpush1.bf16.msra.mxu1 %v9390_v50  ;;  %v9478_v50 = vld [vmem:[%s12276_s8 + $0xeb0] ss:$8 sps:$4 sm:$0xff]  }
 0x5fd   :  { %6085 = vmatprep.subr.bf16.mxu1 %v9398_v44  ;;  %v9483_v44 = vld [vmem:[%s12276_s8 + $0xec4] ss:$8 sps:$4 sm:$0xff]  }
 0x5fe   :  { %6371 = vmatpush1.bf16.msra.mxu0 %v9393_v52  ;;  %v9481_v52 = vld [vmem:[%s12276_s8 + $0xec0] ss:$8 sps:$4 sm:$0xff]  }
 0x5ff   :  { %6372 = vmatprep.subr.bf16.mxu0 %v9401_v35  ;;  %v9486_v35 = vld [vmem:[%s12276_s8 + $0xed4] ss:$8 sps:$4 sm:$0xff]  }
 0x600   :  { %6086 = vmatpush1.bf16.msra.mxu1 %v9396_v36  ;;  %v9484_v36 = vld [vmem:[%s12276_s8 + $0xed0] ss:$8 sps:$4 sm:$0xff]  }
 0x601   :  { %6087 = vmatprep.subr.bf16.mxu1 %v9404_v60  ;;  %v9489_v60 = vld [vmem:[%s12276_s8 + $0xee4] ss:$8 sps:$4 sm:$0xff]  }
 0x602   :  { %6373 = vmatpush1.bf16.msra.mxu0 %v9399_v38  ;;  %v9487_v38 = vld [vmem:[%s12276_s8 + $0xee0] ss:$8 sps:$4 sm:$0xff]  }
 0x603   :  { %6374 = vmatprep.subr.bf16.mxu0 %v9407_v5  ;;  %v9492_v5 = vld [vmem:[%s12276_s8 + $0xef4] ss:$8 sps:$4 sm:$0xff]  }
 0x604   :  { %6088 = vmatpush1.bf16.msra.mxu1 %v9402_v6  ;;  %v12045_v6 = vld [vmem:[#allocation2 + $0x78] sm:$0xff] }
 0x605   :  { %6089 = vmatprep.subr.bf16.mxu1 %v9410_v18  ;;  %v9490_v18 = vld [vmem:[%s12276_s8 + $0xef0] ss:$8 sps:$4 sm:$0xff]  }
 0x606   :  { %6375 = vmatpush1.bf16.msra.mxu0 %v9405_v9  ;;  %v9495_v9 = vld [vmem:[%s12276_s8 + $0xf04] ss:$8 sps:$4 sm:$0xff]  }
 0x607   :  { %6376 = vmatprep.subr.bf16.mxu0 %v9413_v4  ;;  %v2690_v4 = vcombine.high %v12045_v6, %v12045_v6 }
 0x608   :  { %6090 = vmatpush1.bf16.msra.mxu1 %v9408_v13  ;;  %v9493_v13 = vld [vmem:[%s12276_s8 + $0xf00] ss:$8 sps:$4 sm:$0xff]  }
 0x609   :  { %6091 = vmatprep.subr.bf16.mxu1 %v9416_v3  ;;  %v2735_v3 = vpack.c.bf16 %v11941_v7, %v11941_v7  ;;  %v6513_v7 = vld [vmem:[%s12304_s24] sm:$0xf] }
 0x60a   :  { %6377 = vmatpush1.bf16.msra.mxu0 %v9411_v28  ;;  %v9499_v28 = vld [vmem:[%s12276_s8 + $0xf14] ss:$8 sps:$4 sm:$0xff]  }
 0x60b   :  { %6378 = vmatprep.subr.bf16.mxu0 %v9419_v48  ;;  %v2738_v48 = vpack.c.bf16 %v2690_v4, %v2690_v4  ;;  %v6491_v4 = vld [vmem:[#allocation3 + $0x50] sm:$0xff] }
 0x60c   :  { %6092 = vmatpush1.bf16.msra.mxu1 %v9414_v61  ;;  %v9497_v61 = vld [vmem:[%s12276_s8 + $0xf10] ss:$8 sps:$4 sm:$0xff]  }
 0x60d   :  { %6093 = vmatprep.subr.bf16.mxu1 %v9422_v45  ;;  %v9502_v45 = vld [vmem:[%s12276_s8 + $0xf24] ss:$8 sps:$4 sm:$0xff]  }
 0x60e   :  { %6379 = vmatpush1.bf16.msra.mxu0 %v9417_v55  ;;  %v9500_v55 = vld [vmem:[%s12276_s8 + $0xf20] ss:$8 sps:$4 sm:$0xff]  }
 0x60f   :  { %6380 = vmatprep.subr.bf16.mxu0 %v9425_v46  ;;  %v9505_v46 = vld [vmem:[%s12276_s8 + $0xf34] ss:$8 sps:$4 sm:$0xff]  }
 0x610   :  { %6094 = vmatpush1.bf16.msra.mxu1 %v9420_v40  ;;  %v9503_v40 = vld [vmem:[%s12276_s8 + $0xf30] ss:$8 sps:$4 sm:$0xff]  }
 0x611   :  { %6095 = vmatprep.subr.bf16.mxu1 %v9428_v11  ;;  %v9508_v11 = vld [vmem:[%s12276_s8 + $0xf44] ss:$8 sps:$4 sm:$0xff]  }
 0x612   :  { %6381 = vmatpush1.bf16.msra.mxu0 %v9423_v17  ;;  %v9506_v17 = vld [vmem:[%s12276_s8 + $0xf40] ss:$8 sps:$4 sm:$0xff]  }
 0x613   :  { %6382 = vmatprep.subr.bf16.mxu0 %v9431_v59  ;;  %v9511_v59 = vld [vmem:[%s12276_s8 + $0xf54] ss:$8 sps:$4 sm:$0xff]  }
 0x614   :  { %6096 = vmatpush1.bf16.msra.mxu1 %v9426_v49  ;;  %v9509_v49 = vld [vmem:[%s12276_s8 + $0xf50] ss:$8 sps:$4 sm:$0xff]  }
 0x615   :  { %6097 = vmatprep.subr.bf16.mxu1 %v9434_v24  ;;  %v9514_v24 = vld [vmem:[%s12276_s8 + $0xf64] ss:$8 sps:$4 sm:$0xff]  }
 0x616   :  { %6383 = vmatpush1.bf16.msra.mxu0 %v9429_v47  ;;  %v9512_v47 = vld [vmem:[%s12276_s8 + $0xf60] ss:$8 sps:$4 sm:$0xff]  }
 0x617   :  { %6384 = vmatprep.subr.bf16.mxu0 %v9437_v21  ;;  %v9517_v21 = vld [vmem:[%s12276_s8 + $0xf74] ss:$8 sps:$4 sm:$0xff]  }
 0x618   :  { %6098 = vmatpush1.bf16.msra.mxu1 %v9432_v51  ;;  %v6514_v51 = vld [vmem:[%s12279_s11] sm:$0xf] }
 0x619   :  { %6099 = vmatprep.subr.bf16.mxu1 %v9440_v29  ;;  %v6497_v29 = vld [vmem:[#allocation3 + $0x80] sm:$0xff] }
 0x61a   :  { %6385 = vmatpush1.bf16.msra.mxu0 %v9435_v8  ;;  %v6498_v8 = vld [vmem:[#allocation3 + $0x88] sm:$0xff] }
 0x61b   :  { %6386 = vmatprep.subr.bf16.mxu0 %v9443_v23  ;;  %v9638_v23 = vmov 0.0  }
 0x61c   :  { %6100 = vmatpush1.bf16.msra.mxu1 %v9438_v25  ;;  %v8460_v25 = vpack.c.bf16 %v6498_v8, %v6497_v29 }
 0x61d   :  { %8196 = vmatprep.subr.mxu1 %v9638_v23 }
 0x61e   :  { %6387 = vmatpush1.bf16.msra.mxu0 %v9441_v12  ;;  %v6481_v12 = vld [vmem:[#allocation3] sm:$0xff] }
 0x61f   :  { %6102 = vmatmul.mubr.bf16.vlgmr.msra.gmra.mrb[32].mxu1 %v2719_v0  ;;  %6397 = vmatprep.subr.bf16.mxu0 %v9446_v26  ;;  %v6482_v26 = vld [vmem:[#allocation3 + $0x8] sm:$0xff]  ;;  %v6499_v0 = vld [vmem:[#allocation3 + $0x90] sm:$0xff] }
 0x620   :  { %8197 = vmatpush3.msk.msra.mxu1 %vm184_vm0, %v6514_v51  ;;  %v8462_v27 = vpack.c.bf16 %v6482_v26, %v6481_v12  ;;  %8198 = vmatprep.mubr.msk.f32.mxu1 %vm9639_vm13, %v9638_v23  ;;  %v6511_v26 = vld [vmem:[#allocation3 + $0xf0] sm:$0xff]  ;;  %vm6764_vm0 = vcmp.lt.s32.totalorder %v10018_v20, 2 }
 0x621   :  { %6389 = vmatmul.mubr.bf16.vlgmr.msra.gmra.mrb[32].mxu0 %v2733_v16  ;;  %v6483_v16 = vld [vmem:[#allocation3 + $0x10] sm:$0xff]  ;;  %8461 = vmatprep.subr.bf16.mxu1 %v8460_v25  ;;  %v6493_v25 = vld [vmem:[#allocation3 + $0x60] sm:$0xff] }
 0x622   :  { %6398 = vmatpush1.bf16.msra.mxu0 %v9444_v15  ;;  %6429 = vmatprep.mubr.bf16.mxu0 %v2736_v14  ;;  %v6500_v15 = vld [vmem:[#allocation3 + $0x98] sm:$0xff] }
 0x623   :  { %6399 = vmatprep.subr.bf16.mxu0 %v9450_v19  ;;  %v8464_v19 = vpack.c.bf16 %v6500_v15, %v6499_v0  ;;  %v6484_v14 = vld [vmem:[#allocation3 + $0x18] sm:$0xff]  ;;  %v6495_v0 = vld [vmem:[#allocation3 + $0x70] sm:$0xff] }
 0x626   :  { %6400 = vmatpush1.bf16.msra.mxu0 %v9448_v37  ;;  %v6501_v37 = vld [vmem:[#allocation3 + $0xa0] sm:$0xff] }
 0x627   :  { %6401 = vmatprep.subr.bf16.mxu0 %v9453_v43  ;;  %v6502_v43 = vld [vmem:[#allocation3 + $0xa8] sm:$0xff]  ;;  %8199 = vmatmul.mubr.msk.f32.vlgmr.msra.gmra.mrb[36].mxu1 %vm6515_vm12, %v6513_v7 }
 0x628   :  { %8463 = vmatpush3.bf16.msra.mxu1 %v8462_v27  ;;  %v6494_v7 = vld [vmem:[#allocation3 + $0x68] sm:$0xff]  ;;  %v6512_v27 = vld [vmem:[#allocation3 + $0xf8] sm:$0xff] }
 0x629   :  { %8465 = vmatprep.subr.bf16.mxu1 %v8464_v19  ;;  %v8486_v12 = vpack.c.bf16 %v6494_v7, %v6493_v25  ;;  %v8488_v15 = vpack.c.bf16 %v6512_v27, %v6511_v26  ;;  %v7658_v25 = vld [vmem:[%s12280_s12] ss:$0 sm:$0xff]  ;;  %s9641_s12 = smov [#allocation7]  }
 0x62a   :  { %6402 = vmatpush1.bf16.msra.mxu0 %v9451_v58  ;;  %v9515_v58 = vld [vmem:[%s12276_s8 + $0xf70] ss:$8 sps:$4 sm:$0xff]  }
 0x62b   :  { %6403 = vmatprep.subr.bf16.mxu0 %v9456_v56  ;;  %v8466_v56 = vpack.c.bf16 %v6484_v14, %v6483_v16  ;;  %v6496_v16 = vld [vmem:[#allocation3 + $0x78] sm:$0xff]  ;;  %v9640_v14 = vmov 0.0|0.0  }
 0x62c   :  { %v8490_v19 = vpack.c.bf16 %v6496_v16, %v6495_v0  ;;  %v7659_v0 = vld [vmem:[%s12282_s14] ss:$0 sm:$0xff]  ;;  %s9642_s14 = smov [#allocation6]  }
 0x62d   :  { %8467 = vmatpush3.bf16.msra.mxu1 %v8466_v56  ;;  %v3251_v56 = vld [vmem:[%s12277_s9] sm:$0x3]  ;;  %s6809_s1 = sshll.u32 %s9642_s14, 4  ;;  %s6810_s1 = int_to_ptr.vmem [resolvable:$true] %s6809_s1 }
 0x62e   :  { %6404 = vmatpush1.bf16.msra.mxu0 %v9454_v39  ;;  %v9520_v39 = vld [vmem:[%s12276_s8 + $0xf84] ss:$8 sps:$4 sm:$0xff]  }
 0x62f   :  { %6405 = vmatprep.subr.bf16.mxu0 %v9459_v54  ;;  %v8468_v54 = vpack.c.bf16 %v6502_v43, %v6501_v37  ;;  %v3254_v43 = vshrl.u32 %v120_v10, 7  ;;  %v6672_v10 = vld [vmem:[%s12281_s13 + $0x8] sm:$0xff] }
 0x631   :  { %8469 = vmatprep.subr.bf16.mxu1 %v8468_v54 }
 0x632   :  { %6406 = vmatpush1.bf16.msra.mxu0 %v9457_v62  ;;  %v6485_v62 = vld [vmem:[#allocation3 + $0x20] sm:$0xff] }
 0x633   :  { %6407 = vmatprep.subr.bf16.mxu0 %v9462_v53  ;;  %v6486_v53 = vld [vmem:[#allocation3 + $0x28] sm:$0xff] }
 0x636   :  { %6408 = vmatpush1.bf16.msra.mxu0 %v9460_v63  ;;  %v6503_v63 = vld [vmem:[#allocation3 + $0xb0] sm:$0xff] }
 0x637   :  { %6409 = vmatprep.subr.bf16.mxu0 %v9465_v41  ;;  %v6504_v41 = vld [vmem:[#allocation3 + $0xb8] sm:$0xff] }
 0x63a   :  { %6410 = vmatpush1.bf16.msra.mxu0 %v9463_v1  ;;  %v9518_v1 = vld [vmem:[%s12276_s8 + $0xf80] ss:$8 sps:$4 sm:$0xff]  }
 0x63b   :  { %6411 = vmatprep.subr.bf16.mxu0 %v9468_v2  ;;  %v8470_v2 = vpack.c.bf16 %v6486_v53, %v6485_v62 }
 0x63d   :  { %8471 = vmatpush3.bf16.msra.mxu1 %v8470_v2 }
 0x63e   :  { %6412 = vmatpush1.bf16.msra.mxu0 %v9466_v57  ;;  %v9523_v57 = vld [vmem:[%s12276_s8 + $0xf94] ss:$8 sps:$4 sm:$0xff]  }
 0x63f   :  { %6413 = vmatprep.subr.bf16.mxu0 %v9471_v22  ;;  %v8472_v22 = vpack.c.bf16 %v6504_v41, %v6503_v63 }
 0x641   :  { %8473 = vmatprep.subr.bf16.mxu1 %v8472_v22 }
 0x642   :  { %6414 = vmatpush1.bf16.msra.mxu0 %v9469_v30  ;;  %v6487_v30 = vld [vmem:[#allocation3 + $0x30] sm:$0xff] }
 0x643   :  { %6415 = vmatprep.subr.bf16.mxu0 %v9474_v31  ;;  %v6488_v31 = vld [vmem:[#allocation3 + $0x38] sm:$0xff] }
 0x646   :  { %6416 = vmatpush1.bf16.msra.mxu0 %v9472_v34  ;;  %v6505_v34 = vld [vmem:[#allocation3 + $0xc0] sm:$0xff] }
 0x647   :  { %6417 = vmatprep.subr.bf16.mxu0 %v9477_v32  ;;  %v6506_v32 = vld [vmem:[#allocation3 + $0xc8] sm:$0xff] }
 0x64a   :  { %6418 = vmatpush1.bf16.msra.mxu0 %v9475_v33  ;;  %v9521_v33 = vld [vmem:[%s12276_s8 + $0xf90] ss:$8 sps:$4 sm:$0xff]  }
 0x64b   :  { %6419 = vmatprep.subr.bf16.mxu0 %v9480_v42  ;;  %v8474_v42 = vpack.c.bf16 %v6488_v31, %v6487_v30 }
 0x64d   :  { %8475 = vmatpush3.bf16.msra.mxu1 %v8474_v42  ;;  %v6673_v42 = vld [vmem:[%s12281_s13 + $0x10] sm:$0xff] }
 0x64e   :  { %6420 = vmatpush1.bf16.msra.mxu0 %v9478_v50  ;;  %v9526_v50 = vld [vmem:[%s12276_s8 + $0xfa4] ss:$8 sps:$4 sm:$0xff]  }
 0x64f   :  { %6421 = vmatprep.subr.bf16.mxu0 %v9483_v44  ;;  %v8476_v44 = vpack.c.bf16 %v6506_v32, %v6505_v34 }
 0x651   :  { %8477 = vmatprep.subr.bf16.mxu1 %v8476_v44 }
 0x652   :  { %6422 = vmatpush1.bf16.msra.mxu0 %v9481_v52  ;;  %v6489_v52 = vld [vmem:[#allocation3 + $0x40] sm:$0xff] }
 0x653   :  { %6423 = vmatprep.subr.bf16.mxu0 %v9486_v35  ;;  %v6490_v35 = vld [vmem:[#allocation3 + $0x48] sm:$0xff] }
 0x656   :  { %6424 = vmatpush1.bf16.msra.mxu0 %v9484_v36  ;;  %v6507_v36 = vld [vmem:[#allocation3 + $0xd0] sm:$0xff] }
 0x657   :  { %6425 = vmatprep.subr.bf16.mxu0 %v9489_v60  ;;  %v6508_v60 = vld [vmem:[#allocation3 + $0xd8] sm:$0xff] }
 0x65a   :  { %6426 = vmatpush1.bf16.msra.mxu0 %v9487_v38  ;;  %v9524_v38 = vld [vmem:[%s12276_s8 + $0xfa0] ss:$8 sps:$4 sm:$0xff]  }
 0x65b   :  { %6427 = vmatprep.subr.bf16.mxu0 %v9492_v5  ;;  %v8478_v5 = vpack.c.bf16 %v6490_v35, %v6489_v52  ;;  %v6675_v52 = vld [vmem:[%s12281_s13 + $0x20] sm:$0xff]  ;;  %v6676_v35 = vld [vmem:[%s12281_s13 + $0x28] sm:$0xff] }
 0x65d   :  { %8479 = vmatpush3.bf16.msra.mxu1 %v8478_v5  ;;  %v6679_v5 = vld [vmem:[%s12281_s13 + $0x40] sm:$0xff] }
 0x65e   :  { %6428 = vmatpush1.bf16.msra.mxu0 %v9490_v18  ;;  %v9529_v18 = vld [vmem:[%s12276_s8 + $0xfb4] ss:$8 sps:$4 sm:$0xff]  }
 0x65f   :  { %6438 = vmatprep.subr.bf16.mxu0 %v9495_v9  ;;  %v8480_v9 = vpack.c.bf16 %v6508_v60, %v6507_v36  ;;  %v8499_v36 = vpack.c.bf16 %v6676_v35, %v6675_v52  ;;  %v6677_v60 = vld [vmem:[%s12281_s13 + $0x30] sm:$0xff] }
 0x661   :  { %6430 = vmatmul.mubr.bf16.vlgmr.msra.gmra.mrb[32].mxu0 %v2735_v3  ;;  %v6509_v3 = vld [vmem:[#allocation3 + $0xe0] sm:$0xff]  ;;  %8481 = vmatprep.subr.bf16.mxu1 %v8480_v9 }
 0x662   :  { %6439 = vmatpush1.bf16.msra.mxu0 %v9493_v13  ;;  %6470 = vmatprep.mubr.bf16.mxu0 %v2738_v48  ;;  %v6492_v13 = vld [vmem:[#allocation3 + $0x58] sm:$0xff] }
 0x663   :  { %6440 = vmatprep.subr.bf16.mxu0 %v9499_v28  ;;  %v6510_v28 = vld [vmem:[#allocation3 + $0xe8] sm:$0xff]  ;;  %v9527_v48 = vld [vmem:[%s12276_s8 + $0xfb0] ss:$8 sps:$4 sm:$0xff]  }
 0x666   :  { %6441 = vmatpush1.bf16.msra.mxu0 %v9497_v61  ;;  %v8482_v61 = vpack.c.bf16 %v6492_v13, %v6491_v4  ;;  %v6681_v4 = vld [vmem:[%s12281_s13 + $0x50] sm:$0xff]  ;;  %v6682_v13 = vld [vmem:[%s12281_s13 + $0x58] sm:$0xff] }
 0x667   :  { %6442 = vmatprep.subr.bf16.mxu0 %v9502_v45  ;;  %v9532_v45 = vld [vmem:[%s12276_s8 + $0xfc4] ss:$8 sps:$4 sm:$0xff]  }
 0x668   :  { %8483 = vmatpush3.bf16.msra.mxu1 %v8482_v61 }
 0x66a   :  { %6443 = vmatpush1.bf16.msra.mxu0 %v9500_v55  ;;  %v8484_v55 = vpack.c.bf16 %v6510_v28, %v6509_v3  ;;  %v8508_v3 = vpack.c.bf16 %v6682_v13, %v6681_v4  ;;  %v6683_v28 = vld [vmem:[%s12281_s13 + $0x60] sm:$0xff] }
 0x66b   :  { %6444 = vmatprep.subr.bf16.mxu0 %v9505_v46  ;;  %v9530_v46 = vld [vmem:[%s12276_s8 + $0xfc0] ss:$8 sps:$4 sm:$0xff]  }
 0x66c   :  { %8485 = vmatprep.subr.bf16.mxu1 %v8484_v55  ;;  %v6686_v55 = vld [vmem:[%s12281_s13 + $0x78] sm:$0xff] }
 0x66d   :  { %8487 = vmatpush3.bf16.msra.mxu1 %v8486_v12 }
 0x66e   :  { %6445 = vmatpush1.bf16.msra.mxu0 %v9503_v40  ;;  %v9535_v40 = vld [vmem:[%s12276_s8 + $0xfd4] ss:$8 sps:$4 sm:$0xff]   ;;  %8489 = vmatprep.subr.bf16.mxu1 %v8488_v15 }
 0x66f   :  { %6446 = vmatprep.subr.bf16.mxu0 %v9508_v11  ;;  %v9533_v11 = vld [vmem:[%s12276_s8 + $0xfd0] ss:$8 sps:$4 sm:$0xff]  }
 0x671   :  { %8491 = vmatpush3.bf16.msra.mxu1 %v8490_v19 }
 0x672   :  { %6447 = vmatpush1.bf16.msra.mxu0 %v9506_v17  ;;  %v9538_v17 = vld [vmem:[%s12276_s8 + $0xfe4] ss:$8 sps:$4 sm:$0xff]   ;;  %8492 = vmatprep.subr.bf16.mxu1 %v9640_v14 }
 0x673   :  { %6448 = vmatprep.subr.bf16.mxu0 %v9511_v59  ;;  %v9536_v59 = vld [vmem:[%s12276_s8 + $0xfe0] ss:$8 sps:$4 sm:$0xff]  }
 0x676   :  { %6449 = vmatpush1.bf16.msra.mxu0 %v9509_v49  ;;  %v9541_v49 = vld [vmem:[%s12276_s8 + $0xff4] ss:$8 sps:$4 sm:$0xff]  }
 0x677   :  { %6450 = vmatprep.subr.bf16.mxu0 %v9514_v24  ;;  %v9539_v24 = vld [vmem:[%s12276_s8 + $0xff0] ss:$8 sps:$4 sm:$0xff]  }
 0x67a   :  { %6451 = vmatpush1.bf16.msra.mxu0 %v9512_v47  ;;  %v2737_v47 = vpack.c.bf16 %v12045_v6, %v12045_v6 }
 0x67b   :  { %6452 = vmatprep.subr.bf16.mxu0 %v9517_v21 }
 0x67e   :  { %6453 = vmatpush1.bf16.msra.mxu0 %v9515_v58  ;;  %v12166_v58 = vsub.s32 0, %v3254_v43 }
 0x67f   :  { %6454 = vmatprep.subr.bf16.mxu0 %v9520_v39  ;;  %v3259_v39 = vsub.s32 1, %v3254_v43 }
 0x680   :  { %v3256_v54 = vrot.slane %v3251_v56, %v12166_v58 }
 0x681   :  { %v3260_v62 = vrot.slane %v3251_v56, %v3259_v39 }
 0x682   :  { %6455 = vmatpush1.bf16.msra.mxu0 %v9518_v1 }
 0x683   :  { %6456 = vmatprep.subr.bf16.mxu0 %v9523_v57  ;;  %v6671_v57 = vld [vmem:[%s12281_s13] sm:$0xff] }
 0x684   :  { %v8493_v32 = vpack.c.bf16 %v6672_v10, %v6671_v57 }
 0x686   :  { %6457 = vmatpush1.bf16.msra.mxu0 %v9521_v33 }
 0x687   :  { %6458 = vmatprep.subr.bf16.mxu0 %v9526_v50  ;;  %v6674_v50 = vld [vmem:[%s12281_s13 + $0x18] sm:$0xff] }
 0x688   :  { %v8496_v44 = vpack.c.bf16 %v6674_v50, %v6673_v42 }
 0x68a   :  { %6459 = vmatpush1.bf16.msra.mxu0 %v9524_v38 }
 0x68b   :  { %6460 = vmatprep.subr.bf16.mxu0 %v9529_v18  ;;  %v6680_v18 = vld [vmem:[%s12281_s13 + $0x48] sm:$0xff] }
 0x68c   :  { %v8505_v9 = vpack.c.bf16 %v6680_v18, %v6679_v5 }
 0x68e   :  { %6461 = vmatpush1.bf16.msra.mxu0 %v9527_v48  ;;  %v6684_v48 = vld [vmem:[%s12281_s13 + $0x68] sm:$0xff] }
 0x68f   :  { %6462 = vmatprep.subr.bf16.mxu0 %v9532_v45  ;;  %v8511_v61 = vpack.c.bf16 %v6684_v48, %v6683_v28  ;;  %v6685_v45 = vld [vmem:[%s12281_s13 + $0x70] sm:$0xff] }
 0x692   :  { %6463 = vmatpush1.bf16.msra.mxu0 %v9530_v46  ;;  %v8514_v46 = vpack.c.bf16 %v6686_v55, %v6685_v45 }
 0x693   :  { %6464 = vmatprep.subr.bf16.mxu0 %v9535_v40  ;;  %v6773_v40 = vld [vmem:[%s12283_s15] sm:$0x1] }
 0x696   :  { %6465 = vmatpush1.bf16.msra.mxu0 %v9533_v11  ;;  %v6774_v11 = vld [vmem:[%s12284_s16] sm:$0xf] }
 0x697   :  { %6466 = vmatprep.subr.bf16.mxu0 %v9538_v17  ;;  %v6785_v17 = vmul.f32 -0.5, %v6774_v11 }
 0x69a   :  { %6467 = vmatpush1.bf16.msra.mxu0 %v9536_v59  ;;  %v6786_v59 = vmul.f32 %v6785_v17, %v6774_v11 }
 0x69b   :  { %6468 = vmatprep.subr.bf16.mxu0 %v9541_v49  ;;  %v6792_v49 = vrot.slane %v6773_v40, %v12166_v58 }
 0x69e   :  { %6469 = vmatpush1.bf16.msra.mxu0 %v9539_v24  ;;  %v7661_v24 = vadd.f32 -0.9189385, %v6786_v59 }
 0x6a1   :  { %6471 = vmatmul.mubr.bf16.vlgmr.msra.gmra.mrb[32].mxu0 %v2737_v47  ;;  %v6794_v47 = vsub.f32 %v7661_v24, %v6792_v49 }
 0x6f2   :  { %v6103_v21 = vpop.f32.mrb[32].mxu1 }
 0x6f3   :  { %v6105_v51 = vpop.f32.mrb[33].mxu1  ;;  %v8532_v53 = vadd.f32 %v6103_v21, %v3256_v54  ;;  %v6797_v21 = vsel %vm6795_vm14, %v6794_v47, 0.0 }
 0x6f4   :  { %v6107_v29 = vpop.f32.mrb[34].mxu1  ;;  %v8534_v63 = vadd.f32 %v6105_v51, %v3260_v62  ;;  %6798 = vadd.xlane.f32.xlu1 %v6797_v21 }
 0x6f5   :  { %v6108_v8 = vpop.f32.mrb[35].mxu1 }
 0x6fa   :  { %v12163_v6 = vpop.f32.mrb[36].mxu1 }
 0x6fb   :  { %v8200_v37 = vpop.f32.mrb[37].mxu1 }
 0x6fc   :  { %v6775_v37 = vmul.f32 1.442695, %v6773_v40 }
 0x774   :  { %v6472_v41 = vpop.f32.mrb[32].mxu0 }
 0x775   :  { %v8533_v1 = vadd.f32 %v8532_v53, %v6472_v41  ;;  %v6474_v2 = vpop.f32.mrb[33].mxu0 }
 0x776   :  { %v8535_v22 = vadd.f32 %v8534_v63, %v6474_v2  ;;  %v6476_v30 = vpop.f32.mrb[34].mxu0 }
 0x777   :  { %v6477_v31 = vpop.f32.mrb[35].mxu0  ;;  %v6479_v33 = vmax.f32 %v8533_v1, 0.0 }
 0x778   :  { %v6480_v34 = vmax.f32 %v8535_v22, 0.0 }
 0x77a   :  { %6656 = vmatprep.mubr.f32.mxu1 %v6480_v34 }
 0x77b   :  { %6657 = vmatmul.mubr.f32.vlgmr.msra.gmra.mrb[38].mxu1 %v6479_v33 }
 0x77c   :  { %8494 = vmatpush3.bf16.msra.mxu1 %v8493_v32  ;;  %8233 = vmatprep.mubr.msk.f32.mxu1 %vm9639_vm13, %v9638_v23  ;;  %v6678_v23 = vld [vmem:[%s12281_s13 + $0x38] sm:$0xff] }
 0x77d   :  { %8495 = vmatprep.subr.bf16.mxu1 %v9640_v14  ;;  %v8502_v38 = vpack.c.bf16 %v6678_v23, %v6677_v60 }
 0x780   :  { %8497 = vmatpush3.bf16.msra.mxu1 %v8496_v44 }
 0x781   :  { %8498 = vmatprep.subr.bf16.mxu1 %v9640_v14  ;;  %v6799_v27 = vpop.xlane.xlu1 %6798 }
 0x782   :  { %6801 = vst.msk [vmem:[%s12286_s18] sm:$0xf] %vm6800_vm15, %v6799_v27  ;;  %s6821_s18 = sshll.u32 %s9641_s12, 4  ;;  %s6822_s18 = int_to_ptr.vmem [resolvable:$true] %s6821_s18 }
 0x783   :  { %s9581_s22 = scalar_lea.vmem %s6822_s18, 64  ;;  %p9586_p9 = scmp.lt.s32.totalorder %s6822_s18, %s6822_s18 }
 0x784   :  { %8500 = vmatpush3.bf16.msra.mxu1 %v8499_v36  ;;  %p9582_p8 = scmp.ne.s32.totalorder %s6822_s18, %s9581_s22  ;;  %p9587_p10 = scmp.lt.s32.totalorder %s9581_s22, %s9581_s22 }
 0x785   :  { %8501 = vmatprep.subr.bf16.mxu1 %v9640_v14 }
 0x786   :  { %p9588_p11 = por %p9587_p10, %p9586_p9 }
 0x788   :  { %8503 = vmatpush3.bf16.msra.mxu1 %v8502_v38  ;;  %p9589_p12 = pnand %p9588_p11, %p9582_p8 }
 0x789   :  { %8504 = vmatprep.subr.bf16.mxu1 %v9640_v14 }
 0x78c   :  { %8506 = vmatpush3.bf16.msra.mxu1 %v8505_v9 }
 0x78d   :  { %8507 = vmatprep.subr.bf16.mxu1 %v9640_v14 }
 0x790   :  { %8509 = vmatpush3.bf16.msra.mxu1 %v8508_v3 }
 0x791   :  { %8510 = vmatprep.subr.bf16.mxu1 %v9640_v14 }
 0x794   :  { %8512 = vmatpush3.bf16.msra.mxu1 %v8511_v61 }
 0x795   :  { %8513 = vmatprep.subr.bf16.mxu1 %v9640_v14 }
 0x798   :  { %8515 = vmatpush3.bf16.msra.mxu1 %v8514_v46 }
 0x84e   :  { %v7872_v51 = vpop.f32.mrb[38].mxu1 }
 0x84f   :  { %v7873_v29 = vpop.f32.mrb[39].mxu1 }
 0x850   :  { %v7874_v8 = vadd.f32 %v7873_v29, %v7872_v51 }
 0x852   :  { %v6659_v7 = vadd.f32 %v7874_v8, %v12163_v6 }
 0x854   :  { %v6669_v12 = vadd.f32 %v7658_v25, %v6659_v7 }
 0x856   :  { %v6670_v26 = vmax.f32 %v6669_v12, 0.0 }
 0x858   :  { %8234 = vmatmul.mubr.f32.vlgmr.msra.gmra.mrb[40].mxu1 %v6670_v26 }
 0x92b   :  { %v6760_v15 = vpop.f32.mrb[40].mxu1 }
 0x92c   :  { %v6761_v16 = vadd.f32 %v7659_v0, %v6760_v15  ;;  %v8235_v19 = vpop.f32.mrb[41].mxu1 }
 0x92e   :  { %v7660_v14 = vmul.f32 -1.442695, %v6761_v16 }
 0x930   :  { %9542 = vpow2.f32 %v7660_v14 }
 0x931   :  { %9544 = vpow2.f32 %v6775_v37 }
 0x932   :  { %9546 = vtanh.f32 %v6761_v16 }
 0x93a   :  { %v9543_v6 = vpop.eup %9542 }
 0x93b   :  { %v6768_v43 = vadd.f32 1.0, %v9543_v6  ;;  %v9545_v56 = vpop.eup %9544 }
 0x93c   :  { %v6781_v39 = vrot.slane %v9545_v56, %v12166_v58  ;;  %v9547_v62 = vpop.eup %9546 }
 0x93d   :  { %9548 = vrcp.f32 %v6768_v43 }
 0x93e   :  { %v6783_v54 = vmul.f32 %v6781_v39, %v6774_v11 }
 0x947   :  { %v9549_v53 = vpop.eup %9548 }
 0x948   :  { %v6772_v63 = vsel %vm6764_vm0, %v9549_v53, %v9547_v62 }
 0x949   :  { %v6784_v41 = vadd.f32 %v6783_v54, %v6772_v63  ;;  %6802 = vst.msk [vmem:[#allocation7] sm:$0xf] %vm6795_vm14, %v6772_v63 }
 0x94a   :  { %9592 = shalt.err (!%p9589_p12)
}
 0x94b   :  { %s9593_s28 = scalar_lea.hbm %s12287_s19, 64 }
 0x94c   :  { %p9594_p13 = scmp.ne.s32.totalorder %s12287_s19, %s9593_s28  ;;  %p9597_p0 = scmp.lt.u32.totalorder %s9593_s28, %s12287_s19 }
 0x94e   :  { %p9599_p1 = pnand %p9597_p0, %p9594_p13 }
 0x950   :  { %9602 = shalt.err (!%p9599_p1)
}
 0x951   :  { %6824 = dma.vmem_to_hbm [thread:$0]  %s6822_s18, 64, %s12287_s19, [#allocation8]   ;;  %6796 = vst.msk [vmem:[#allocation6] sm:$0xf] %vm6795_vm14, %v6784_v41 }
 0x952   :  { %s9603_s9 = scalar_lea.vmem %s6810_s1, 64  ;;  %p9608_p3 = scmp.lt.s32.totalorder %s6810_s1, %s6810_s1 }
 0x953   :  { %p9604_p2 = scmp.ne.s32.totalorder %s6810_s1, %s9603_s9  ;;  %p9609_p4 = scmp.lt.s32.totalorder %s9603_s9, %s9603_s9 }
 0x955   :  { %p9610_p5 = por %p9609_p4, %p9608_p3 }
 0x957   :  { %p9611_p6 = pnand %p9610_p5, %p9604_p2 }
 0x959   :  { %9614 = shalt.err (!%p9611_p6)
}
 0x95a   :  { %s9615_s24 = scalar_lea.hbm %s12285_s17, 64 }
 0x95b   :  { %p9616_p7 = scmp.ne.s32.totalorder %s12285_s17, %s9615_s24  ;;  %p9619_p8 = scmp.lt.u32.totalorder %s9615_s24, %s12285_s17 }
 0x95d   :  { %p9621_p9 = pnand %p9619_p8, %p9616_p7 }
 0x95f   :  { %9624 = shalt.err (!%p9621_p9)
}
 0x960   :  { %6812 = dma.vmem_to_hbm [thread:$0]  %s6810_s1, 64, %s12285_s17, [#allocation5]  }
 0x961   :  { %9627 = dma.done.wait [#allocation5], 64  }
 0x962   :  { %9628 = vsyncadd [#allocation5], 4294967232 }
 0x963   :  { %9629 = dma.done.wait [#allocation8], 64  }
 0x964   :  { %9630 = vsyncadd [#allocation8], 4294967232 }
 0x965   :  { %6833 = vsyncpa [#allocation4], 1 }
 0x966   :  { %6834 = vsyncpa [#allocation5], 1 }
 0x967   :  { %6835 = vsyncpa [#allocation8], 1 }

</bundles_post_ra>
